<compile_context>
chip_gen: v6e
topology: v6e:2x2x1
jax: 0.10.0
libtpu: 0.0.40
codegen_flags: <defaults>
</compile_context>

<pallas_src>
import functools

import jax
import jax.numpy as jnp
from jax import lax
from jax.experimental import pallas as pl
from jax.experimental.pallas import tpu as pltpu

EPS = 1e-5
_MXU_DTYPE = jnp.bfloat16


# ---------------------------------------------------------------------------
# Kernel A: fused 1x1 conv (matmul over flattened N*H*W rows) + bias (+ReLU)
# optionally fused with the residual add of the bottleneck output.
# ---------------------------------------------------------------------------
def _pw_kernel(x_ref, w_ref, b_ref, o_ref, *, relu):
    acc = jnp.dot(x_ref[...], w_ref[...], preferred_element_type=jnp.float32)
    out = acc + b_ref[...]
    if relu:
        out = jnp.maximum(out, 0.0)
    o_ref[...] = out.astype(o_ref.dtype)


def _pw_res_kernel(x_ref, w_ref, b_ref, r_ref, o_ref, *, relu):
    acc = jnp.dot(x_ref[...], w_ref[...], preferred_element_type=jnp.float32)
    out = acc + b_ref[...] + r_ref[...].astype(jnp.float32)
    if relu:
        out = jnp.maximum(out, 0.0)
    o_ref[...] = out.astype(o_ref.dtype)


def _pick_row_tile(M, target=512):
    """Largest row tile <= target. Returns (tile, row_padding)."""
    if M <= target:
        return M, 0
    for t in (512, 256, 128, 64, 32, 16, 8):
        if M % t == 0:
            return t, 0
    return 256, (-M) % 256     # remainder path: pad rows, slice result


def pointwise_conv_bias(x_flat, w, bias, *, relu, residual=None,
                        out_dtype=_MXU_DTYPE):
    """y = [relu](x @ w + bias [+ residual]).  x:(M,Cin) bf16, w:(Cin,Cout) bf16."""
    M, cin = x_flat.shape
    cout = w.shape[1]
    tm, pad = _pick_row_tile(M)
    if pad:
        x_flat = jnp.pad(x_flat, ((0, pad), (0, 0)))
        if residual is not None:
            residual = jnp.pad(residual, ((0, pad), (0, 0)))
    Mp = M + pad
    grid = (Mp // tm,)
    bias2 = bias.reshape(1, cout).astype(jnp.float32)

    row_in = pl.BlockSpec((tm, cin), lambda i: (i, 0))
    row_out = pl.BlockSpec((tm, cout), lambda i: (i, 0))
    full_w = pl.BlockSpec((cin, cout), lambda i: (0, 0))
    full_b = pl.BlockSpec((1, cout), lambda i: (0, 0))

    if residual is None:
        kernel = functools.partial(_pw_kernel, relu=relu)
        in_specs = [row_in, full_w, full_b]
        args = (x_flat, w, bias2)
    else:
        kernel = functools.partial(_pw_res_kernel, relu=relu)
        in_specs = [row_in, full_w, full_b, row_out]
        args = (x_flat, w, bias2, residual)

    out = pl.pallas_call(
        kernel,
        out_shape=jax.ShapeDtypeStruct((Mp, cout), out_dtype),
        grid_spec=pltpu.PrefetchScalarGridSpec(
            num_scalar_prefetch=0,
            grid=grid,
            in_specs=in_specs,
            out_specs=row_out,
        ),
        compiler_params=pltpu.CompilerParams(
            dimension_semantics=("parallel",)),
    )(*args)
    return out[:M] if pad else out


# ---------------------------------------------------------------------------
# Kernel B: fused 3x3 conv (stride, pad=1) + bias + ReLU.
# Grid = (batch, output-row tile). Each step computes TR output rows so every
# tap is a (TR*Wo, Cin) x (Cin, Cout) bf16 matmul that actually fills the MXU.
# ---------------------------------------------------------------------------
def _conv3x3_kernel(xp_ref, w_ref, b_ref, o_ref, *, stride, TR, Wo):
    t = pl.program_id(1)
    cin = w_ref.shape[1]
    cout = w_ref.shape[2]
    band_rows = (TR - 1) * stride + 1
    y0 = t * (TR * stride)                      # top row (in padded image)
    acc = jnp.zeros((TR, Wo, cout), jnp.float32)
    for dy in range(3):
        band = xp_ref[0, pl.ds(y0 + dy, band_rows)]      # (band_rows, Wp, Cin)
        for dx in range(3):
            if stride == 1:
                patch = band[:, dx:dx + Wo, :]           # (TR, Wo, Cin)
            else:
                patch = lax.slice(
                    band, (0, dx, 0),
                    (band_rows, dx + (Wo - 1) * stride + 1, cin),
                    (stride, stride, 1))
            acc = acc + lax.dot_general(
                patch, w_ref[dy * 3 + dx],
                dimension_numbers=(((2,), (0,)), ((), ())),
                preferred_element_type=jnp.float32)
    out = jnp.maximum(acc + b_ref[...], 0.0)
    o_ref[...] = out.reshape(1, TR, Wo, cout).astype(o_ref.dtype)


def _pick_row_block(Ho, Wo, target_rows=512):
    tr = 1
    for d in range(1, Ho + 1):
        if Ho % d == 0 and d * Wo <= target_rows:
            tr = d
    return tr


def conv3x3_bias_relu(x_nhwc, w9, bias, *, stride=1, out_dtype=_MXU_DTYPE):
    N, H, W, cin = x_nhwc.shape
    cout = w9.shape[2]
    Ho = (H + 2 - 3) // stride + 1
    Wo = (W + 2 - 3) // stride + 1
    # TODO(synk): the 1-pixel halo is still materialized with jnp.pad (one
    # extra bf16 activation HBM round trip); an in-kernel halo (masked taps or
    # scratch copy) would remove it.
    xp = jnp.pad(x_nhwc, ((0, 0), (1, 1), (1, 1), (0, 0)))
    Hp, Wp = H + 2, W + 2
    TR = _pick_row_block(Ho, Wo)
    bias2 = bias.reshape(1, cout).astype(jnp.float32)

    kernel = functools.partial(_conv3x3_kernel, stride=stride, TR=TR, Wo=Wo)
    return pl.pallas_call(
        kernel,
        out_shape=jax.ShapeDtypeStruct((N, Ho, Wo, cout), out_dtype),
        grid_spec=pltpu.PrefetchScalarGridSpec(
            num_scalar_prefetch=0,
            grid=(N, Ho // TR),
            in_specs=[
                pl.BlockSpec((1, Hp, Wp, cin), lambda n, t: (n, 0, 0, 0)),
                pl.BlockSpec((9, cin, cout), lambda n, t: (0, 0, 0)),
                pl.BlockSpec((1, cout), lambda n, t: (0, 0)),
            ],
            out_specs=pl.BlockSpec((1, TR, Wo, cout),
                                   lambda n, t: (n, t, 0, 0)),
        ),
        compiler_params=pltpu.CompilerParams(
            dimension_semantics=("parallel", "parallel")),
    )(xp, w9, bias2)


# ---------------------------------------------------------------------------
# Parameter init (deterministic) & BN folding
# ---------------------------------------------------------------------------
def _fold_bn(gamma, beta, mean, var):
    scale = gamma / jnp.sqrt(var + EPS)
    bias = beta - mean * scale
    return scale, bias


def init_params(key, in_planes, planes, stride):
    expansion = 4
    out_planes = expansion * planes
    keys = jax.random.split(key, 8)

    def bn(k, c):
        k1, k2, k3, k4 = jax.random.split(k, 4)
        gamma = jax.random.uniform(k1, (c,), jnp.float32, 0.5, 1.5)
        beta = 0.1 * jax.random.normal(k2, (c,), jnp.float32)
        mean = 0.1 * jax.random.normal(k3, (c,), jnp.float32)
        var = jax.random.uniform(k4, (c,), jnp.float32, 0.5, 1.5)
        return _fold_bn(gamma, beta, mean, var)

    p = {}
    # 1x1 conv weights stored as (Cin, Cout); 3x3 as (9 taps, Cin, Cout).
    p['w1'] = 0.3 * jax.random.normal(keys[0], (in_planes, planes), jnp.float32)
    p['s1'], p['b1'] = bn(keys[1], planes)
    p['w2'] = 0.3 * jax.random.normal(keys[2], (9, planes, planes), jnp.float32)
    p['s2'], p['b2'] = bn(keys[3], planes)
    p['w3'] = 0.3 * jax.random.normal(keys[4], (planes, out_planes), jnp.float32)
    p['s3'], p['b3'] = bn(keys[5], out_planes)
    if stride != 1 or in_planes != out_planes:
        p['w_sc'] = 0.3 * jax.random.normal(keys[6], (in_planes, out_planes),
                                            jnp.float32)
        p['s_sc'], p['b_sc'] = bn(keys[7], out_planes)
    return p


# ---------------------------------------------------------------------------
# Bottleneck forward (wrapper glue around the Pallas kernels)
# ---------------------------------------------------------------------------
def bottleneck_forward(x_nchw, params, *, stride=1):
    x = jnp.transpose(x_nchw, (0, 2, 3, 1))                 # NHWC
    x_bf = x.astype(_MXU_DTYPE)
    N, H, W, cin = x.shape
    planes = params['w1'].shape[1]
    out_planes = params['w3'].shape[1]

    # Fold BN scale into the conv weights (wrapper-side) and cast to bf16 for
    # the MXU. Biases stay f32 for the kernel epilogues.
    w1 = (params['w1'] * params['s1'][None, :]).astype(_MXU_DTYPE)
    w2 = (params['w2'] * params['s2'][None, None, :]).astype(_MXU_DTYPE)
    w3 = (params['w3'] * params['s3'][None, :]).astype(_MXU_DTYPE)

    # conv1 (1x1) + bn1 + relu
    out1 = pointwise_conv_bias(x_bf.reshape(N * H * W, cin), w1, params['b1'],
                               relu=True).reshape(N, H, W, planes)

    # conv2 (3x3, stride, pad=1) + bn2 + relu
    out2 = conv3x3_bias_relu(out1, w2, params['b2'], stride=stride)
    _, Ho, Wo, _ = out2.shape

    # shortcut (1x1 stride-s conv + bn, or identity)
    # TODO(synk): for stride>1 the spatial subsample is a wrapper-side slice;
    # fusing it into the shortcut kernel's index_map would drop one HBM pass.
    x_s = x_bf if stride == 1 else x_bf[:, ::stride, ::stride, :]
    if 'w_sc' in params:
        w_sc = (params['w_sc'] * params['s_sc'][None, :]).astype(_MXU_DTYPE)
        shortcut = pointwise_conv_bias(x_s.reshape(N * Ho * Wo, cin), w_sc,
                                       params['b_sc'], relu=False)
    else:
        assert cin == out_planes, "identity shortcut requires cin == out_planes"
        shortcut = x_s.reshape(N * Ho * Wo, out_planes)

    # conv3 (1x1) + bn3 + residual add + relu, fused; f32 block output
    out3 = pointwise_conv_bias(out2.reshape(N * Ho * Wo, planes), w3,
                               params['b3'], relu=True, residual=shortcut,
                               out_dtype=jnp.float32)
    out3 = out3.reshape(N, Ho, Wo, out_planes)
    return jnp.transpose(out3, (0, 3, 1, 2))                # back to NCHW


# ---------------------------------------------------------------------------
# References (verification only)
# ---------------------------------------------------------------------------
def _conv_nchw(x, w_oihw, s=1, pad=0):
    return lax.conv_general_dilated(
        x, w_oihw, window_strides=(s, s), padding=((pad, pad), (pad, pad)),
        dimension_numbers=('NCHW', 'OIHW', 'NCHW'),
        precision=lax.Precision.HIGHEST)


def bottleneck_ref_f32(x_nchw, params, *, stride=1):
    """Pure-f32 reference matching the PyTorch module (eval-mode BN)."""
    def bnb(x, s, b):
        return x * s.reshape(1, -1, 1, 1) + b.reshape(1, -1, 1, 1)
    w1 = params['w1'].T[:, :, None, None]
    w2 = jnp.transpose(params['w2'].reshape(3, 3, *params['w2'].shape[1:]),
                       (3, 2, 0, 1))
    w3 = params['w3'].T[:, :, None, None]
    out = jax.nn.relu(bnb(_conv_nchw(x_nchw, w1), params['s1'], params['b1']))
    out = jax.nn.relu(bnb(_conv_nchw(out, w2, s=stride, pad=1),
                          params['s2'], params['b2']))
    out = bnb(_conv_nchw(out, w3), params['s3'], params['b3'])
    if 'w_sc' in params:
        wsc = params['w_sc'].T[:, :, None, None]
        sc = bnb(_conv_nchw(x_nchw, wsc, s=stride),
                 params['s_sc'], params['b_sc'])
    else:
        sc = x_nchw[:, :, ::stride, ::stride]
    return jax.nn.relu(out + sc)


def bottleneck_ref_bf16(x_nchw, params, *, stride=1):
    """Reference with the SAME bf16 rounding points as the Pallas path
    (bf16 matmul operands, f32 accumulation/epilogue, bf16 intermediates)."""
    bf = lambda a: a.astype(jnp.bfloat16).astype(jnp.float32)
    b4 = lambda b: b.reshape(1, -1, 1, 1)
    w1 = bf(params['w1'] * params['s1'][None, :]).T[:, :, None, None]
    w2f = bf(params['w2'] * params['s2'][None, None, :])
    w2 = jnp.transpose(w2f.reshape(3, 3, *w2f.shape[1:]), (3, 2, 0, 1))
    w3 = bf(params['w3'] * params['s3'][None, :]).T[:, :, None, None]
    xq = bf(x_nchw)
    o1 = bf(jax.nn.relu(_conv_nchw(xq, w1) + b4(params['b1'])))
    o2 = bf(jax.nn.relu(_conv_nchw(o1, w2, s=stride, pad=1) + b4(params['b2'])))
    main = _conv_nchw(o2, w3) + b4(params['b3'])
    if 'w_sc' in params:
        wsc = bf(params['w_sc'] * params['s_sc'][None, :]).T[:, :, None, None]
        sc = bf(_conv_nchw(xq, wsc, s=stride) + b4(params['b_sc']))
    else:
        sc = xq[:, :, ::stride, ::stride]
    return jax.nn.relu(main + sc)


if __name__ == "__main__":
    key = jax.random.PRNGKey(0)
    kx, kp = jax.random.split(key)

    in_planes, planes, stride = 4, 4, 1   # Bottleneck(4, 4) -> projection shortcut
    x = jax.random.normal(kx, (2, in_planes, 16, 16), jnp.float32)  # NCHW input
    params = init_params(kp, in_planes, planes, stride)

    fwd = jax.jit(functools.partial(bottleneck_forward, stride=stride))
    out = jax.block_until_ready(fwd(x, params))
    assert out.shape == (2, 4 * planes, 16, 16), out.shape

    # Tight check vs a reference with identical bf16 rounding points.
    ref_bf = bottleneck_ref_bf16(x, params, stride=stride)
    err_bf = float(jnp.max(jnp.abs(out - ref_bf)))
    assert jnp.allclose(out, ref_bf, atol=2e-3, rtol=2e-3), err_bf

    # Sanity check vs the pure-f32 module semantics (bf16-level error allowed).
    ref_f32 = bottleneck_ref_f32(x, params, stride=stride)
    err_f32 = float(jnp.max(jnp.abs(out - ref_f32)))
    bound = 0.03 * float(jnp.max(jnp.abs(ref_f32))) + 1e-2
    assert err_f32 < bound, (err_f32, bound)

    print("KERNEL_OK")
</pallas_src>

<mosaic_0001>
module attributes {stable_mosaic.version = 11 : i64} {
  func.func @_pw_kernel(%arg0: i32, %arg1: memref<512x4xbf16, #tpu.memory_space<vmem>>, %arg2: memref<4x16xbf16, #tpu.memory_space<vmem>>, %arg3: memref<1x16xf32, #tpu.memory_space<vmem>>, %arg4: memref<512x16xbf16, #tpu.memory_space<vmem>>) attributes {dimension_semantics = [#tpu.dimension_semantics<parallel>], iteration_bounds = array<i64: 1>, scalar_prefetch = 0 : i64, scratch_operands = 0 : i64, tpu.core_type = #tpu.core_type<tc>, window_params = [{transform_indices = @transform_0, window_bounds = array<i64: 512, 4>}, {pipeline_mode = #tpu.pipeline_mode<synchronous>, transform_indices = @transform_1, window_bounds = array<i64: 4, 16>}, {pipeline_mode = #tpu.pipeline_mode<synchronous>, transform_indices = @transform_2, window_bounds = array<i64: 1, 16>}, {transform_indices = @transform_3, window_bounds = array<i64: 512, 16>}]} {
    %c0 = arith.constant 0 : index
    %c0_0 = arith.constant 0 : index
    %0 = vector.load %arg1[%c0, %c0_0] : memref<512x4xbf16, #tpu.memory_space<vmem>>, vector<512x4xbf16>
    %c0_1 = arith.constant 0 : index
    %c0_2 = arith.constant 0 : index
    %1 = vector.load %arg2[%c0_1, %c0_2] : memref<4x16xbf16, #tpu.memory_space<vmem>>, vector<4x16xbf16>
    %cst = arith.constant dense<0.000000e+00> : vector<512x16xf32>
    %2 = tpu.matmul %0, %1, %cst {dimension_numbers = #tpu.dot_dimension_numbers<[1], [0], [0], [1], [0, 0, 1, 1], [], []>} : vector<512x4xbf16>, vector<4x16xbf16>, vector<512x16xf32> -> vector<512x16xf32>
    %c0_3 = arith.constant 0 : index
    %c0_4 = arith.constant 0 : index
    %3 = vector.load %arg3[%c0_3, %c0_4] : memref<1x16xf32, #tpu.memory_space<vmem>>, vector<1x16xf32>
    %4 = vector.broadcast %3 : vector<1x16xf32> to vector<512x16xf32>
    %5 = arith.addf %2, %4 : vector<512x16xf32>
    %6 = arith.truncf %5 : vector<512x16xf32> to vector<512x16xbf16>
    %c0_5 = arith.constant 0 : index
    %c0_6 = arith.constant 0 : index
    %7 = vector.load %arg4[%c0_5, %c0_6] : memref<512x16xbf16, #tpu.memory_space<vmem>>, vector<512x16xbf16>
    tpu.vector_store %arg4[%c0_5, %c0_6], %6 {strides = array<i32>} : memref<512x16xbf16, #tpu.memory_space<vmem>>, vector<512x16xbf16>,
    return
  }
  func.func @transform_0(%arg0: i32) -> (i32, i32) {
    %c0_i32 = arith.constant 0 : i32
    %c0_i32_0 = arith.constant 0 : i32
    return %arg0, %c0_i32 : i32, i32
  }
  func.func @transform_1(%arg0: i32) -> (i32, i32) {
    %c0_i32 = arith.constant 0 : i32
    %c0_i32_0 = arith.constant 0 : i32
    %c0_i32_1 = arith.constant 0 : i32
    return %c0_i32, %c0_i32_0 : i32, i32
  }
  func.func @transform_2(%arg0: i32) -> (i32, i32) {
    %c0_i32 = arith.constant 0 : i32
    %c0_i32_0 = arith.constant 0 : i32
    %c0_i32_1 = arith.constant 0 : i32
    return %c0_i32, %c0_i32_0 : i32, i32
  }
  func.func @transform_3(%arg0: i32) -> (i32, i32) {
    %c0_i32 = arith.constant 0 : i32
    %c0_i32_0 = arith.constant 0 : i32
    return %arg0, %c0_i32 : i32, i32
  }
}

module attributes {stable_mosaic.version = 11 : i64} {
  func.func @_pw_kernel(%arg0: i32, %arg1: memref<512x4xbf16, #tpu.memory_space<vmem>>, %arg2: memref<4x4xbf16, #tpu.memory_space<vmem>>, %arg3: memref<1x4xf32, #tpu.memory_space<vmem>>, %arg4: memref<512x4xbf16, #tpu.memory_space<vmem>>) attributes {dimension_semantics = [#tpu.dimension_semantics<parallel>], iteration_bounds = array<i64: 1>, scalar_prefetch = 0 : i64, scratch_operands = 0 : i64, tpu.core_type = #tpu.core_type<tc>, window_params = [{transform_indices = @transform_0, window_bounds = array<i64: 512, 4>}, {pipeline_mode = #tpu.pipeline_mode<synchronous>, transform_indices = @transform_1, window_bounds = array<i64: 4, 4>}, {pipeline_mode = #tpu.pipeline_mode<synchronous>, transform_indices = @transform_2, window_bounds = array<i64: 1, 4>}, {transform_indices = @transform_3, window_bounds = array<i64: 512, 4>}]} {
    %c0 = arith.constant 0 : index
    %c0_0 = arith.constant 0 : index
    %0 = vector.load %arg1[%c0, %c0_0] : memref<512x4xbf16, #tpu.memory_space<vmem>>, vector<512x4xbf16>
    %c0_1 = arith.constant 0 : index
    %c0_2 = arith.constant 0 : index
    %1 = vector.load %arg2[%c0_1, %c0_2] : memref<4x4xbf16, #tpu.memory_space<vmem>>, vector<4x4xbf16>
    %cst = arith.constant dense<0.000000e+00> : vector<512x4xf32>
    %2 = tpu.matmul %0, %1, %cst {dimension_numbers = #tpu.dot_dimension_numbers<[1], [0], [0], [1], [0, 0, 1, 1], [], []>} : vector<512x4xbf16>, vector<4x4xbf16>, vector<512x4xf32> -> vector<512x4xf32>
    %c0_3 = arith.constant 0 : index
    %c0_4 = arith.constant 0 : index
    %3 = vector.load %arg3[%c0_3, %c0_4] : memref<1x4xf32, #tpu.memory_space<vmem>>, vector<1x4xf32>
    %4 = vector.broadcast %3 : vector<1x4xf32> to vector<512x4xf32>
    %5 = arith.addf %2, %4 : vector<512x4xf32>
    %cst_5 = arith.constant 0.000000e+00 : f32
    %6 = vector.broadcast %cst_5 : f32 to vector<512x4xf32>
    %7 = arith.maximumf %5, %6 : vector<512x4xf32>
    %8 = arith.truncf %7 : vector<512x4xf32> to vector<512x4xbf16>
    %c0_6 = arith.constant 0 : index
    %c0_7 = arith.constant 0 : index
    %9 = vector.load %arg4[%c0_6, %c0_7] : memref<512x4xbf16, #tpu.memory_space<vmem>>, vector<512x4xbf16>
    tpu.vector_store %arg4[%c0_6, %c0_7], %8 {strides = array<i32>} : memref<512x4xbf16, #tpu.memory_space<vmem>>, vector<512x4xbf16>,
    return
  }
  func.func @transform_0(%arg0: i32) -> (i32, i32) {
    %c0_i32 = arith.constant 0 : i32
    %c0_i32_0 = arith.constant 0 : i32
    return %arg0, %c0_i32 : i32, i32
  }
  func.func @transform_1(%arg0: i32) -> (i32, i32) {
    %c0_i32 = arith.constant 0 : i32
    %c0_i32_0 = arith.constant 0 : i32
    %c0_i32_1 = arith.constant 0 : i32
    return %c0_i32, %c0_i32_0 : i32, i32
  }
  func.func @transform_2(%arg0: i32) -> (i32, i32) {
    %c0_i32 = arith.constant 0 : i32
    %c0_i32_0 = arith.constant 0 : i32
    %c0_i32_1 = arith.constant 0 : i32
    return %c0_i32, %c0_i32_0 : i32, i32
  }
  func.func @transform_3(%arg0: i32) -> (i32, i32) {
    %c0_i32 = arith.constant 0 : i32
    %c0_i32_0 = arith.constant 0 : i32
    return %arg0, %c0_i32 : i32, i32
  }
}

module attributes {stable_mosaic.version = 11 : i64} {
  func.func @_conv3x3_kernel(%arg0: i32, %arg1: i32, %arg2: memref<1x18x18x4xbf16, #tpu.memory_space<vmem>>, %arg3: memref<9x4x4xbf16, #tpu.memory_space<vmem>>, %arg4: memref<1x4xf32, #tpu.memory_space<vmem>>, %arg5: memref<1x16x16x4xbf16, #tpu.memory_space<vmem>>) attributes {dimension_semantics = [#tpu.dimension_semantics<parallel>, #tpu.dimension_semantics<parallel>], iteration_bounds = array<i64: 2, 1>, scalar_prefetch = 0 : i64, scratch_operands = 0 : i64, tpu.core_type = #tpu.core_type<tc>, window_params = [{transform_indices = @transform_0, window_bounds = array<i64: 1, 18, 18, 4>}, {pipeline_mode = #tpu.pipeline_mode<synchronous>, transform_indices = @transform_1, window_bounds = array<i64: 9, 4, 4>}, {pipeline_mode = #tpu.pipeline_mode<synchronous>, transform_indices = @transform_2, window_bounds = array<i64: 1, 4>}, {transform_indices = @transform_3, window_bounds = array<i64: 1, 16, 16, 4>}]} {
    %c16_i32 = arith.constant 16 : i32
    %0 = arith.muli %arg1, %c16_i32 : i32
    %cst = arith.constant 0.000000e+00 : f32
    %1 = vector.broadcast %cst : f32 to vector<16x16x4xf32>
    %c0_i32 = arith.constant 0 : i32
    %2 = arith.addi %0, %c0_i32 : i32
    %c0 = arith.constant 0 : index
    %3 = arith.index_cast %2 : i32 to index
    %c0_0 = arith.constant 0 : index
    %c0_1 = arith.constant 0 : index
    %4 = vector.load %arg2[%c0, %3, %c0_0, %c0_1] : memref<1x18x18x4xbf16, #tpu.memory_space<vmem>>, vector<1x16x18x4xbf16>
    %5 = vector.shape_cast %4 : vector<1x16x18x4xbf16> to vector<16x18x4xbf16>
    %6 = vector.extract_strided_slice %5 {offsets = [0, 0, 0], sizes = [16, 16, 4], strides = [1, 1, 1]} : vector<16x18x4xbf16> to vector<16x16x4xbf16>
    %c0_2 = arith.constant 0 : index
    %c0_3 = arith.constant 0 : index
    %c0_4 = arith.constant 0 : index
    %7 = vector.load %arg3[%c0_2, %c0_3, %c0_4] : memref<9x4x4xbf16, #tpu.memory_space<vmem>>, vector<1x4x4xbf16>
    %8 = vector.shape_cast %7 : vector<1x4x4xbf16> to vector<4x4xbf16>
    %cst_5 = arith.constant dense<0.000000e+00> : vector<16x16x4xf32>
    %9 = tpu.matmul %6, %8, %cst_5 {dimension_numbers = #tpu.dot_dimension_numbers<[2], [0], [0, 1], [1], [0, 0, 0, 1, 1, 1], [], []>} : vector<16x16x4xbf16>, vector<4x4xbf16>, vector<16x16x4xf32> -> vector<16x16x4xf32>
    %10 = arith.addf %1, %9 : vector<16x16x4xf32>
    %11 = vector.extract_strided_slice %5 {offsets = [0, 1, 0], sizes = [16, 16, 4], strides = [1, 1, 1]} : vector<16x18x4xbf16> to vector<16x16x4xbf16>
    %c1 = arith.constant 1 : index
    %c0_6 = arith.constant 0 : index
    %c0_7 = arith.constant 0 : index
    %12 = vector.load %arg3[%c1, %c0_6, %c0_7] : memref<9x4x4xbf16, #tpu.memory_space<vmem>>, vector<1x4x4xbf16>
    %13 = vector.shape_cast %12 : vector<1x4x4xbf16> to vector<4x4xbf16>
    %cst_8 = arith.constant dense<0.000000e+00> : vector<16x16x4xf32>
    %14 = tpu.matmul %11, %13, %cst_8 {dimension_numbers = #tpu.dot_dimension_numbers<[2], [0], [0, 1], [1], [0, 0, 0, 1, 1, 1], [], []>} : vector<16x16x4xbf16>, vector<4x4xbf16>, vector<16x16x4xf32> -> vector<16x16x4xf32>
    %15 = arith.addf %10, %14 : vector<16x16x4xf32>
    %16 = vector.extract_strided_slice %5 {offsets = [0, 2, 0], sizes = [16, 16, 4], strides = [1, 1, 1]} : vector<16x18x4xbf16> to vector<16x16x4xbf16>
    %c2 = arith.constant 2 : index
    %c0_9 = arith.constant 0 : index
    %c0_10 = arith.constant 0 : index
    %17 = vector.load %arg3[%c2, %c0_9, %c0_10] : memref<9x4x4xbf16, #tpu.memory_space<vmem>>, vector<1x4x4xbf16>
    %18 = vector.shape_cast %17 : vector<1x4x4xbf16> to vector<4x4xbf16>
    %cst_11 = arith.constant dense<0.000000e+00> : vector<16x16x4xf32>
    %19 = tpu.matmul %16, %18, %cst_11 {dimension_numbers = #tpu.dot_dimension_numbers<[2], [0], [0, 1], [1], [0, 0, 0, 1, 1, 1], [], []>} : vector<16x16x4xbf16>, vector<4x4xbf16>, vector<16x16x4xf32> -> vector<16x16x4xf32>
    %20 = arith.addf %15, %19 : vector<16x16x4xf32>
    %c1_i32 = arith.constant 1 : i32
    %21 = arith.addi %0, %c1_i32 : i32
    %c0_12 = arith.constant 0 : index
    %22 = arith.index_cast %21 : i32 to index
    %c0_13 = arith.constant 0 : index
    %c0_14 = arith.constant 0 : index
    %23 = vector.load %arg2[%c0_12, %22, %c0_13, %c0_14] : memref<1x18x18x4xbf16, #tpu.memory_space<vmem>>, vector<1x16x18x4xbf16>
    %24 = vector.shape_cast %23 : vector<1x16x18x4xbf16> to vector<16x18x4xbf16>
    %25 = vector.extract_strided_slice %24 {offsets = [0, 0, 0], sizes = [16, 16, 4], strides = [1, 1, 1]} : vector<16x18x4xbf16> to vector<16x16x4xbf16>
    %c3 = arith.constant 3 : index
    %c0_15 = arith.constant 0 : index
    %c0_16 = arith.constant 0 : index
    %26 = vector.load %arg3[%c3, %c0_15, %c0_16] : memref<9x4x4xbf16, #tpu.memory_space<vmem>>, vector<1x4x4xbf16>
    %27 = vector.shape_cast %26 : vector<1x4x4xbf16> to vector<4x4xbf16>
    %cst_17 = arith.constant dense<0.000000e+00> : vector<16x16x4xf32>
    %28 = tpu.matmul %25, %27, %cst_17 {dimension_numbers = #tpu.dot_dimension_numbers<[2], [0], [0, 1], [1], [0, 0, 0, 1, 1, 1], [], []>} : vector<16x16x4xbf16>, vector<4x4xbf16>, vector<16x16x4xf32> -> vector<16x16x4xf32>
    %29 = arith.addf %20, %28 : vector<16x16x4xf32>
    %30 = vector.extract_strided_slice %24 {offsets = [0, 1, 0], sizes = [16, 16, 4], strides = [1, 1, 1]} : vector<16x18x4xbf16> to vector<16x16x4xbf16>
    %c4 = arith.constant 4 : index
    %c0_18 = arith.constant 0 : index
    %c0_19 = arith.constant 0 : index
    %31 = vector.load %arg3[%c4, %c0_18, %c0_19] : memref<9x4x4xbf16, #tpu.memory_space<vmem>>, vector<1x4x4xbf16>
    %32 = vector.shape_cast %31 : vector<1x4x4xbf16> to vector<4x4xbf16>
    %cst_20 = arith.constant dense<0.000000e+00> : vector<16x16x4xf32>
    %33 = tpu.matmul %30, %32, %cst_20 {dimension_numbers = #tpu.dot_dimension_numbers<[2], [0], [0, 1], [1], [0, 0, 0, 1, 1, 1], [], []>} : vector<16x16x4xbf16>, vector<4x4xbf16>, vector<16x16x4xf32> -> vector<16x16x4xf32>
    %34 = arith.addf %29, %33 : vector<16x16x4xf32>
    %35 = vector.extract_strided_slice %24 {offsets = [0, 2, 0], sizes = [16, 16, 4], strides = [1, 1, 1]} : vector<16x18x4xbf16> to vector<16x16x4xbf16>
    %c5 = arith.constant 5 : index
    %c0_21 = arith.constant 0 : index
    %c0_22 = arith.constant 0 : index
    %36 = vector.load %arg3[%c5, %c0_21, %c0_22] : memref<9x4x4xbf16, #tpu.memory_space<vmem>>, vector<1x4x4xbf16>
    %37 = vector.shape_cast %36 : vector<1x4x4xbf16> to vector<4x4xbf16>
    %cst_23 = arith.constant dense<0.000000e+00> : vector<16x16x4xf32>
    %38 = tpu.matmul %35, %37, %cst_23 {dimension_numbers = #tpu.dot_dimension_numbers<[2], [0], [0, 1], [1], [0, 0, 0, 1, 1, 1], [], []>} : vector<16x16x4xbf16>, vector<4x4xbf16>, vector<16x16x4xf32> -> vector<16x16x4xf32>
    %39 = arith.addf %34, %38 : vector<16x16x4xf32>
    %c2_i32 = arith.constant 2 : i32
    %40 = arith.addi %0, %c2_i32 : i32
    %c0_24 = arith.constant 0 : index
    %41 = arith.index_cast %40 : i32 to index
    %c0_25 = arith.constant 0 : index
    %c0_26 = arith.constant 0 : index
    %42 = vector.load %arg2[%c0_24, %41, %c0_25, %c0_26] : memref<1x18x18x4xbf16, #tpu.memory_space<vmem>>, vector<1x16x18x4xbf16>
    %43 = vector.shape_cast %42 : vector<1x16x18x4xbf16> to vector<16x18x4xbf16>
    %44 = vector.extract_strided_slice %43 {offsets = [0, 0, 0], sizes = [16, 16, 4], strides = [1, 1, 1]} : vector<16x18x4xbf16> to vector<16x16x4xbf16>
    %c6 = arith.constant 6 : index
    %c0_27 = arith.constant 0 : index
    %c0_28 = arith.constant 0 : index
    %45 = vector.load %arg3[%c6, %c0_27, %c0_28] : memref<9x4x4xbf16, #tpu.memory_space<vmem>>, vector<1x4x4xbf16>
    %46 = vector.shape_cast %45 : vector<1x4x4xbf16> to vector<4x4xbf16>
    %cst_29 = arith.constant dense<0.000000e+00> : vector<16x16x4xf32>
    %47 = tpu.matmul %44, %46, %cst_29 {dimension_numbers = #tpu.dot_dimension_numbers<[2], [0], [0, 1], [1], [0, 0, 0, 1, 1, 1], [], []>} : vector<16x16x4xbf16>, vector<4x4xbf16>, vector<16x16x4xf32> -> vector<16x16x4xf32>
    %48 = arith.addf %39, %47 : vector<16x16x4xf32>
    %49 = vector.extract_strided_slice %43 {offsets = [0, 1, 0], sizes = [16, 16, 4], strides = [1, 1, 1]} : vector<16x18x4xbf16> to vector<16x16x4xbf16>
    %c7 = arith.constant 7 : index
    %c0_30 = arith.constant 0 : index
    %c0_31 = arith.constant 0 : index
    %50 = vector.load %arg3[%c7, %c0_30, %c0_31] : memref<9x4x4xbf16, #tpu.memory_space<vmem>>, vector<1x4x4xbf16>
    %51 = vector.shape_cast %50 : vector<1x4x4xbf16> to vector<4x4xbf16>
    %cst_32 = arith.constant dense<0.000000e+00> : vector<16x16x4xf32>
    %52 = tpu.matmul %49, %51, %cst_32 {dimension_numbers = #tpu.dot_dimension_numbers<[2], [0], [0, 1], [1], [0, 0, 0, 1, 1, 1], [], []>} : vector<16x16x4xbf16>, vector<4x4xbf16>, vector<16x16x4xf32> -> vector<16x16x4xf32>
    %53 = arith.addf %48, %52 : vector<16x16x4xf32>
    %54 = vector.extract_strided_slice %43 {offsets = [0, 2, 0], sizes = [16, 16, 4], strides = [1, 1, 1]} : vector<16x18x4xbf16> to vector<16x16x4xbf16>
    %c8 = arith.constant 8 : index
    %c0_33 = arith.constant 0 : index
    %c0_34 = arith.constant 0 : index
    %55 = vector.load %arg3[%c8, %c0_33, %c0_34] : memref<9x4x4xbf16, #tpu.memory_space<vmem>>, vector<1x4x4xbf16>
    %56 = vector.shape_cast %55 : vector<1x4x4xbf16> to vector<4x4xbf16>
    %cst_35 = arith.constant dense<0.000000e+00> : vector<16x16x4xf32>
    %57 = tpu.matmul %54, %56, %cst_35 {dimension_numbers = #tpu.dot_dimension_numbers<[2], [0], [0, 1], [1], [0, 0, 0, 1, 1, 1], [], []>} : vector<16x16x4xbf16>, vector<4x4xbf16>, vector<16x16x4xf32> -> vector<16x16x4xf32>
    %58 = arith.addf %53, %57 : vector<16x16x4xf32>
    %c0_36 = arith.constant 0 : index
    %c0_37 = arith.constant 0 : index
    %59 = vector.load %arg4[%c0_36, %c0_37] : memref<1x4xf32, #tpu.memory_space<vmem>>, vector<1x4xf32>
    %60 = vector.shape_cast %59 : vector<1x4xf32> to vector<1x1x4xf32>
    %61 = vector.broadcast %60 : vector<1x1x4xf32> to vector<16x16x4xf32>
    %62 = arith.addf %58, %61 : vector<16x16x4xf32>
    %cst_38 = arith.constant 0.000000e+00 : f32
    %63 = vector.broadcast %cst_38 : f32 to vector<16x16x4xf32>
    %64 = arith.maximumf %62, %63 : vector<16x16x4xf32>
    %65 = vector.shape_cast %64 : vector<16x16x4xf32> to vector<1x16x16x4xf32>
    %66 = arith.truncf %65 : vector<1x16x16x4xf32> to vector<1x16x16x4xbf16>
    %c0_39 = arith.constant 0 : index
    %c0_40 = arith.constant 0 : index
    %c0_41 = arith.constant 0 : index
    %c0_42 = arith.constant 0 : index
    %67 = vector.load %arg5[%c0_39, %c0_40, %c0_41, %c0_42] : memref<1x16x16x4xbf16, #tpu.memory_space<vmem>>, vector<1x16x16x4xbf16>
    tpu.vector_store %arg5[%c0_39, %c0_40, %c0_41, %c0_42], %66 {strides = array<i32>} : memref<1x16x16x4xbf16, #tpu.memory_space<vmem>>, vector<1x16x16x4xbf16>,
    return
  }
  func.func @transform_0(%arg0: i32, %arg1: i32) -> (i32, i32, i32, i32) {
    %c0_i32 = arith.constant 0 : i32
    %c0_i32_0 = arith.constant 0 : i32
    %c0_i32_1 = arith.constant 0 : i32
    %c0_i32_2 = arith.constant 0 : i32
    return %arg0, %c0_i32, %c0_i32_0, %c0_i32_1 : i32, i32, i32, i32
  }
  func.func @transform_1(%arg0: i32, %arg1: i32) -> (i32, i32, i32) {
    %c0_i32 = arith.constant 0 : i32
    %c0_i32_0 = arith.constant 0 : i32
    %c0_i32_1 = arith.constant 0 : i32
    %c0_i32_2 = arith.constant 0 : i32
    return %c0_i32, %c0_i32_0, %c0_i32_1 : i32, i32, i32
  }
  func.func @transform_2(%arg0: i32, %arg1: i32) -> (i32, i32) {
    %c0_i32 = arith.constant 0 : i32
    %c0_i32_0 = arith.constant 0 : i32
    %c0_i32_1 = arith.constant 0 : i32
    return %c0_i32, %c0_i32_0 : i32, i32
  }
  func.func @transform_3(%arg0: i32, %arg1: i32) -> (i32, i32, i32, i32) {
    %c0_i32 = arith.constant 0 : i32
    %c0_i32_0 = arith.constant 0 : i32
    %c0_i32_1 = arith.constant 0 : i32
    return %arg0, %arg1, %c0_i32, %c0_i32_0 : i32, i32, i32, i32
  }
}

module attributes {stable_mosaic.version = 11 : i64} {
  func.func @_pw_res_kernel(%arg0: i32, %arg1: memref<512x4xbf16, #tpu.memory_space<vmem>>, %arg2: memref<4x16xbf16, #tpu.memory_space<vmem>>, %arg3: memref<1x16xf32, #tpu.memory_space<vmem>>, %arg4: memref<512x16xbf16, #tpu.memory_space<vmem>>, %arg5: memref<512x16xf32, #tpu.memory_space<vmem>>) attributes {dimension_semantics = [#tpu.dimension_semantics<parallel>], iteration_bounds = array<i64: 1>, scalar_prefetch = 0 : i64, scratch_operands = 0 : i64, tpu.core_type = #tpu.core_type<tc>, window_params = [{transform_indices = @transform_0, window_bounds = array<i64: 512, 4>}, {pipeline_mode = #tpu.pipeline_mode<synchronous>, transform_indices = @transform_1, window_bounds = array<i64: 4, 16>}, {pipeline_mode = #tpu.pipeline_mode<synchronous>, transform_indices = @transform_2, window_bounds = array<i64: 1, 16>}, {transform_indices = @transform_3, window_bounds = array<i64: 512, 16>}, {transform_indices = @transform_4, window_bounds = array<i64: 512, 16>}]} {
    %c0 = arith.constant 0 : index
    %c0_0 = arith.constant 0 : index
    %0 = vector.load %arg1[%c0, %c0_0] : memref<512x4xbf16, #tpu.memory_space<vmem>>, vector<512x4xbf16>
    %c0_1 = arith.constant 0 : index
    %c0_2 = arith.constant 0 : index
    %1 = vector.load %arg2[%c0_1, %c0_2] : memref<4x16xbf16, #tpu.memory_space<vmem>>, vector<4x16xbf16>
    %cst = arith.constant dense<0.000000e+00> : vector<512x16xf32>
    %2 = tpu.matmul %0, %1, %cst {dimension_numbers = #tpu.dot_dimension_numbers<[1], [0], [0], [1], [0, 0, 1, 1], [], []>} : vector<512x4xbf16>, vector<4x16xbf16>, vector<512x16xf32> -> vector<512x16xf32>
    %c0_3 = arith.constant 0 : index
    %c0_4 = arith.constant 0 : index
    %3 = vector.load %arg3[%c0_3, %c0_4] : memref<1x16xf32, #tpu.memory_space<vmem>>, vector<1x16xf32>
    %4 = vector.broadcast %3 : vector<1x16xf32> to vector<512x16xf32>
    %5 = arith.addf %2, %4 : vector<512x16xf32>
    %c0_5 = arith.constant 0 : index
    %c0_6 = arith.constant 0 : index
    %6 = vector.load %arg4[%c0_5, %c0_6] : memref<512x16xbf16, #tpu.memory_space<vmem>>, vector<512x16xbf16>
    %7 = arith.extf %6 : vector<512x16xbf16> to vector<512x16xf32>
    %8 = arith.addf %5, %7 : vector<512x16xf32>
    %cst_7 = arith.constant 0.000000e+00 : f32
    %9 = vector.broadcast %cst_7 : f32 to vector<512x16xf32>
    %10 = arith.maximumf %8, %9 : vector<512x16xf32>
    %c0_8 = arith.constant 0 : index
    %c0_9 = arith.constant 0 : index
    %11 = vector.load %arg5[%c0_8, %c0_9] : memref<512x16xf32, #tpu.memory_space<vmem>>, vector<512x16xf32>
    tpu.vector_store %arg5[%c0_8, %c0_9], %10 {strides = array<i32>} : memref<512x16xf32, #tpu.memory_space<vmem>>, vector<512x16xf32>,
    return
  }
  func.func @transform_0(%arg0: i32) -> (i32, i32) {
    %c0_i32 = arith.constant 0 : i32
    %c0_i32_0 = arith.constant 0 : i32
    return %arg0, %c0_i32 : i32, i32
  }
  func.func @transform_1(%arg0: i32) -> (i32, i32) {
    %c0_i32 = arith.constant 0 : i32
    %c0_i32_0 = arith.constant 0 : i32
    %c0_i32_1 = arith.constant 0 : i32
    return %c0_i32, %c0_i32_0 : i32, i32
  }
  func.func @transform_2(%arg0: i32) -> (i32, i32) {
    %c0_i32 = arith.constant 0 : i32
    %c0_i32_0 = arith.constant 0 : i32
    %c0_i32_1 = arith.constant 0 : i32
    return %c0_i32, %c0_i32_0 : i32, i32
  }
  func.func @transform_3(%arg0: i32) -> (i32, i32) {
    %c0_i32 = arith.constant 0 : i32
    %c0_i32_0 = arith.constant 0 : i32
    return %arg0, %c0_i32 : i32, i32
  }
  func.func @transform_4(%arg0: i32) -> (i32, i32) {
    %c0_i32 = arith.constant 0 : i32
    %c0_i32_0 = arith.constant 0 : i32
    return %arg0, %c0_i32 : i32, i32
  }
}

</mosaic_0001>

<bundles_post_ra>
// kernel: bottleneck_forward.6
= control target key start
LH: loop header
LB: loop body
LE: loop exit
PB: predicated region body
PF: predicated region fallthrough
CT: control target
= control target key end

     0   :  { %vm344_vm0 = vcmask 1041408   ;;  %vm247_vm1 = vcmask 31744   ;;  %vm893_vm2 = vcmask 125952   ;;  %s1766_s1 = inlined_call_operand.vmem [shape: bf16[4,16], index: 1, kind: input, shape index: {}]   ;;  %s1767_s0 = inlined_call_operand.vmem [shape: bf16[512,4], index: 0, kind: input, shape index: {}]   ;;  %s1768_s2 = inlined_call_operand.vmem [shape: f32[1,16], index: 2, kind: input, shape index: {}]   ;;  %s1769_s3 = inlined_call_operand.vmem [shape: bf16[512,16], index: 3, kind: output, shape index: {}]  }
   0x1   :  { %v79_v0 = vld [vmem:[%s1766_s1] sm:$0x3]  ;;  %v1260_v4 = vld [vmem:[%s1767_s0 + $0x8] sm:$0xff]   ;;  %v1262_v6 = vld [vmem:[%s1767_s0 + $0x10] sm:$0xff]  }
   0x2   :  { %1256 = vmatprep.subr.msk.bf16.mxu0 %vm344_vm0, %v79_v0  ;;  %1257 = vmatprep.subr.msk.bf16.mxu1 %vm344_vm0, %v79_v0  ;;  %v346_v1 = vsel %vm344_vm0, %v79_v0, 0  ;;  %v1258_v2 = vld [vmem:[%s1767_s0] sm:$0xff]   ;;  %v1261_v5 = vld [vmem:[%s1767_s0 + $0x88] sm:$0xff]   ;;  %v1263_v7 = vld [vmem:[%s1767_s0 + $0x90] sm:$0xff]  }
   0x3   :  { %1189 = vmatpush3.bf16.msra.mxu0 %v346_v1  ;;  %1255 = vmatpush3.bf16.msra.mxu1 %v346_v1  ;;  %v1259_v3 = vld [vmem:[%s1767_s0 + $0x80] sm:$0xff]   ;;  %v1264_v8 = vld [vmem:[%s1767_s0 + $0x18] sm:$0xff]   ;;  %v1268_v12 = vld [vmem:[%s1767_s0 + $0x28] sm:$0xff]  }
   0x4   :  { %1190 = vmatprep.mubr.msk.bf16.mxu0 %vm247_vm1, %v1258_v2  ;;  %1222 = vmatprep.mubr.msk.bf16.mxu1 %vm247_vm1, %v1259_v3  ;;  %v1265_v9 = vld [vmem:[%s1767_s0 + $0x98] sm:$0xff]   ;;  %v1266_v10 = vld [vmem:[%s1767_s0 + $0x20] sm:$0xff]   ;;  %v1269_v13 = vld [vmem:[%s1767_s0 + $0xa8] sm:$0xff]  }
   0x5   :  { %v1267_v11 = vld [vmem:[%s1767_s0 + $0xa0] sm:$0xff]   ;;  %v1270_v14 = vld [vmem:[%s1767_s0 + $0x30] sm:$0xff]   ;;  %v1272_v16 = vld [vmem:[%s1767_s0 + $0x38] sm:$0xff]  }
   0x6   :  { %1191 = vmatmul.mubr.msk.bf16.vlgmr.msra.gmra.mxu0 %vm247_vm1, %v1260_v4  ;;  %1223 = vmatmul.mubr.msk.bf16.vlgmr.msra.gmra.mxu1 %vm247_vm1, %v1261_v5  ;;  %v1271_v15 = vld [vmem:[%s1767_s0 + $0xb0] sm:$0xff]   ;;  %v1273_v17 = vld [vmem:[%s1767_s0 + $0xb8] sm:$0xff]   ;;  %v1274_v18 = vld [vmem:[%s1767_s0 + $0x40] sm:$0xff]  }
   0x7   :  { %1194 = vmatprep.mubr.msk.bf16.mxu0 %vm247_vm1, %v1262_v6  ;;  %1226 = vmatprep.mubr.msk.bf16.mxu1 %vm247_vm1, %v1263_v7  ;;  %v1275_v19 = vld [vmem:[%s1767_s0 + $0xc0] sm:$0xff]   ;;  %v1276_v20 = vld [vmem:[%s1767_s0 + $0x48] sm:$0xff]   ;;  %v1278_v22 = vld [vmem:[%s1767_s0 + $0x50] sm:$0xff]  }
   0x8   :  { %v1277_v21 = vld [vmem:[%s1767_s0 + $0xc8] sm:$0xff]   ;;  %v1279_v23 = vld [vmem:[%s1767_s0 + $0xd0] sm:$0xff]   ;;  %v1280_v24 = vld [vmem:[%s1767_s0 + $0x58] sm:$0xff]  }
   0x9   :  { %v1281_v25 = vld [vmem:[%s1767_s0 + $0xd8] sm:$0xff]   ;;  %v1282_v26 = vld [vmem:[%s1767_s0 + $0x60] sm:$0xff]   ;;  %v1284_v28 = vld [vmem:[%s1767_s0 + $0x68] sm:$0xff]  }
   0xa   :  { %v1283_v27 = vld [vmem:[%s1767_s0 + $0xe0] sm:$0xff]   ;;  %v1285_v29 = vld [vmem:[%s1767_s0 + $0xe8] sm:$0xff]   ;;  %v1286_v30 = vld [vmem:[%s1767_s0 + $0x70] sm:$0xff]  }
   0xb   :  { %v1287_v31 = vld [vmem:[%s1767_s0 + $0xf0] sm:$0xff]   ;;  %v1288_v32 = vld [vmem:[%s1767_s0 + $0x78] sm:$0xff]   ;;  %v1444_v34 = vld [vmem:[%s1768_s2] ss:$0 sm:$0xff] }
   0xc   :  { %v1289_v33 = vld [vmem:[%s1767_s0 + $0xf8] sm:$0xff]  }
   0xe   :  { %1195 = vmatmul.mubr.msk.bf16.gmra.mxu0 %vm247_vm1, %v1264_v8  ;;  %1227 = vmatmul.mubr.msk.bf16.gmra.mxu1 %vm247_vm1, %v1265_v9 }
   0xf   :  { %1198 = vmatprep.mubr.msk.bf16.mxu0 %vm247_vm1, %v1266_v10  ;;  %1230 = vmatprep.mubr.msk.bf16.mxu1 %vm247_vm1, %v1267_v11 }
  0x16   :  { %1199 = vmatmul.mubr.msk.bf16.gmra.mxu0 %vm247_vm1, %v1268_v12  ;;  %1231 = vmatmul.mubr.msk.bf16.gmra.mxu1 %vm247_vm1, %v1269_v13 }
  0x17   :  { %1202 = vmatprep.mubr.msk.bf16.mxu0 %vm247_vm1, %v1270_v14  ;;  %1234 = vmatprep.mubr.msk.bf16.mxu1 %vm247_vm1, %v1271_v15 }
  0x1e   :  { %1203 = vmatmul.mubr.msk.bf16.gmra.mxu0 %vm247_vm1, %v1272_v16  ;;  %1235 = vmatmul.mubr.msk.bf16.gmra.mxu1 %vm247_vm1, %v1273_v17 }
  0x1f   :  { %1206 = vmatprep.mubr.msk.bf16.mxu0 %vm247_vm1, %v1274_v18  ;;  %1238 = vmatprep.mubr.msk.bf16.mxu1 %vm247_vm1, %v1275_v19 }
  0x26   :  { %1207 = vmatmul.mubr.msk.bf16.gmra.mxu0 %vm247_vm1, %v1276_v20  ;;  %1239 = vmatmul.mubr.msk.bf16.gmra.mxu1 %vm247_vm1, %v1277_v21 }
  0x27   :  { %1210 = vmatprep.mubr.msk.bf16.mxu0 %vm247_vm1, %v1278_v22  ;;  %1242 = vmatprep.mubr.msk.bf16.mxu1 %vm247_vm1, %v1279_v23 }
  0x2e   :  { %1211 = vmatmul.mubr.msk.bf16.gmra.mxu0 %vm247_vm1, %v1280_v24  ;;  %1243 = vmatmul.mubr.msk.bf16.gmra.mxu1 %vm247_vm1, %v1281_v25 }
  0x2f   :  { %1214 = vmatprep.mubr.msk.bf16.mxu0 %vm247_vm1, %v1282_v26  ;;  %1246 = vmatprep.mubr.msk.bf16.mxu1 %vm247_vm1, %v1283_v27 }
  0x36   :  { %1215 = vmatmul.mubr.msk.bf16.gmra.mxu0 %vm247_vm1, %v1284_v28  ;;  %1247 = vmatmul.mubr.msk.bf16.gmra.mxu1 %vm247_vm1, %v1285_v29 }
  0x37   :  { %1218 = vmatprep.mubr.msk.bf16.mxu0 %vm247_vm1, %v1286_v30  ;;  %1250 = vmatprep.mubr.msk.bf16.mxu1 %vm247_vm1, %v1287_v31 }
  0x3e   :  { %1219 = vmatmul.mubr.msk.bf16.gmra.mxu0 %vm247_vm1, %v1288_v32  ;;  %1251 = vmatmul.mubr.msk.bf16.gmra.mxu1 %vm247_vm1, %v1289_v33 }
  0xc6   :  { %v1192_v35 = vpop.f32.mrf.mxu0  ;;  %v1224_v37 = vpop.f32.mrf.mxu1 }
  0xc7   :  { %v391_v36 = vadd.f32 %v1192_v35, %v1444_v34  ;;  %v519_v38 = vadd.f32 %v1224_v37, %v1444_v34 }
  0xc8   :  { %v382_v39 = vpop.f32.mrf.mxu0  ;;  %v510_v42 = vpop.f32.mrf.mxu1 }
  0xc9   :  { %v1093_v40 = vpack.c.bf16 %v391_v36, %v391_v36  ;;  %v383_v41 = vadd.f32 %v1444_v34, %v382_v39  ;;  %v1125_v43 = vpack.c.bf16 %v519_v38, %v519_v38  ;;  %v511_v44 = vadd.f32 %v1444_v34, %v510_v42 }
  0xca   :  { %v1193_v45 = vpop.f32.mrf.mxu0  ;;  %v1225_v48 = vpop.f32.mrf.mxu1 }
  0xcb   :  { %896 = vst.msk [vmem:[%s1769_s3 + $0x8] sm:$0xf] %vm893_vm2, %v1093_v40  ;;  %v1091_v46 = vpack.c.bf16 %v383_v41, %v383_v41  ;;  %v394_v47 = vadd.f32 %v1193_v45, %v1444_v34  ;;  %928 = vst.msk [vmem:[%s1769_s3 + $0x88] sm:$0xf] %vm893_vm2, %v1125_v43  ;;  %v1123_v49 = vpack.c.bf16 %v511_v44, %v511_v44 }
  0xcc   :  { %v522_v50 = vadd.f32 %v1225_v48, %v1444_v34  ;;  %v385_v51 = vpop.f32.mrf.mxu0  ;;  %v513_v54 = vpop.f32.mrf.mxu1 }
  0xcd   :  { %894 = vst.msk [vmem:[%s1769_s3] sm:$0xf] %vm893_vm2, %v1091_v46  ;;  %v1094_v52 = vpack.c.bf16 %v394_v47, %v394_v47  ;;  %v386_v53 = vadd.f32 %v1444_v34, %v385_v51  ;;  %926 = vst.msk [vmem:[%s1769_s3 + $0x80] sm:$0xf] %vm893_vm2, %v1123_v49  ;;  %v514_v56 = vadd.f32 %v1444_v34, %v513_v54 }
  0xce   :  { %v1126_v55 = vpack.c.bf16 %v522_v50, %v522_v50  ;;  %v1196_v57 = vpop.f32.mrf.mxu0  ;;  %v1228_v60 = vpop.f32.mrf.mxu1 }
  0xcf   :  { %897 = vst.msk [vmem:[%s1769_s3 + $0xc] sm:$0xf] %vm893_vm2, %v1094_v52  ;;  %v1092_v58 = vpack.c.bf16 %v386_v53, %v386_v53  ;;  %v407_v59 = vadd.f32 %v1196_v57, %v1444_v34  ;;  %v1124_v61 = vpack.c.bf16 %v514_v56, %v514_v56  ;;  %v535_v62 = vadd.f32 %v1228_v60, %v1444_v34 }
  0xd0   :  { %929 = vst.msk [vmem:[%s1769_s3 + $0x8c] sm:$0xf] %vm893_vm2, %v1126_v55  ;;  %v398_v63 = vpop.f32.mrf.mxu0  ;;  %v526_v2 = vpop.f32.mrf.mxu1 }
  0xd1   :  { %895 = vst.msk [vmem:[%s1769_s3 + $0x4] sm:$0xf] %vm893_vm2, %v1092_v58  ;;  %v1097_v0 = vpack.c.bf16 %v407_v59, %v407_v59  ;;  %v399_v1 = vadd.f32 %v1444_v34, %v398_v63  ;;  %927 = vst.msk [vmem:[%s1769_s3 + $0x84] sm:$0xf] %vm893_vm2, %v1124_v61  ;;  %v1129_v3 = vpack.c.bf16 %v535_v62, %v535_v62 }
  0xd2   :  { %v527_v4 = vadd.f32 %v1444_v34, %v526_v2  ;;  %v1197_v5 = vpop.f32.mrf.mxu0  ;;  %v1229_v8 = vpop.f32.mrf.mxu1 }
  0xd3   :  { %900 = vst.msk [vmem:[%s1769_s3 + $0x18] sm:$0xf] %vm893_vm2, %v1097_v0  ;;  %v1095_v6 = vpack.c.bf16 %v399_v1, %v399_v1  ;;  %v410_v7 = vadd.f32 %v1197_v5, %v1444_v34  ;;  %932 = vst.msk [vmem:[%s1769_s3 + $0x98] sm:$0xf] %vm893_vm2, %v1129_v3  ;;  %v538_v10 = vadd.f32 %v1229_v8, %v1444_v34 }
  0xd4   :  { %v1127_v9 = vpack.c.bf16 %v527_v4, %v527_v4  ;;  %v401_v11 = vpop.f32.mrf.mxu0  ;;  %v529_v14 = vpop.f32.mrf.mxu1 }
  0xd5   :  { %898 = vst.msk [vmem:[%s1769_s3 + $0x10] sm:$0xf] %vm893_vm2, %v1095_v6  ;;  %v1098_v12 = vpack.c.bf16 %v410_v7, %v410_v7  ;;  %v402_v13 = vadd.f32 %v1444_v34, %v401_v11  ;;  %v1130_v15 = vpack.c.bf16 %v538_v10, %v538_v10  ;;  %v530_v16 = vadd.f32 %v1444_v34, %v529_v14 }
  0xd6   :  { %930 = vst.msk [vmem:[%s1769_s3 + $0x90] sm:$0xf] %vm893_vm2, %v1127_v9  ;;  %v1200_v17 = vpop.f32.mrf.mxu0  ;;  %v1232_v20 = vpop.f32.mrf.mxu1 }
  0xd7   :  { %901 = vst.msk [vmem:[%s1769_s3 + $0x1c] sm:$0xf] %vm893_vm2, %v1098_v12  ;;  %v1096_v18 = vpack.c.bf16 %v402_v13, %v402_v13  ;;  %v423_v19 = vadd.f32 %v1200_v17, %v1444_v34  ;;  %933 = vst.msk [vmem:[%s1769_s3 + $0x9c] sm:$0xf] %vm893_vm2, %v1130_v15  ;;  %v1128_v21 = vpack.c.bf16 %v530_v16, %v530_v16 }
  0xd8   :  { %v551_v22 = vadd.f32 %v1232_v20, %v1444_v34  ;;  %v414_v23 = vpop.f32.mrf.mxu0  ;;  %v542_v26 = vpop.f32.mrf.mxu1 }
  0xd9   :  { %899 = vst.msk [vmem:[%s1769_s3 + $0x14] sm:$0xf] %vm893_vm2, %v1096_v18  ;;  %v1101_v24 = vpack.c.bf16 %v423_v19, %v423_v19  ;;  %v415_v25 = vadd.f32 %v1444_v34, %v414_v23  ;;  %931 = vst.msk [vmem:[%s1769_s3 + $0x94] sm:$0xf] %vm893_vm2, %v1128_v21  ;;  %v543_v28 = vadd.f32 %v1444_v34, %v542_v26 }
  0xda   :  { %v1133_v27 = vpack.c.bf16 %v551_v22, %v551_v22  ;;  %v1201_v29 = vpop.f32.mrf.mxu0  ;;  %v1233_v32 = vpop.f32.mrf.mxu1 }
  0xdb   :  { %904 = vst.msk [vmem:[%s1769_s3 + $0x28] sm:$0xf] %vm893_vm2, %v1101_v24  ;;  %v1099_v30 = vpack.c.bf16 %v415_v25, %v415_v25  ;;  %v426_v31 = vadd.f32 %v1201_v29, %v1444_v34  ;;  %v1131_v33 = vpack.c.bf16 %v543_v28, %v543_v28  ;;  %v554_v35 = vadd.f32 %v1233_v32, %v1444_v34 }
  0xdc   :  { %936 = vst.msk [vmem:[%s1769_s3 + $0xa8] sm:$0xf] %vm893_vm2, %v1133_v27  ;;  %v417_v36 = vpop.f32.mrf.mxu0  ;;  %v545_v39 = vpop.f32.mrf.mxu1 }
  0xdd   :  { %902 = vst.msk [vmem:[%s1769_s3 + $0x20] sm:$0xf] %vm893_vm2, %v1099_v30  ;;  %v1102_v37 = vpack.c.bf16 %v426_v31, %v426_v31  ;;  %v418_v38 = vadd.f32 %v1444_v34, %v417_v36  ;;  %934 = vst.msk [vmem:[%s1769_s3 + $0xa0] sm:$0xf] %vm893_vm2, %v1131_v33  ;;  %v1134_v40 = vpack.c.bf16 %v554_v35, %v554_v35 }
  0xde   :  { %v546_v41 = vadd.f32 %v1444_v34, %v545_v39  ;;  %v1204_v42 = vpop.f32.mrf.mxu0  ;;  %v1236_v45 = vpop.f32.mrf.mxu1 }
  0xdf   :  { %905 = vst.msk [vmem:[%s1769_s3 + $0x2c] sm:$0xf] %vm893_vm2, %v1102_v37  ;;  %v1100_v43 = vpack.c.bf16 %v418_v38, %v418_v38  ;;  %v439_v44 = vadd.f32 %v1204_v42, %v1444_v34  ;;  %937 = vst.msk [vmem:[%s1769_s3 + $0xac] sm:$0xf] %vm893_vm2, %v1134_v40  ;;  %v567_v47 = vadd.f32 %v1236_v45, %v1444_v34 }
  0xe0   :  { %v1132_v46 = vpack.c.bf16 %v546_v41, %v546_v41  ;;  %v430_v48 = vpop.f32.mrf.mxu0  ;;  %v558_v51 = vpop.f32.mrf.mxu1 }
  0xe1   :  { %903 = vst.msk [vmem:[%s1769_s3 + $0x24] sm:$0xf] %vm893_vm2, %v1100_v43  ;;  %v1105_v49 = vpack.c.bf16 %v439_v44, %v439_v44  ;;  %v431_v50 = vadd.f32 %v1444_v34, %v430_v48  ;;  %v1137_v52 = vpack.c.bf16 %v567_v47, %v567_v47  ;;  %v559_v53 = vadd.f32 %v1444_v34, %v558_v51 }
  0xe2   :  { %935 = vst.msk [vmem:[%s1769_s3 + $0xa4] sm:$0xf] %vm893_vm2, %v1132_v46  ;;  %v1205_v54 = vpop.f32.mrf.mxu0  ;;  %v1237_v57 = vpop.f32.mrf.mxu1 }
  0xe3   :  { %908 = vst.msk [vmem:[%s1769_s3 + $0x38] sm:$0xf] %vm893_vm2, %v1105_v49  ;;  %v1103_v55 = vpack.c.bf16 %v431_v50, %v431_v50  ;;  %v442_v56 = vadd.f32 %v1205_v54, %v1444_v34  ;;  %940 = vst.msk [vmem:[%s1769_s3 + $0xb8] sm:$0xf] %vm893_vm2, %v1137_v52  ;;  %v1135_v58 = vpack.c.bf16 %v559_v53, %v559_v53 }
  0xe4   :  { %v570_v59 = vadd.f32 %v1237_v57, %v1444_v34  ;;  %v433_v60 = vpop.f32.mrf.mxu0  ;;  %v561_v63 = vpop.f32.mrf.mxu1 }
  0xe5   :  { %906 = vst.msk [vmem:[%s1769_s3 + $0x30] sm:$0xf] %vm893_vm2, %v1103_v55  ;;  %v1106_v61 = vpack.c.bf16 %v442_v56, %v442_v56  ;;  %v434_v62 = vadd.f32 %v1444_v34, %v433_v60  ;;  %938 = vst.msk [vmem:[%s1769_s3 + $0xb0] sm:$0xf] %vm893_vm2, %v1135_v58  ;;  %v562_v1 = vadd.f32 %v1444_v34, %v561_v63 }
  0xe6   :  { %v1138_v0 = vpack.c.bf16 %v570_v59, %v570_v59  ;;  %v1208_v2 = vpop.f32.mrf.mxu0  ;;  %v1240_v5 = vpop.f32.mrf.mxu1 }
  0xe7   :  { %909 = vst.msk [vmem:[%s1769_s3 + $0x3c] sm:$0xf] %vm893_vm2, %v1106_v61  ;;  %v1104_v3 = vpack.c.bf16 %v434_v62, %v434_v62  ;;  %v455_v4 = vadd.f32 %v1208_v2, %v1444_v34  ;;  %v1136_v6 = vpack.c.bf16 %v562_v1, %v562_v1  ;;  %v583_v7 = vadd.f32 %v1240_v5, %v1444_v34 }
  0xe8   :  { %941 = vst.msk [vmem:[%s1769_s3 + $0xbc] sm:$0xf] %vm893_vm2, %v1138_v0  ;;  %v446_v8 = vpop.f32.mrf.mxu0  ;;  %v574_v11 = vpop.f32.mrf.mxu1 }
  0xe9   :  { %907 = vst.msk [vmem:[%s1769_s3 + $0x34] sm:$0xf] %vm893_vm2, %v1104_v3  ;;  %v1109_v9 = vpack.c.bf16 %v455_v4, %v455_v4  ;;  %v447_v10 = vadd.f32 %v1444_v34, %v446_v8  ;;  %939 = vst.msk [vmem:[%s1769_s3 + $0xb4] sm:$0xf] %vm893_vm2, %v1136_v6  ;;  %v1141_v12 = vpack.c.bf16 %v583_v7, %v583_v7 }
  0xea   :  { %v575_v13 = vadd.f32 %v1444_v34, %v574_v11  ;;  %v1209_v14 = vpop.f32.mrf.mxu0  ;;  %v1241_v17 = vpop.f32.mrf.mxu1 }
  0xeb   :  { %912 = vst.msk [vmem:[%s1769_s3 + $0x48] sm:$0xf] %vm893_vm2, %v1109_v9  ;;  %v1107_v15 = vpack.c.bf16 %v447_v10, %v447_v10  ;;  %v458_v16 = vadd.f32 %v1209_v14, %v1444_v34  ;;  %944 = vst.msk [vmem:[%s1769_s3 + $0xc8] sm:$0xf] %vm893_vm2, %v1141_v12  ;;  %v586_v19 = vadd.f32 %v1241_v17, %v1444_v34 }
  0xec   :  { %v1139_v18 = vpack.c.bf16 %v575_v13, %v575_v13  ;;  %v449_v20 = vpop.f32.mrf.mxu0  ;;  %v577_v23 = vpop.f32.mrf.mxu1 }
  0xed   :  { %910 = vst.msk [vmem:[%s1769_s3 + $0x40] sm:$0xf] %vm893_vm2, %v1107_v15  ;;  %v1110_v21 = vpack.c.bf16 %v458_v16, %v458_v16  ;;  %v450_v22 = vadd.f32 %v1444_v34, %v449_v20  ;;  %v1142_v24 = vpack.c.bf16 %v586_v19, %v586_v19  ;;  %v578_v25 = vadd.f32 %v1444_v34, %v577_v23 }
  0xee   :  { %942 = vst.msk [vmem:[%s1769_s3 + $0xc0] sm:$0xf] %vm893_vm2, %v1139_v18  ;;  %v1212_v26 = vpop.f32.mrf.mxu0  ;;  %v1244_v29 = vpop.f32.mrf.mxu1 }
  0xef   :  { %913 = vst.msk [vmem:[%s1769_s3 + $0x4c] sm:$0xf] %vm893_vm2, %v1110_v21  ;;  %v1108_v27 = vpack.c.bf16 %v450_v22, %v450_v22  ;;  %v471_v28 = vadd.f32 %v1212_v26, %v1444_v34  ;;  %945 = vst.msk [vmem:[%s1769_s3 + $0xcc] sm:$0xf] %vm893_vm2, %v1142_v24  ;;  %v1140_v30 = vpack.c.bf16 %v578_v25, %v578_v25 }
  0xf0   :  { %v599_v31 = vadd.f32 %v1244_v29, %v1444_v34  ;;  %v462_v32 = vpop.f32.mrf.mxu0  ;;  %v590_v36 = vpop.f32.mrf.mxu1 }
  0xf1   :  { %911 = vst.msk [vmem:[%s1769_s3 + $0x44] sm:$0xf] %vm893_vm2, %v1108_v27  ;;  %v1113_v33 = vpack.c.bf16 %v471_v28, %v471_v28  ;;  %v463_v35 = vadd.f32 %v1444_v34, %v462_v32  ;;  %943 = vst.msk [vmem:[%s1769_s3 + $0xc4] sm:$0xf] %vm893_vm2, %v1140_v30  ;;  %v591_v38 = vadd.f32 %v1444_v34, %v590_v36 }
  0xf2   :  { %v1145_v37 = vpack.c.bf16 %v599_v31, %v599_v31  ;;  %v1213_v39 = vpop.f32.mrf.mxu0  ;;  %v1245_v42 = vpop.f32.mrf.mxu1 }
  0xf3   :  { %916 = vst.msk [vmem:[%s1769_s3 + $0x58] sm:$0xf] %vm893_vm2, %v1113_v33  ;;  %v1111_v40 = vpack.c.bf16 %v463_v35, %v463_v35  ;;  %v474_v41 = vadd.f32 %v1213_v39, %v1444_v34  ;;  %v1143_v43 = vpack.c.bf16 %v591_v38, %v591_v38  ;;  %v602_v44 = vadd.f32 %v1245_v42, %v1444_v34 }
  0xf4   :  { %948 = vst.msk [vmem:[%s1769_s3 + $0xd8] sm:$0xf] %vm893_vm2, %v1145_v37  ;;  %v465_v45 = vpop.f32.mrf.mxu0  ;;  %v593_v48 = vpop.f32.mrf.mxu1 }
  0xf5   :  { %914 = vst.msk [vmem:[%s1769_s3 + $0x50] sm:$0xf] %vm893_vm2, %v1111_v40  ;;  %v1114_v46 = vpack.c.bf16 %v474_v41, %v474_v41  ;;  %v466_v47 = vadd.f32 %v1444_v34, %v465_v45  ;;  %946 = vst.msk [vmem:[%s1769_s3 + $0xd0] sm:$0xf] %vm893_vm2, %v1143_v43  ;;  %v1146_v49 = vpack.c.bf16 %v602_v44, %v602_v44 }
  0xf6   :  { %v594_v50 = vadd.f32 %v1444_v34, %v593_v48  ;;  %v1216_v51 = vpop.f32.mrf.mxu0  ;;  %v1248_v54 = vpop.f32.mrf.mxu1 }
  0xf7   :  { %917 = vst.msk [vmem:[%s1769_s3 + $0x5c] sm:$0xf] %vm893_vm2, %v1114_v46  ;;  %v1112_v52 = vpack.c.bf16 %v466_v47, %v466_v47  ;;  %v487_v53 = vadd.f32 %v1216_v51, %v1444_v34  ;;  %949 = vst.msk [vmem:[%s1769_s3 + $0xdc] sm:$0xf] %vm893_vm2, %v1146_v49  ;;  %v615_v56 = vadd.f32 %v1248_v54, %v1444_v34 }
  0xf8   :  { %v1144_v55 = vpack.c.bf16 %v594_v50, %v594_v50  ;;  %v478_v57 = vpop.f32.mrf.mxu0  ;;  %v606_v60 = vpop.f32.mrf.mxu1 }
  0xf9   :  { %915 = vst.msk [vmem:[%s1769_s3 + $0x54] sm:$0xf] %vm893_vm2, %v1112_v52  ;;  %v1117_v58 = vpack.c.bf16 %v487_v53, %v487_v53  ;;  %v479_v59 = vadd.f32 %v1444_v34, %v478_v57  ;;  %v1149_v61 = vpack.c.bf16 %v615_v56, %v615_v56  ;;  %v607_v62 = vadd.f32 %v1444_v34, %v606_v60 }
  0xfa   :  { %947 = vst.msk [vmem:[%s1769_s3 + $0xd4] sm:$0xf] %vm893_vm2, %v1144_v55  ;;  %v1217_v63 = vpop.f32.mrf.mxu0  ;;  %v1249_v2 = vpop.f32.mrf.mxu1 }
  0xfb   :  { %920 = vst.msk [vmem:[%s1769_s3 + $0x68] sm:$0xf] %vm893_vm2, %v1117_v58  ;;  %v1115_v0 = vpack.c.bf16 %v479_v59, %v479_v59  ;;  %v490_v1 = vadd.f32 %v1217_v63, %v1444_v34  ;;  %952 = vst.msk [vmem:[%s1769_s3 + $0xe8] sm:$0xf] %vm893_vm2, %v1149_v61  ;;  %v1147_v3 = vpack.c.bf16 %v607_v62, %v607_v62 }
  0xfc   :  { %v618_v4 = vadd.f32 %v1249_v2, %v1444_v34  ;;  %v481_v5 = vpop.f32.mrf.mxu0  ;;  %v609_v8 = vpop.f32.mrf.mxu1 }
  0xfd   :  { %918 = vst.msk [vmem:[%s1769_s3 + $0x60] sm:$0xf] %vm893_vm2, %v1115_v0  ;;  %v1118_v6 = vpack.c.bf16 %v490_v1, %v490_v1  ;;  %v482_v7 = vadd.f32 %v1444_v34, %v481_v5  ;;  %950 = vst.msk [vmem:[%s1769_s3 + $0xe0] sm:$0xf] %vm893_vm2, %v1147_v3  ;;  %v610_v10 = vadd.f32 %v1444_v34, %v609_v8 }
  0xfe   :  { %v1150_v9 = vpack.c.bf16 %v618_v4, %v618_v4  ;;  %v1220_v11 = vpop.f32.mrf.mxu0  ;;  %v1252_v14 = vpop.f32.mrf.mxu1 }
  0xff   :  { %921 = vst.msk [vmem:[%s1769_s3 + $0x6c] sm:$0xf] %vm893_vm2, %v1118_v6  ;;  %v1116_v12 = vpack.c.bf16 %v482_v7, %v482_v7  ;;  %v503_v13 = vadd.f32 %v1220_v11, %v1444_v34  ;;  %v1148_v15 = vpack.c.bf16 %v610_v10, %v610_v10  ;;  %v631_v16 = vadd.f32 %v1252_v14, %v1444_v34 }
 0x100   :  { %953 = vst.msk [vmem:[%s1769_s3 + $0xec] sm:$0xf] %vm893_vm2, %v1150_v9  ;;  %v494_v17 = vpop.f32.mrf.mxu0  ;;  %v622_v20 = vpop.f32.mrf.mxu1 }
 0x101   :  { %919 = vst.msk [vmem:[%s1769_s3 + $0x64] sm:$0xf] %vm893_vm2, %v1116_v12  ;;  %v1121_v18 = vpack.c.bf16 %v503_v13, %v503_v13  ;;  %v495_v19 = vadd.f32 %v1444_v34, %v494_v17  ;;  %951 = vst.msk [vmem:[%s1769_s3 + $0xe4] sm:$0xf] %vm893_vm2, %v1148_v15  ;;  %v1153_v21 = vpack.c.bf16 %v631_v16, %v631_v16 }
 0x102   :  { %v623_v22 = vadd.f32 %v1444_v34, %v622_v20  ;;  %v1221_v23 = vpop.f32.mrf.mxu0  ;;  %v1253_v26 = vpop.f32.mrf.mxu1 }
 0x103   :  { %924 = vst.msk [vmem:[%s1769_s3 + $0x78] sm:$0xf] %vm893_vm2, %v1121_v18  ;;  %v1119_v24 = vpack.c.bf16 %v495_v19, %v495_v19  ;;  %v506_v25 = vadd.f32 %v1221_v23, %v1444_v34  ;;  %956 = vst.msk [vmem:[%s1769_s3 + $0xf8] sm:$0xf] %vm893_vm2, %v1153_v21  ;;  %v634_v28 = vadd.f32 %v1253_v26, %v1444_v34 }
 0x104   :  { %v1151_v27 = vpack.c.bf16 %v623_v22, %v623_v22  ;;  %v497_v29 = vpop.f32.mrf.mxu0  ;;  %v625_v32 = vpop.f32.mrf.mxu1 }
 0x105   :  { %922 = vst.msk [vmem:[%s1769_s3 + $0x70] sm:$0xf] %vm893_vm2, %v1119_v24  ;;  %v1122_v30 = vpack.c.bf16 %v506_v25, %v506_v25  ;;  %v498_v31 = vadd.f32 %v1444_v34, %v497_v29  ;;  %v1154_v33 = vpack.c.bf16 %v634_v28, %v634_v28  ;;  %v626_v35 = vadd.f32 %v1444_v34, %v625_v32 }
 0x106   :  { %954 = vst.msk [vmem:[%s1769_s3 + $0xf0] sm:$0xf] %vm893_vm2, %v1151_v27 }
 0x107   :  { %925 = vst.msk [vmem:[%s1769_s3 + $0x7c] sm:$0xf] %vm893_vm2, %v1122_v30  ;;  %v1120_v36 = vpack.c.bf16 %v498_v31, %v498_v31  ;;  %957 = vst.msk [vmem:[%s1769_s3 + $0xfc] sm:$0xf] %vm893_vm2, %v1154_v33  ;;  %v1152_v37 = vpack.c.bf16 %v626_v35, %v626_v35 }
 0x109   :  { %923 = vst.msk [vmem:[%s1769_s3 + $0x74] sm:$0xf] %vm893_vm2, %v1120_v36  ;;  %955 = vst.msk [vmem:[%s1769_s3 + $0xf4] sm:$0xf] %vm893_vm2, %v1152_v37 }

// kernel: bottleneck_forward.4
= control target key start
LH: loop header
LB: loop body
LE: loop exit
PB: predicated region body
PF: predicated region fallthrough
CT: control target
= control target key end

     0   :  { %vm344_vm0 = vcmask 1041408   ;;  %vm247_vm1 = vcmask 31744   ;;  %vm957_vm2 = vcmask 27648   ;;  %s1830_s1 = inlined_call_operand.vmem [shape: bf16[4,4], index: 1, kind: input, shape index: {}]   ;;  %s1831_s0 = inlined_call_operand.vmem [shape: bf16[512,4], index: 0, kind: input, shape index: {}]   ;;  %s1832_s2 = inlined_call_operand.vmem [shape: f32[1,4], index: 2, kind: input, shape index: {}]   ;;  %s1833_s3 = inlined_call_operand.vmem [shape: bf16[512,4], index: 3, kind: output, shape index: {}]  }
   0x1   :  { %v79_v0 = vld [vmem:[%s1830_s1] sm:$0x3]  ;;  %v1324_v4 = vld [vmem:[%s1831_s0 + $0x8] sm:$0xff]   ;;  %v1326_v6 = vld [vmem:[%s1831_s0 + $0x10] sm:$0xff]  }
   0x2   :  { %1320 = vmatprep.subr.msk.bf16.mxu0 %vm344_vm0, %v79_v0  ;;  %1321 = vmatprep.subr.msk.bf16.mxu1 %vm344_vm0, %v79_v0  ;;  %v346_v1 = vsel %vm344_vm0, %v79_v0, 0  ;;  %v1322_v2 = vld [vmem:[%s1831_s0] sm:$0xff]   ;;  %v1325_v5 = vld [vmem:[%s1831_s0 + $0x88] sm:$0xff]   ;;  %v1327_v7 = vld [vmem:[%s1831_s0 + $0x90] sm:$0xff]  }
   0x3   :  { %1253 = vmatpush3.bf16.msra.mxu0 %v346_v1  ;;  %1319 = vmatpush3.bf16.msra.mxu1 %v346_v1  ;;  %v1323_v3 = vld [vmem:[%s1831_s0 + $0x80] sm:$0xff]   ;;  %v1328_v8 = vld [vmem:[%s1831_s0 + $0x18] sm:$0xff]   ;;  %v1332_v12 = vld [vmem:[%s1831_s0 + $0x28] sm:$0xff]  }
   0x4   :  { %1254 = vmatprep.mubr.msk.bf16.mxu0 %vm247_vm1, %v1322_v2  ;;  %1286 = vmatprep.mubr.msk.bf16.mxu1 %vm247_vm1, %v1323_v3  ;;  %v1329_v9 = vld [vmem:[%s1831_s0 + $0x98] sm:$0xff]   ;;  %v1330_v10 = vld [vmem:[%s1831_s0 + $0x20] sm:$0xff]   ;;  %v1333_v13 = vld [vmem:[%s1831_s0 + $0xa8] sm:$0xff]  }
   0x5   :  { %v1331_v11 = vld [vmem:[%s1831_s0 + $0xa0] sm:$0xff]   ;;  %v1334_v14 = vld [vmem:[%s1831_s0 + $0x30] sm:$0xff]   ;;  %v1336_v16 = vld [vmem:[%s1831_s0 + $0x38] sm:$0xff]  }
   0x6   :  { %1255 = vmatmul.mubr.msk.bf16.vlgmr.msra.gmra.mxu0 %vm247_vm1, %v1324_v4  ;;  %1287 = vmatmul.mubr.msk.bf16.vlgmr.msra.gmra.mxu1 %vm247_vm1, %v1325_v5  ;;  %v1335_v15 = vld [vmem:[%s1831_s0 + $0xb0] sm:$0xff]   ;;  %v1337_v17 = vld [vmem:[%s1831_s0 + $0xb8] sm:$0xff]   ;;  %v1338_v18 = vld [vmem:[%s1831_s0 + $0x40] sm:$0xff]  }
   0x7   :  { %1258 = vmatprep.mubr.msk.bf16.mxu0 %vm247_vm1, %v1326_v6  ;;  %1290 = vmatprep.mubr.msk.bf16.mxu1 %vm247_vm1, %v1327_v7  ;;  %v1339_v19 = vld [vmem:[%s1831_s0 + $0xc0] sm:$0xff]   ;;  %v1340_v20 = vld [vmem:[%s1831_s0 + $0x48] sm:$0xff]   ;;  %v1342_v22 = vld [vmem:[%s1831_s0 + $0x50] sm:$0xff]  }
   0x8   :  { %v1341_v21 = vld [vmem:[%s1831_s0 + $0xc8] sm:$0xff]   ;;  %v1343_v23 = vld [vmem:[%s1831_s0 + $0xd0] sm:$0xff]   ;;  %v1344_v24 = vld [vmem:[%s1831_s0 + $0x58] sm:$0xff]  }
   0x9   :  { %v1345_v25 = vld [vmem:[%s1831_s0 + $0xd8] sm:$0xff]   ;;  %v1346_v26 = vld [vmem:[%s1831_s0 + $0x60] sm:$0xff]   ;;  %v1348_v28 = vld [vmem:[%s1831_s0 + $0x68] sm:$0xff]  }
   0xa   :  { %v1347_v27 = vld [vmem:[%s1831_s0 + $0xe0] sm:$0xff]   ;;  %v1349_v29 = vld [vmem:[%s1831_s0 + $0xe8] sm:$0xff]   ;;  %v1350_v30 = vld [vmem:[%s1831_s0 + $0x70] sm:$0xff]  }
   0xb   :  { %v1351_v31 = vld [vmem:[%s1831_s0 + $0xf0] sm:$0xff]   ;;  %v1352_v32 = vld [vmem:[%s1831_s0 + $0x78] sm:$0xff]   ;;  %v1508_v34 = vld [vmem:[%s1832_s2] ss:$0 sm:$0xff] }
   0xc   :  { %v1353_v33 = vld [vmem:[%s1831_s0 + $0xf8] sm:$0xff]  }
   0xe   :  { %1259 = vmatmul.mubr.msk.bf16.gmra.mxu0 %vm247_vm1, %v1328_v8  ;;  %1291 = vmatmul.mubr.msk.bf16.gmra.mxu1 %vm247_vm1, %v1329_v9 }
   0xf   :  { %1262 = vmatprep.mubr.msk.bf16.mxu0 %vm247_vm1, %v1330_v10  ;;  %1294 = vmatprep.mubr.msk.bf16.mxu1 %vm247_vm1, %v1331_v11 }
  0x16   :  { %1263 = vmatmul.mubr.msk.bf16.gmra.mxu0 %vm247_vm1, %v1332_v12  ;;  %1295 = vmatmul.mubr.msk.bf16.gmra.mxu1 %vm247_vm1, %v1333_v13 }
  0x17   :  { %1266 = vmatprep.mubr.msk.bf16.mxu0 %vm247_vm1, %v1334_v14  ;;  %1298 = vmatprep.mubr.msk.bf16.mxu1 %vm247_vm1, %v1335_v15 }
  0x1e   :  { %1267 = vmatmul.mubr.msk.bf16.gmra.mxu0 %vm247_vm1, %v1336_v16  ;;  %1299 = vmatmul.mubr.msk.bf16.gmra.mxu1 %vm247_vm1, %v1337_v17 }
  0x1f   :  { %1270 = vmatprep.mubr.msk.bf16.mxu0 %vm247_vm1, %v1338_v18  ;;  %1302 = vmatprep.mubr.msk.bf16.mxu1 %vm247_vm1, %v1339_v19 }
  0x26   :  { %1271 = vmatmul.mubr.msk.bf16.gmra.mxu0 %vm247_vm1, %v1340_v20  ;;  %1303 = vmatmul.mubr.msk.bf16.gmra.mxu1 %vm247_vm1, %v1341_v21 }
  0x27   :  { %1274 = vmatprep.mubr.msk.bf16.mxu0 %vm247_vm1, %v1342_v22  ;;  %1306 = vmatprep.mubr.msk.bf16.mxu1 %vm247_vm1, %v1343_v23 }
  0x2e   :  { %1275 = vmatmul.mubr.msk.bf16.gmra.mxu0 %vm247_vm1, %v1344_v24  ;;  %1307 = vmatmul.mubr.msk.bf16.gmra.mxu1 %vm247_vm1, %v1345_v25 }
  0x2f   :  { %1278 = vmatprep.mubr.msk.bf16.mxu0 %vm247_vm1, %v1346_v26  ;;  %1310 = vmatprep.mubr.msk.bf16.mxu1 %vm247_vm1, %v1347_v27 }
  0x36   :  { %1279 = vmatmul.mubr.msk.bf16.gmra.mxu0 %vm247_vm1, %v1348_v28  ;;  %1311 = vmatmul.mubr.msk.bf16.gmra.mxu1 %vm247_vm1, %v1349_v29 }
  0x37   :  { %1282 = vmatprep.mubr.msk.bf16.mxu0 %vm247_vm1, %v1350_v30  ;;  %1314 = vmatprep.mubr.msk.bf16.mxu1 %vm247_vm1, %v1351_v31 }
  0x3e   :  { %1283 = vmatmul.mubr.msk.bf16.gmra.mxu0 %vm247_vm1, %v1352_v32  ;;  %1315 = vmatmul.mubr.msk.bf16.gmra.mxu1 %vm247_vm1, %v1353_v33 }
  0xc6   :  { %v1256_v35 = vpop.f32.mrf.mxu0  ;;  %v1288_v37 = vpop.f32.mrf.mxu1 }
  0xc7   :  { %v391_v36 = vadd.f32 %v1256_v35, %v1508_v34  ;;  %v519_v38 = vadd.f32 %v1288_v37, %v1508_v34 }
  0xc8   :  { %v382_v39 = vpop.f32.mrf.mxu0  ;;  %v510_v42 = vpop.f32.mrf.mxu1 }
  0xc9   :  { %v639_v40 = vmax.f32 %v391_v36, 0.0  ;;  %v383_v41 = vadd.f32 %v1508_v34, %v382_v39  ;;  %v671_v43 = vmax.f32 %v519_v38, 0.0  ;;  %v511_v44 = vadd.f32 %v1508_v34, %v510_v42 }
  0xca   :  { %v1257_v45 = vpop.f32.mrf.mxu0  ;;  %v1289_v49 = vpop.f32.mrf.mxu1 }
  0xcb   :  { %v1157_v46 = vpack.c.bf16 %v639_v40, %v639_v40  ;;  %v637_v47 = vmax.f32 %v383_v41, 0.0  ;;  %v394_v48 = vadd.f32 %v1257_v45, %v1508_v34  ;;  %v1189_v50 = vpack.c.bf16 %v671_v43, %v671_v43 }
  0xcc   :  { %v669_v51 = vmax.f32 %v511_v44, 0.0  ;;  %v522_v52 = vadd.f32 %v1289_v49, %v1508_v34  ;;  %v385_v53 = vpop.f32.mrf.mxu0  ;;  %v513_v57 = vpop.f32.mrf.mxu1 }
  0xcd   :  { %960 = vst.msk [vmem:[%s1833_s3 + $0x8] sm:$0xf] %vm957_vm2, %v1157_v46  ;;  %v1155_v54 = vpack.c.bf16 %v637_v47, %v637_v47  ;;  %v640_v55 = vmax.f32 %v394_v48, 0.0  ;;  %v386_v56 = vadd.f32 %v1508_v34, %v385_v53  ;;  %992 = vst.msk [vmem:[%s1833_s3 + $0x88] sm:$0xf] %vm957_vm2, %v1189_v50  ;;  %v514_v60 = vadd.f32 %v1508_v34, %v513_v57 }
  0xce   :  { %v1187_v58 = vpack.c.bf16 %v669_v51, %v669_v51  ;;  %v672_v59 = vmax.f32 %v522_v52, 0.0  ;;  %v1260_v61 = vpop.f32.mrf.mxu0  ;;  %v1292_v1 = vpop.f32.mrf.mxu1 }
  0xcf   :  { %958 = vst.msk [vmem:[%s1833_s3] sm:$0xf] %vm957_vm2, %v1155_v54  ;;  %v1158_v62 = vpack.c.bf16 %v640_v55, %v640_v55  ;;  %v638_v63 = vmax.f32 %v386_v56, 0.0  ;;  %v407_v0 = vadd.f32 %v1260_v61, %v1508_v34  ;;  %v670_v3 = vmax.f32 %v514_v60, 0.0 }
  0xd0   :  { %990 = vst.msk [vmem:[%s1833_s3 + $0x80] sm:$0xf] %vm957_vm2, %v1187_v58  ;;  %v1190_v2 = vpack.c.bf16 %v672_v59, %v672_v59  ;;  %v535_v4 = vadd.f32 %v1292_v1, %v1508_v34  ;;  %v398_v5 = vpop.f32.mrf.mxu0  ;;  %v526_v9 = vpop.f32.mrf.mxu1 }
  0xd1   :  { %961 = vst.msk [vmem:[%s1833_s3 + $0xc] sm:$0xf] %vm957_vm2, %v1158_v62  ;;  %v1156_v6 = vpack.c.bf16 %v638_v63, %v638_v63  ;;  %v643_v7 = vmax.f32 %v407_v0, 0.0  ;;  %v399_v8 = vadd.f32 %v1508_v34, %v398_v5  ;;  %v1188_v10 = vpack.c.bf16 %v670_v3, %v670_v3 }
  0xd2   :  { %993 = vst.msk [vmem:[%s1833_s3 + $0x8c] sm:$0xf] %vm957_vm2, %v1190_v2  ;;  %v675_v11 = vmax.f32 %v535_v4, 0.0  ;;  %v527_v12 = vadd.f32 %v1508_v34, %v526_v9  ;;  %v1261_v13 = vpop.f32.mrf.mxu0  ;;  %v1293_v17 = vpop.f32.mrf.mxu1 }
  0xd3   :  { %959 = vst.msk [vmem:[%s1833_s3 + $0x4] sm:$0xf] %vm957_vm2, %v1156_v6  ;;  %v1161_v14 = vpack.c.bf16 %v643_v7, %v643_v7  ;;  %v641_v15 = vmax.f32 %v399_v8, 0.0  ;;  %v410_v16 = vadd.f32 %v1261_v13, %v1508_v34  ;;  %991 = vst.msk [vmem:[%s1833_s3 + $0x84] sm:$0xf] %vm957_vm2, %v1188_v10  ;;  %v538_v20 = vadd.f32 %v1293_v17, %v1508_v34 }
  0xd4   :  { %v1193_v18 = vpack.c.bf16 %v675_v11, %v675_v11  ;;  %v673_v19 = vmax.f32 %v527_v12, 0.0  ;;  %v401_v21 = vpop.f32.mrf.mxu0  ;;  %v529_v25 = vpop.f32.mrf.mxu1 }
  0xd5   :  { %964 = vst.msk [vmem:[%s1833_s3 + $0x18] sm:$0xf] %vm957_vm2, %v1161_v14  ;;  %v1159_v22 = vpack.c.bf16 %v641_v15, %v641_v15  ;;  %v644_v23 = vmax.f32 %v410_v16, 0.0  ;;  %v402_v24 = vadd.f32 %v1508_v34, %v401_v21  ;;  %v676_v27 = vmax.f32 %v538_v20, 0.0 }
  0xd6   :  { %996 = vst.msk [vmem:[%s1833_s3 + $0x98] sm:$0xf] %vm957_vm2, %v1193_v18  ;;  %v1191_v26 = vpack.c.bf16 %v673_v19, %v673_v19  ;;  %v530_v28 = vadd.f32 %v1508_v34, %v529_v25  ;;  %v1264_v29 = vpop.f32.mrf.mxu0  ;;  %v1296_v33 = vpop.f32.mrf.mxu1 }
  0xd7   :  { %962 = vst.msk [vmem:[%s1833_s3 + $0x10] sm:$0xf] %vm957_vm2, %v1159_v22  ;;  %v1162_v30 = vpack.c.bf16 %v644_v23, %v644_v23  ;;  %v642_v31 = vmax.f32 %v402_v24, 0.0  ;;  %v423_v32 = vadd.f32 %v1264_v29, %v1508_v34  ;;  %v1194_v35 = vpack.c.bf16 %v676_v27, %v676_v27 }
  0xd8   :  { %994 = vst.msk [vmem:[%s1833_s3 + $0x90] sm:$0xf] %vm957_vm2, %v1191_v26  ;;  %v674_v36 = vmax.f32 %v530_v28, 0.0  ;;  %v551_v37 = vadd.f32 %v1296_v33, %v1508_v34  ;;  %v414_v38 = vpop.f32.mrf.mxu0  ;;  %v542_v42 = vpop.f32.mrf.mxu1 }
  0xd9   :  { %965 = vst.msk [vmem:[%s1833_s3 + $0x1c] sm:$0xf] %vm957_vm2, %v1162_v30  ;;  %v1160_v39 = vpack.c.bf16 %v642_v31, %v642_v31  ;;  %v647_v40 = vmax.f32 %v423_v32, 0.0  ;;  %v415_v41 = vadd.f32 %v1508_v34, %v414_v38  ;;  %997 = vst.msk [vmem:[%s1833_s3 + $0x9c] sm:$0xf] %vm957_vm2, %v1194_v35  ;;  %v543_v45 = vadd.f32 %v1508_v34, %v542_v42 }
  0xda   :  { %v1192_v43 = vpack.c.bf16 %v674_v36, %v674_v36  ;;  %v679_v44 = vmax.f32 %v551_v37, 0.0  ;;  %v1265_v46 = vpop.f32.mrf.mxu0  ;;  %v1297_v50 = vpop.f32.mrf.mxu1 }
  0xdb   :  { %963 = vst.msk [vmem:[%s1833_s3 + $0x14] sm:$0xf] %vm957_vm2, %v1160_v39  ;;  %v1165_v47 = vpack.c.bf16 %v647_v40, %v647_v40  ;;  %v645_v48 = vmax.f32 %v415_v41, 0.0  ;;  %v426_v49 = vadd.f32 %v1265_v46, %v1508_v34  ;;  %v677_v52 = vmax.f32 %v543_v45, 0.0 }
  0xdc   :  { %995 = vst.msk [vmem:[%s1833_s3 + $0x94] sm:$0xf] %vm957_vm2, %v1192_v43  ;;  %v1197_v51 = vpack.c.bf16 %v679_v44, %v679_v44  ;;  %v554_v53 = vadd.f32 %v1297_v50, %v1508_v34  ;;  %v417_v54 = vpop.f32.mrf.mxu0  ;;  %v545_v58 = vpop.f32.mrf.mxu1 }
  0xdd   :  { %968 = vst.msk [vmem:[%s1833_s3 + $0x28] sm:$0xf] %vm957_vm2, %v1165_v47  ;;  %v1163_v55 = vpack.c.bf16 %v645_v48, %v645_v48  ;;  %v648_v56 = vmax.f32 %v426_v49, 0.0  ;;  %v418_v57 = vadd.f32 %v1508_v34, %v417_v54  ;;  %v1195_v59 = vpack.c.bf16 %v677_v52, %v677_v52 }
  0xde   :  { %1000 = vst.msk [vmem:[%s1833_s3 + $0xa8] sm:$0xf] %vm957_vm2, %v1197_v51  ;;  %v680_v60 = vmax.f32 %v554_v53, 0.0  ;;  %v546_v61 = vadd.f32 %v1508_v34, %v545_v58  ;;  %v1268_v62 = vpop.f32.mrf.mxu0  ;;  %v1300_v2 = vpop.f32.mrf.mxu1 }
  0xdf   :  { %966 = vst.msk [vmem:[%s1833_s3 + $0x20] sm:$0xf] %vm957_vm2, %v1163_v55  ;;  %v1166_v63 = vpack.c.bf16 %v648_v56, %v648_v56  ;;  %v646_v0 = vmax.f32 %v418_v57, 0.0  ;;  %v439_v1 = vadd.f32 %v1268_v62, %v1508_v34  ;;  %998 = vst.msk [vmem:[%s1833_s3 + $0xa0] sm:$0xf] %vm957_vm2, %v1195_v59  ;;  %v567_v5 = vadd.f32 %v1300_v2, %v1508_v34 }
  0xe0   :  { %v1198_v3 = vpack.c.bf16 %v680_v60, %v680_v60  ;;  %v678_v4 = vmax.f32 %v546_v61, 0.0  ;;  %v430_v6 = vpop.f32.mrf.mxu0  ;;  %v558_v10 = vpop.f32.mrf.mxu1 }
  0xe1   :  { %969 = vst.msk [vmem:[%s1833_s3 + $0x2c] sm:$0xf] %vm957_vm2, %v1166_v63  ;;  %v1164_v7 = vpack.c.bf16 %v646_v0, %v646_v0  ;;  %v651_v8 = vmax.f32 %v439_v1, 0.0  ;;  %v431_v9 = vadd.f32 %v1508_v34, %v430_v6  ;;  %v683_v12 = vmax.f32 %v567_v5, 0.0 }
  0xe2   :  { %1001 = vst.msk [vmem:[%s1833_s3 + $0xac] sm:$0xf] %vm957_vm2, %v1198_v3  ;;  %v1196_v11 = vpack.c.bf16 %v678_v4, %v678_v4  ;;  %v559_v13 = vadd.f32 %v1508_v34, %v558_v10  ;;  %v1269_v14 = vpop.f32.mrf.mxu0  ;;  %v1301_v18 = vpop.f32.mrf.mxu1 }
  0xe3   :  { %967 = vst.msk [vmem:[%s1833_s3 + $0x24] sm:$0xf] %vm957_vm2, %v1164_v7  ;;  %v1169_v15 = vpack.c.bf16 %v651_v8, %v651_v8  ;;  %v649_v16 = vmax.f32 %v431_v9, 0.0  ;;  %v442_v17 = vadd.f32 %v1269_v14, %v1508_v34  ;;  %v1201_v19 = vpack.c.bf16 %v683_v12, %v683_v12 }
  0xe4   :  { %999 = vst.msk [vmem:[%s1833_s3 + $0xa4] sm:$0xf] %vm957_vm2, %v1196_v11  ;;  %v681_v20 = vmax.f32 %v559_v13, 0.0  ;;  %v570_v21 = vadd.f32 %v1301_v18, %v1508_v34  ;;  %v433_v22 = vpop.f32.mrf.mxu0  ;;  %v561_v26 = vpop.f32.mrf.mxu1 }
  0xe5   :  { %972 = vst.msk [vmem:[%s1833_s3 + $0x38] sm:$0xf] %vm957_vm2, %v1169_v15  ;;  %v1167_v23 = vpack.c.bf16 %v649_v16, %v649_v16  ;;  %v652_v24 = vmax.f32 %v442_v17, 0.0  ;;  %v434_v25 = vadd.f32 %v1508_v34, %v433_v22  ;;  %1004 = vst.msk [vmem:[%s1833_s3 + $0xb8] sm:$0xf] %vm957_vm2, %v1201_v19  ;;  %v562_v29 = vadd.f32 %v1508_v34, %v561_v26 }
  0xe6   :  { %v1199_v27 = vpack.c.bf16 %v681_v20, %v681_v20  ;;  %v684_v28 = vmax.f32 %v570_v21, 0.0  ;;  %v1272_v30 = vpop.f32.mrf.mxu0  ;;  %v1304_v35 = vpop.f32.mrf.mxu1 }
  0xe7   :  { %970 = vst.msk [vmem:[%s1833_s3 + $0x30] sm:$0xf] %vm957_vm2, %v1167_v23  ;;  %v1170_v31 = vpack.c.bf16 %v652_v24, %v652_v24  ;;  %v650_v32 = vmax.f32 %v434_v25, 0.0  ;;  %v455_v33 = vadd.f32 %v1272_v30, %v1508_v34  ;;  %v682_v37 = vmax.f32 %v562_v29, 0.0 }
  0xe8   :  { %1002 = vst.msk [vmem:[%s1833_s3 + $0xb0] sm:$0xf] %vm957_vm2, %v1199_v27  ;;  %v1202_v36 = vpack.c.bf16 %v684_v28, %v684_v28  ;;  %v583_v38 = vadd.f32 %v1304_v35, %v1508_v34  ;;  %v446_v39 = vpop.f32.mrf.mxu0  ;;  %v574_v43 = vpop.f32.mrf.mxu1 }
  0xe9   :  { %973 = vst.msk [vmem:[%s1833_s3 + $0x3c] sm:$0xf] %vm957_vm2, %v1170_v31  ;;  %v1168_v40 = vpack.c.bf16 %v650_v32, %v650_v32  ;;  %v655_v41 = vmax.f32 %v455_v33, 0.0  ;;  %v447_v42 = vadd.f32 %v1508_v34, %v446_v39  ;;  %v1200_v44 = vpack.c.bf16 %v682_v37, %v682_v37 }
  0xea   :  { %1005 = vst.msk [vmem:[%s1833_s3 + $0xbc] sm:$0xf] %vm957_vm2, %v1202_v36  ;;  %v687_v45 = vmax.f32 %v583_v38, 0.0  ;;  %v575_v46 = vadd.f32 %v1508_v34, %v574_v43  ;;  %v1273_v47 = vpop.f32.mrf.mxu0  ;;  %v1305_v51 = vpop.f32.mrf.mxu1 }
  0xeb   :  { %971 = vst.msk [vmem:[%s1833_s3 + $0x34] sm:$0xf] %vm957_vm2, %v1168_v40  ;;  %v1173_v48 = vpack.c.bf16 %v655_v41, %v655_v41  ;;  %v653_v49 = vmax.f32 %v447_v42, 0.0  ;;  %v458_v50 = vadd.f32 %v1273_v47, %v1508_v34  ;;  %1003 = vst.msk [vmem:[%s1833_s3 + $0xb4] sm:$0xf] %vm957_vm2, %v1200_v44  ;;  %v586_v54 = vadd.f32 %v1305_v51, %v1508_v34 }
  0xec   :  { %v1205_v52 = vpack.c.bf16 %v687_v45, %v687_v45  ;;  %v685_v53 = vmax.f32 %v575_v46, 0.0  ;;  %v449_v55 = vpop.f32.mrf.mxu0  ;;  %v577_v59 = vpop.f32.mrf.mxu1 }
  0xed   :  { %976 = vst.msk [vmem:[%s1833_s3 + $0x48] sm:$0xf] %vm957_vm2, %v1173_v48  ;;  %v1171_v56 = vpack.c.bf16 %v653_v49, %v653_v49  ;;  %v656_v57 = vmax.f32 %v458_v50, 0.0  ;;  %v450_v58 = vadd.f32 %v1508_v34, %v449_v55  ;;  %v688_v61 = vmax.f32 %v586_v54, 0.0 }
  0xee   :  { %1008 = vst.msk [vmem:[%s1833_s3 + $0xc8] sm:$0xf] %vm957_vm2, %v1205_v52  ;;  %v1203_v60 = vpack.c.bf16 %v685_v53, %v685_v53  ;;  %v578_v62 = vadd.f32 %v1508_v34, %v577_v59  ;;  %v1276_v63 = vpop.f32.mrf.mxu0  ;;  %v1308_v3 = vpop.f32.mrf.mxu1 }
  0xef   :  { %974 = vst.msk [vmem:[%s1833_s3 + $0x40] sm:$0xf] %vm957_vm2, %v1171_v56  ;;  %v1174_v0 = vpack.c.bf16 %v656_v57, %v656_v57  ;;  %v654_v1 = vmax.f32 %v450_v58, 0.0  ;;  %v471_v2 = vadd.f32 %v1276_v63, %v1508_v34  ;;  %v1206_v4 = vpack.c.bf16 %v688_v61, %v688_v61 }
  0xf0   :  { %1006 = vst.msk [vmem:[%s1833_s3 + $0xc0] sm:$0xf] %vm957_vm2, %v1203_v60  ;;  %v686_v5 = vmax.f32 %v578_v62, 0.0  ;;  %v599_v6 = vadd.f32 %v1308_v3, %v1508_v34  ;;  %v462_v7 = vpop.f32.mrf.mxu0  ;;  %v590_v11 = vpop.f32.mrf.mxu1 }
  0xf1   :  { %977 = vst.msk [vmem:[%s1833_s3 + $0x4c] sm:$0xf] %vm957_vm2, %v1174_v0  ;;  %v1172_v8 = vpack.c.bf16 %v654_v1, %v654_v1  ;;  %v659_v9 = vmax.f32 %v471_v2, 0.0  ;;  %v463_v10 = vadd.f32 %v1508_v34, %v462_v7  ;;  %1009 = vst.msk [vmem:[%s1833_s3 + $0xcc] sm:$0xf] %vm957_vm2, %v1206_v4  ;;  %v591_v14 = vadd.f32 %v1508_v34, %v590_v11 }
  0xf2   :  { %v1204_v12 = vpack.c.bf16 %v686_v5, %v686_v5  ;;  %v691_v13 = vmax.f32 %v599_v6, 0.0  ;;  %v1277_v15 = vpop.f32.mrf.mxu0  ;;  %v1309_v19 = vpop.f32.mrf.mxu1 }
  0xf3   :  { %975 = vst.msk [vmem:[%s1833_s3 + $0x44] sm:$0xf] %vm957_vm2, %v1172_v8  ;;  %v1177_v16 = vpack.c.bf16 %v659_v9, %v659_v9  ;;  %v657_v17 = vmax.f32 %v463_v10, 0.0  ;;  %v474_v18 = vadd.f32 %v1277_v15, %v1508_v34  ;;  %v689_v21 = vmax.f32 %v591_v14, 0.0 }
  0xf4   :  { %1007 = vst.msk [vmem:[%s1833_s3 + $0xc4] sm:$0xf] %vm957_vm2, %v1204_v12  ;;  %v1209_v20 = vpack.c.bf16 %v691_v13, %v691_v13  ;;  %v602_v22 = vadd.f32 %v1309_v19, %v1508_v34  ;;  %v465_v23 = vpop.f32.mrf.mxu0  ;;  %v593_v27 = vpop.f32.mrf.mxu1 }
  0xf5   :  { %980 = vst.msk [vmem:[%s1833_s3 + $0x58] sm:$0xf] %vm957_vm2, %v1177_v16  ;;  %v1175_v24 = vpack.c.bf16 %v657_v17, %v657_v17  ;;  %v660_v25 = vmax.f32 %v474_v18, 0.0  ;;  %v466_v26 = vadd.f32 %v1508_v34, %v465_v23  ;;  %v1207_v28 = vpack.c.bf16 %v689_v21, %v689_v21 }
  0xf6   :  { %1012 = vst.msk [vmem:[%s1833_s3 + $0xd8] sm:$0xf] %vm957_vm2, %v1209_v20  ;;  %v692_v29 = vmax.f32 %v602_v22, 0.0  ;;  %v594_v30 = vadd.f32 %v1508_v34, %v593_v27  ;;  %v1280_v31 = vpop.f32.mrf.mxu0  ;;  %v1312_v36 = vpop.f32.mrf.mxu1 }
  0xf7   :  { %978 = vst.msk [vmem:[%s1833_s3 + $0x50] sm:$0xf] %vm957_vm2, %v1175_v24  ;;  %v1178_v32 = vpack.c.bf16 %v660_v25, %v660_v25  ;;  %v658_v33 = vmax.f32 %v466_v26, 0.0  ;;  %v487_v35 = vadd.f32 %v1280_v31, %v1508_v34  ;;  %1010 = vst.msk [vmem:[%s1833_s3 + $0xd0] sm:$0xf] %vm957_vm2, %v1207_v28  ;;  %v615_v39 = vadd.f32 %v1312_v36, %v1508_v34 }
  0xf8   :  { %v1210_v37 = vpack.c.bf16 %v692_v29, %v692_v29  ;;  %v690_v38 = vmax.f32 %v594_v30, 0.0  ;;  %v478_v40 = vpop.f32.mrf.mxu0  ;;  %v606_v44 = vpop.f32.mrf.mxu1 }
  0xf9   :  { %981 = vst.msk [vmem:[%s1833_s3 + $0x5c] sm:$0xf] %vm957_vm2, %v1178_v32  ;;  %v1176_v41 = vpack.c.bf16 %v658_v33, %v658_v33  ;;  %v663_v42 = vmax.f32 %v487_v35, 0.0  ;;  %v479_v43 = vadd.f32 %v1508_v34, %v478_v40  ;;  %v695_v46 = vmax.f32 %v615_v39, 0.0 }
  0xfa   :  { %1013 = vst.msk [vmem:[%s1833_s3 + $0xdc] sm:$0xf] %vm957_vm2, %v1210_v37  ;;  %v1208_v45 = vpack.c.bf16 %v690_v38, %v690_v38  ;;  %v607_v47 = vadd.f32 %v1508_v34, %v606_v44  ;;  %v1281_v48 = vpop.f32.mrf.mxu0  ;;  %v1313_v52 = vpop.f32.mrf.mxu1 }
  0xfb   :  { %979 = vst.msk [vmem:[%s1833_s3 + $0x54] sm:$0xf] %vm957_vm2, %v1176_v41  ;;  %v1181_v49 = vpack.c.bf16 %v663_v42, %v663_v42  ;;  %v661_v50 = vmax.f32 %v479_v43, 0.0  ;;  %v490_v51 = vadd.f32 %v1281_v48, %v1508_v34  ;;  %v1213_v53 = vpack.c.bf16 %v695_v46, %v695_v46 }
  0xfc   :  { %1011 = vst.msk [vmem:[%s1833_s3 + $0xd4] sm:$0xf] %vm957_vm2, %v1208_v45  ;;  %v693_v54 = vmax.f32 %v607_v47, 0.0  ;;  %v618_v55 = vadd.f32 %v1313_v52, %v1508_v34  ;;  %v481_v56 = vpop.f32.mrf.mxu0  ;;  %v609_v60 = vpop.f32.mrf.mxu1 }
  0xfd   :  { %984 = vst.msk [vmem:[%s1833_s3 + $0x68] sm:$0xf] %vm957_vm2, %v1181_v49  ;;  %v1179_v57 = vpack.c.bf16 %v661_v50, %v661_v50  ;;  %v664_v58 = vmax.f32 %v490_v51, 0.0  ;;  %v482_v59 = vadd.f32 %v1508_v34, %v481_v56  ;;  %1016 = vst.msk [vmem:[%s1833_s3 + $0xe8] sm:$0xf] %vm957_vm2, %v1213_v53  ;;  %v610_v63 = vadd.f32 %v1508_v34, %v609_v60 }
  0xfe   :  { %v1211_v61 = vpack.c.bf16 %v693_v54, %v693_v54  ;;  %v696_v62 = vmax.f32 %v618_v55, 0.0  ;;  %v1284_v0 = vpop.f32.mrf.mxu0  ;;  %v1316_v4 = vpop.f32.mrf.mxu1 }
  0xff   :  { %982 = vst.msk [vmem:[%s1833_s3 + $0x60] sm:$0xf] %vm957_vm2, %v1179_v57  ;;  %v1182_v1 = vpack.c.bf16 %v664_v58, %v664_v58  ;;  %v662_v2 = vmax.f32 %v482_v59, 0.0  ;;  %v503_v3 = vadd.f32 %v1284_v0, %v1508_v34  ;;  %v694_v6 = vmax.f32 %v610_v63, 0.0 }
 0x100   :  { %1014 = vst.msk [vmem:[%s1833_s3 + $0xe0] sm:$0xf] %vm957_vm2, %v1211_v61  ;;  %v1214_v5 = vpack.c.bf16 %v696_v62, %v696_v62  ;;  %v631_v7 = vadd.f32 %v1316_v4, %v1508_v34  ;;  %v494_v8 = vpop.f32.mrf.mxu0  ;;  %v622_v12 = vpop.f32.mrf.mxu1 }
 0x101   :  { %985 = vst.msk [vmem:[%s1833_s3 + $0x6c] sm:$0xf] %vm957_vm2, %v1182_v1  ;;  %v1180_v9 = vpack.c.bf16 %v662_v2, %v662_v2  ;;  %v667_v10 = vmax.f32 %v503_v3, 0.0  ;;  %v495_v11 = vadd.f32 %v1508_v34, %v494_v8  ;;  %v1212_v13 = vpack.c.bf16 %v694_v6, %v694_v6 }
 0x102   :  { %1017 = vst.msk [vmem:[%s1833_s3 + $0xec] sm:$0xf] %vm957_vm2, %v1214_v5  ;;  %v699_v14 = vmax.f32 %v631_v7, 0.0  ;;  %v623_v15 = vadd.f32 %v1508_v34, %v622_v12  ;;  %v1285_v16 = vpop.f32.mrf.mxu0  ;;  %v1317_v20 = vpop.f32.mrf.mxu1 }
 0x103   :  { %983 = vst.msk [vmem:[%s1833_s3 + $0x64] sm:$0xf] %vm957_vm2, %v1180_v9  ;;  %v1185_v17 = vpack.c.bf16 %v667_v10, %v667_v10  ;;  %v665_v18 = vmax.f32 %v495_v11, 0.0  ;;  %v506_v19 = vadd.f32 %v1285_v16, %v1508_v34  ;;  %1015 = vst.msk [vmem:[%s1833_s3 + $0xe4] sm:$0xf] %vm957_vm2, %v1212_v13  ;;  %v634_v23 = vadd.f32 %v1317_v20, %v1508_v34 }
 0x104   :  { %v1217_v21 = vpack.c.bf16 %v699_v14, %v699_v14  ;;  %v697_v22 = vmax.f32 %v623_v15, 0.0  ;;  %v497_v24 = vpop.f32.mrf.mxu0  ;;  %v625_v28 = vpop.f32.mrf.mxu1 }
 0x105   :  { %988 = vst.msk [vmem:[%s1833_s3 + $0x78] sm:$0xf] %vm957_vm2, %v1185_v17  ;;  %v1183_v25 = vpack.c.bf16 %v665_v18, %v665_v18  ;;  %v668_v26 = vmax.f32 %v506_v19, 0.0  ;;  %v498_v27 = vadd.f32 %v1508_v34, %v497_v24  ;;  %v700_v30 = vmax.f32 %v634_v23, 0.0 }
 0x106   :  { %1020 = vst.msk [vmem:[%s1833_s3 + $0xf8] sm:$0xf] %vm957_vm2, %v1217_v21  ;;  %v1215_v29 = vpack.c.bf16 %v697_v22, %v697_v22  ;;  %v626_v31 = vadd.f32 %v1508_v34, %v625_v28 }
 0x107   :  { %986 = vst.msk [vmem:[%s1833_s3 + $0x70] sm:$0xf] %vm957_vm2, %v1183_v25  ;;  %v1186_v32 = vpack.c.bf16 %v668_v26, %v668_v26  ;;  %v666_v33 = vmax.f32 %v498_v27, 0.0  ;;  %v1218_v35 = vpack.c.bf16 %v700_v30, %v700_v30 }
 0x108   :  { %1018 = vst.msk [vmem:[%s1833_s3 + $0xf0] sm:$0xf] %vm957_vm2, %v1215_v29  ;;  %v698_v36 = vmax.f32 %v626_v31, 0.0 }
 0x109   :  { %989 = vst.msk [vmem:[%s1833_s3 + $0x7c] sm:$0xf] %vm957_vm2, %v1186_v32  ;;  %v1184_v34 = vpack.c.bf16 %v666_v33, %v666_v33  ;;  %1021 = vst.msk [vmem:[%s1833_s3 + $0xfc] sm:$0xf] %vm957_vm2, %v1218_v35 }
 0x10a   :  { %v1216_v37 = vpack.c.bf16 %v698_v36, %v698_v36 }
 0x10b   :  { %987 = vst.msk [vmem:[%s1833_s3 + $0x74] sm:$0xf] %vm957_vm2, %v1184_v34 }
 0x10c   :  { %1019 = vst.msk [vmem:[%s1833_s3 + $0xf4] sm:$0xf] %vm957_vm2, %v1216_v37 }

// kernel: bottleneck_forward.7
= control target key start
LH: loop header
LB: loop body
LE: loop exit
PB: predicated region body
PF: predicated region fallthrough
CT: control target
= control target key end

     0   :  { %vm347_vm0 = vcmask 1041408   ;;  %vm250_vm1 = vcmask 31744   ;;  %vm896_vm2 = vcmask 130048   ;;  %s2005_s1 = inlined_call_operand.vmem [shape: bf16[4,16], index: 1, kind: input, shape index: {}]   ;;  %s2006_s0 = inlined_call_operand.vmem [shape: bf16[512,4], index: 0, kind: input, shape index: {}]   ;;  %s2007_s3 = inlined_call_operand.vmem [shape: bf16[512,16], index: 3, kind: input, shape index: {}]   ;;  %s2008_s2 = inlined_call_operand.vmem [shape: f32[1,16], index: 2, kind: input, shape index: {}]   ;;  %s2009_s4 = inlined_call_operand.vmem [shape: f32[512,16], index: 4, kind: output, shape index: {}]  }
   0x1   :  { %v82_v0 = vld [vmem:[%s2005_s1] sm:$0x3]  ;;  %v1294_v4 = vld [vmem:[%s2006_s0 + $0x8] sm:$0xff]   ;;  %v1296_v6 = vld [vmem:[%s2006_s0 + $0x10] sm:$0xff]  }
   0x2   :  { %1290 = vmatprep.subr.msk.bf16.mxu0 %vm347_vm0, %v82_v0  ;;  %1291 = vmatprep.subr.msk.bf16.mxu1 %vm347_vm0, %v82_v0  ;;  %v349_v1 = vsel %vm347_vm0, %v82_v0, 0  ;;  %v1292_v2 = vld [vmem:[%s2006_s0] sm:$0xff]   ;;  %v1295_v5 = vld [vmem:[%s2006_s0 + $0x88] sm:$0xff]   ;;  %v1297_v7 = vld [vmem:[%s2006_s0 + $0x90] sm:$0xff]  }
   0x3   :  { %1223 = vmatpush3.bf16.msra.mxu0 %v349_v1  ;;  %1289 = vmatpush3.bf16.msra.mxu1 %v349_v1  ;;  %v1293_v3 = vld [vmem:[%s2006_s0 + $0x80] sm:$0xff]   ;;  %v1298_v8 = vld [vmem:[%s2006_s0 + $0x18] sm:$0xff]   ;;  %v1302_v12 = vld [vmem:[%s2006_s0 + $0x28] sm:$0xff]  }
   0x4   :  { %1224 = vmatprep.mubr.msk.bf16.mxu0 %vm250_vm1, %v1292_v2  ;;  %1256 = vmatprep.mubr.msk.bf16.mxu1 %vm250_vm1, %v1293_v3  ;;  %v1299_v9 = vld [vmem:[%s2006_s0 + $0x98] sm:$0xff]   ;;  %v1300_v10 = vld [vmem:[%s2006_s0 + $0x20] sm:$0xff]   ;;  %v1303_v13 = vld [vmem:[%s2006_s0 + $0xa8] sm:$0xff]  }
   0x5   :  { %v1301_v11 = vld [vmem:[%s2006_s0 + $0xa0] sm:$0xff]   ;;  %v1304_v14 = vld [vmem:[%s2006_s0 + $0x30] sm:$0xff]   ;;  %v1306_v16 = vld [vmem:[%s2006_s0 + $0x38] sm:$0xff]  }
   0x6   :  { %1225 = vmatmul.mubr.msk.bf16.vlgmr.msra.gmra.mxu0 %vm250_vm1, %v1294_v4  ;;  %1257 = vmatmul.mubr.msk.bf16.vlgmr.msra.gmra.mxu1 %vm250_vm1, %v1295_v5  ;;  %v1305_v15 = vld [vmem:[%s2006_s0 + $0xb0] sm:$0xff]   ;;  %v1307_v17 = vld [vmem:[%s2006_s0 + $0xb8] sm:$0xff]   ;;  %v1308_v18 = vld [vmem:[%s2006_s0 + $0x40] sm:$0xff]  }
   0x7   :  { %1228 = vmatprep.mubr.msk.bf16.mxu0 %vm250_vm1, %v1296_v6  ;;  %1260 = vmatprep.mubr.msk.bf16.mxu1 %vm250_vm1, %v1297_v7  ;;  %v1309_v19 = vld [vmem:[%s2006_s0 + $0xc0] sm:$0xff]   ;;  %v1310_v20 = vld [vmem:[%s2006_s0 + $0x48] sm:$0xff]   ;;  %v1312_v22 = vld [vmem:[%s2006_s0 + $0x50] sm:$0xff]  }
   0x8   :  { %v1311_v21 = vld [vmem:[%s2006_s0 + $0xc8] sm:$0xff]   ;;  %v1313_v23 = vld [vmem:[%s2006_s0 + $0xd0] sm:$0xff]   ;;  %v1314_v24 = vld [vmem:[%s2006_s0 + $0x58] sm:$0xff]  }
   0x9   :  { %v1315_v25 = vld [vmem:[%s2006_s0 + $0xd8] sm:$0xff]   ;;  %v1316_v26 = vld [vmem:[%s2006_s0 + $0x60] sm:$0xff]   ;;  %v1318_v28 = vld [vmem:[%s2006_s0 + $0x68] sm:$0xff]  }
   0xa   :  { %v1317_v27 = vld [vmem:[%s2006_s0 + $0xe0] sm:$0xff]   ;;  %v1319_v29 = vld [vmem:[%s2006_s0 + $0xe8] sm:$0xff]   ;;  %v1320_v30 = vld [vmem:[%s2006_s0 + $0x70] sm:$0xff]  }
   0xb   :  { %v1321_v31 = vld [vmem:[%s2006_s0 + $0xf0] sm:$0xff]   ;;  %v1322_v32 = vld [vmem:[%s2006_s0 + $0x78] sm:$0xff]   ;;  %v1158_v34 = vld [vmem:[%s2007_s3 + $0x8] sm:$0xff]  }
   0xc   :  { %v1323_v33 = vld [vmem:[%s2006_s0 + $0xf8] sm:$0xff]   ;;  %v1174_v35 = vld [vmem:[%s2007_s3 + $0x88] sm:$0xff]   ;;  %v1489_v36 = vld [vmem:[%s2008_s2] ss:$0 sm:$0xff]  ;;  %v1036_v38 = vunpack.c.l.bf16 %v1158_v34  ;;  %v1037_v51 = vunpack.c.h.bf16 %v1158_v34 }
   0xd   :  { %v1031_v37 = vld [vmem:[%s2007_s3] sm:$0xff]   ;;  %v1100_v41 = vunpack.c.l.bf16 %v1174_v35  ;;  %v1101_v55 = vunpack.c.h.bf16 %v1174_v35  ;;  %v1504_v56 = vld [vmem:[%s2007_s3 + $0x18] sm:$0xff]   ;;  %v1516_v4 = vld [vmem:[%s2007_s3 + $0x10] sm:$0xff]  }
   0xe   :  { %1229 = vmatmul.mubr.msk.bf16.gmra.mxu0 %vm250_vm1, %v1298_v8  ;;  %1261 = vmatmul.mubr.msk.bf16.gmra.mxu1 %vm250_vm1, %v1299_v9  ;;  %v1173_v39 = vld [vmem:[%s2007_s3 + $0x80] sm:$0xff]   ;;  %v1032_v44 = vunpack.c.l.bf16 %v1031_v37  ;;  %v1033_v61 = vunpack.c.h.bf16 %v1031_v37  ;;  %v1510_v62 = vld [vmem:[%s2007_s3 + $0x98] sm:$0xff]   ;;  %v1044_v9 = vunpack.c.l.bf16 %v1504_v56  ;;  %v1562_v37 = vld [vmem:[%s2007_s3 + $0x28] sm:$0xff]  }
   0xf   :  { %1232 = vmatprep.mubr.msk.bf16.mxu0 %vm250_vm1, %v1300_v10  ;;  %1264 = vmatprep.mubr.msk.bf16.mxu1 %vm250_vm1, %v1301_v11  ;;  %v1096_v47 = vunpack.c.l.bf16 %v1173_v39  ;;  %v1097_v3 = vunpack.c.h.bf16 %v1173_v39  ;;  %v1527_v10 = vld [vmem:[%s2007_s3 + $0x90] sm:$0xff]   ;;  %v1109_v35 = vunpack.c.h.bf16 %v1510_v62 }
  0x16   :  { %1233 = vmatmul.mubr.msk.bf16.gmra.mxu0 %vm250_vm1, %v1302_v12  ;;  %1265 = vmatmul.mubr.msk.bf16.gmra.mxu1 %vm250_vm1, %v1303_v13 }
  0x17   :  { %1236 = vmatprep.mubr.msk.bf16.mxu0 %vm250_vm1, %v1304_v14  ;;  %1268 = vmatprep.mubr.msk.bf16.mxu1 %vm250_vm1, %v1305_v15  ;;  %v1108_v15 = vunpack.c.l.bf16 %v1510_v62 }
  0x1e   :  { %1237 = vmatmul.mubr.msk.bf16.gmra.mxu0 %vm250_vm1, %v1306_v16  ;;  %1269 = vmatmul.mubr.msk.bf16.gmra.mxu1 %vm250_vm1, %v1307_v17 }
  0x1f   :  { %1240 = vmatprep.mubr.msk.bf16.mxu0 %vm250_vm1, %v1308_v18  ;;  %1272 = vmatprep.mubr.msk.bf16.mxu1 %vm250_vm1, %v1309_v19 }
  0x26   :  { %1241 = vmatmul.mubr.msk.bf16.gmra.mxu0 %vm250_vm1, %v1310_v20  ;;  %1273 = vmatmul.mubr.msk.bf16.gmra.mxu1 %vm250_vm1, %v1311_v21  ;;  %v1040_v20 = vunpack.c.l.bf16 %v1516_v4 }
  0x27   :  { %1244 = vmatprep.mubr.msk.bf16.mxu0 %vm250_vm1, %v1312_v22  ;;  %1276 = vmatprep.mubr.msk.bf16.mxu1 %vm250_vm1, %v1313_v23 }
  0x2e   :  { %1245 = vmatmul.mubr.msk.bf16.gmra.mxu0 %vm250_vm1, %v1314_v24  ;;  %1277 = vmatmul.mubr.msk.bf16.gmra.mxu1 %vm250_vm1, %v1315_v25  ;;  %v1104_v25 = vunpack.c.l.bf16 %v1527_v10 }
  0x2f   :  { %1248 = vmatprep.mubr.msk.bf16.mxu0 %vm250_vm1, %v1316_v26  ;;  %1280 = vmatprep.mubr.msk.bf16.mxu1 %vm250_vm1, %v1317_v27 }
  0x36   :  { %1249 = vmatmul.mubr.msk.bf16.gmra.mxu0 %vm250_vm1, %v1318_v28  ;;  %1281 = vmatmul.mubr.msk.bf16.gmra.mxu1 %vm250_vm1, %v1319_v29 }
  0x37   :  { %1252 = vmatprep.mubr.msk.bf16.mxu0 %vm250_vm1, %v1320_v30  ;;  %1284 = vmatprep.mubr.msk.bf16.mxu1 %vm250_vm1, %v1321_v31  ;;  %v1045_v30 = vunpack.c.h.bf16 %v1504_v56 }
  0x3e   :  { %1253 = vmatmul.mubr.msk.bf16.gmra.mxu0 %vm250_vm1, %v1322_v32  ;;  %1285 = vmatmul.mubr.msk.bf16.gmra.mxu1 %vm250_vm1, %v1323_v33 }
  0xc6   :  { %v1226_v40 = vpop.f32.mrf.mxu0  ;;  %v1258_v43 = vpop.f32.mrf.mxu1 }
  0xc7   :  { %v394_v42 = vadd.f32 %v1226_v40, %v1489_v36  ;;  %v522_v45 = vadd.f32 %v1258_v43, %v1489_v36  ;;  %v1573_v43 = vld [vmem:[%s2007_s3 + $0xa8] sm:$0xff]  }
  0xc8   :  { %v385_v46 = vpop.f32.mrf.mxu0  ;;  %v513_v50 = vpop.f32.mrf.mxu1 }
  0xc9   :  { %v770_v48 = vadd.f32 %v1036_v38, %v394_v42  ;;  %v386_v49 = vadd.f32 %v1489_v36, %v385_v46  ;;  %v802_v52 = vadd.f32 %v1100_v41, %v522_v45  ;;  %v514_v53 = vadd.f32 %v1489_v36, %v513_v50 }
  0xca   :  { %v1227_v54 = vpop.f32.mrf.mxu0  ;;  %v1259_v60 = vpop.f32.mrf.mxu1  ;;  %v1041_v42 = vunpack.c.h.bf16 %v1516_v4 }
  0xcb   :  { %v834_v57 = vmax.f32 %v770_v48, 0.0  ;;  %v768_v58 = vadd.f32 %v1032_v44, %v386_v49  ;;  %v397_v59 = vadd.f32 %v1227_v54, %v1489_v36  ;;  %v866_v63 = vmax.f32 %v802_v52, 0.0  ;;  %v1584_v49 = vld [vmem:[%s2007_s3 + $0x20] sm:$0xff]  }
  0xcc   :  { %v800_v0 = vadd.f32 %v1096_v47, %v514_v53  ;;  %v525_v1 = vadd.f32 %v1259_v60, %v1489_v36  ;;  %v388_v2 = vpop.f32.mrf.mxu0  ;;  %v516_v8 = vpop.f32.mrf.mxu1  ;;  %v1105_v48 = vunpack.c.h.bf16 %v1527_v10  ;;  %v1052_v54 = vunpack.c.l.bf16 %v1562_v37 }
  0xcd   :  { %899 = vst.msk [vmem:[%s2009_s4 + $0x10] sm:$0xff] %vm896_vm2, %v834_v57  ;;  %v832_v5 = vmax.f32 %v768_v58, 0.0  ;;  %v771_v6 = vadd.f32 %v1037_v51, %v397_v59  ;;  %v389_v7 = vadd.f32 %v1489_v36, %v388_v2  ;;  %931 = vst.msk [vmem:[%s2009_s4 + $0x110] sm:$0xff] %vm896_vm2, %v866_v63  ;;  %v517_v13 = vadd.f32 %v1489_v36, %v516_v8 }
  0xce   :  { %v864_v11 = vmax.f32 %v800_v0, 0.0  ;;  %v803_v12 = vadd.f32 %v1101_v55, %v525_v1  ;;  %v1230_v14 = vpop.f32.mrf.mxu0  ;;  %v1262_v19 = vpop.f32.mrf.mxu1  ;;  %v1595_v55 = vld [vmem:[%s2007_s3 + $0xa0] sm:$0xff]   ;;  %v1116_v60 = vunpack.c.l.bf16 %v1573_v43  ;;  %v1048_v1 = vunpack.c.l.bf16 %v1584_v49 }
  0xcf   :  { %897 = vst.msk [vmem:[%s2009_s4] sm:$0xff] %vm896_vm2, %v832_v5  ;;  %v835_v16 = vmax.f32 %v771_v6, 0.0  ;;  %v769_v17 = vadd.f32 %v1033_v61, %v389_v7  ;;  %v410_v18 = vadd.f32 %v1230_v14, %v1489_v36  ;;  %v801_v22 = vadd.f32 %v1097_v3, %v517_v13 }
  0xd0   :  { %929 = vst.msk [vmem:[%s2009_s4 + $0x100] sm:$0xff] %vm896_vm2, %v864_v11  ;;  %v867_v21 = vmax.f32 %v803_v12, 0.0  ;;  %v538_v23 = vadd.f32 %v1262_v19, %v1489_v36  ;;  %v401_v24 = vpop.f32.mrf.mxu0  ;;  %v529_v29 = vpop.f32.mrf.mxu1  ;;  %v1112_v6 = vunpack.c.l.bf16 %v1595_v55  ;;  %v1053_v11 = vunpack.c.h.bf16 %v1562_v37 }
  0xd1   :  { %900 = vst.msk [vmem:[%s2009_s4 + $0x18] sm:$0xff] %vm896_vm2, %v835_v16  ;;  %v833_v26 = vmax.f32 %v769_v17, 0.0  ;;  %v774_v27 = vadd.f32 %v1044_v9, %v410_v18  ;;  %v402_v28 = vadd.f32 %v1489_v36, %v401_v24  ;;  %v865_v31 = vmax.f32 %v801_v22, 0.0  ;;  %v1630_v17 = vld [vmem:[%s2007_s3 + $0x38] sm:$0xff]  }
  0xd2   :  { %932 = vst.msk [vmem:[%s2009_s4 + $0x118] sm:$0xff] %vm896_vm2, %v867_v21  ;;  %v806_v32 = vadd.f32 %v1108_v15, %v538_v23  ;;  %v530_v33 = vadd.f32 %v1489_v36, %v529_v29  ;;  %v1231_v34 = vpop.f32.mrf.mxu0  ;;  %v1263_v41 = vpop.f32.mrf.mxu1  ;;  %v1117_v16 = vunpack.c.h.bf16 %v1573_v43  ;;  %v1049_v22 = vunpack.c.h.bf16 %v1584_v49  ;;  %v1641_v23 = vld [vmem:[%s2007_s3 + $0xb8] sm:$0xff]   ;;  %v1652_v29 = vld [vmem:[%s2007_s3 + $0x30] sm:$0xff]  }
  0xd3   :  { %898 = vst.msk [vmem:[%s2009_s4 + $0x8] sm:$0xff] %vm896_vm2, %v833_v26  ;;  %v838_v38 = vmax.f32 %v774_v27, 0.0  ;;  %v772_v39 = vadd.f32 %v1040_v20, %v402_v28  ;;  %v413_v40 = vadd.f32 %v1231_v34, %v1489_v36  ;;  %930 = vst.msk [vmem:[%s2009_s4 + $0x108] sm:$0xff] %vm896_vm2, %v865_v31  ;;  %v541_v46 = vadd.f32 %v1263_v41, %v1489_v36 }
  0xd4   :  { %v870_v44 = vmax.f32 %v806_v32, 0.0  ;;  %v804_v45 = vadd.f32 %v1104_v25, %v530_v33  ;;  %v404_v47 = vpop.f32.mrf.mxu0  ;;  %v532_v53 = vpop.f32.mrf.mxu1  ;;  %v1113_v28 = vunpack.c.h.bf16 %v1595_v55  ;;  %v1060_v34 = vunpack.c.l.bf16 %v1630_v17 }
  0xd5   :  { %903 = vst.msk [vmem:[%s2009_s4 + $0x30] sm:$0xff] %vm896_vm2, %v838_v38  ;;  %v836_v50 = vmax.f32 %v772_v39, 0.0  ;;  %v775_v51 = vadd.f32 %v1045_v30, %v413_v40  ;;  %v405_v52 = vadd.f32 %v1489_v36, %v404_v47  ;;  %v807_v57 = vadd.f32 %v1109_v35, %v541_v46  ;;  %v1663_v35 = vld [vmem:[%s2007_s3 + $0xb0] sm:$0xff]  }
  0xd6   :  { %935 = vst.msk [vmem:[%s2009_s4 + $0x130] sm:$0xff] %vm896_vm2, %v870_v44  ;;  %v868_v56 = vmax.f32 %v804_v45, 0.0  ;;  %v533_v58 = vadd.f32 %v1489_v36, %v532_v53  ;;  %v1234_v59 = vpop.f32.mrf.mxu0  ;;  %v1266_v0 = vpop.f32.mrf.mxu1  ;;  %v1124_v41 = vunpack.c.l.bf16 %v1641_v23  ;;  %v1056_v46 = vunpack.c.l.bf16 %v1652_v29 }
  0xd7   :  { %901 = vst.msk [vmem:[%s2009_s4 + $0x20] sm:$0xff] %vm896_vm2, %v836_v50  ;;  %v839_v61 = vmax.f32 %v775_v51, 0.0  ;;  %v773_v62 = vadd.f32 %v1041_v42, %v405_v52  ;;  %v426_v63 = vadd.f32 %v1234_v59, %v1489_v36  ;;  %v871_v2 = vmax.f32 %v807_v57, 0.0 }
  0xd8   :  { %933 = vst.msk [vmem:[%s2009_s4 + $0x120] sm:$0xff] %vm896_vm2, %v868_v56  ;;  %v805_v3 = vadd.f32 %v1105_v48, %v533_v58  ;;  %v554_v4 = vadd.f32 %v1266_v0, %v1489_v36  ;;  %v417_v5 = vpop.f32.mrf.mxu0  ;;  %v545_v10 = vpop.f32.mrf.mxu1  ;;  %v1120_v51 = vunpack.c.l.bf16 %v1663_v35  ;;  %v1061_v56 = vunpack.c.h.bf16 %v1630_v17 }
  0xd9   :  { %904 = vst.msk [vmem:[%s2009_s4 + $0x38] sm:$0xff] %vm896_vm2, %v839_v61  ;;  %v837_v7 = vmax.f32 %v773_v62, 0.0  ;;  %v778_v8 = vadd.f32 %v1052_v54, %v426_v63  ;;  %v418_v9 = vadd.f32 %v1489_v36, %v417_v5  ;;  %936 = vst.msk [vmem:[%s2009_s4 + $0x138] sm:$0xff] %vm896_vm2, %v871_v2  ;;  %v546_v14 = vadd.f32 %v1489_v36, %v545_v10  ;;  %v1698_v62 = vld [vmem:[%s2007_s3 + $0x48] sm:$0xff]   ;;  %v1720_v10 = vld [vmem:[%s2007_s3 + $0x40] sm:$0xff]  }
  0xda   :  { %v869_v12 = vmax.f32 %v805_v3, 0.0  ;;  %v810_v13 = vadd.f32 %v1116_v60, %v554_v4  ;;  %v1235_v15 = vpop.f32.mrf.mxu0  ;;  %v1267_v21 = vpop.f32.mrf.mxu1  ;;  %v1125_v61 = vunpack.c.h.bf16 %v1641_v23  ;;  %v1057_v3 = vunpack.c.h.bf16 %v1652_v29  ;;  %v1709_v4 = vld [vmem:[%s2007_s3 + $0xc8] sm:$0xff]  }
  0xdb   :  { %902 = vst.msk [vmem:[%s2009_s4 + $0x28] sm:$0xff] %vm896_vm2, %v837_v7  ;;  %v842_v18 = vmax.f32 %v778_v8, 0.0  ;;  %v776_v19 = vadd.f32 %v1048_v1, %v418_v9  ;;  %v429_v20 = vadd.f32 %v1235_v15, %v1489_v36  ;;  %v808_v25 = vadd.f32 %v1112_v6, %v546_v14 }
  0xdc   :  { %934 = vst.msk [vmem:[%s2009_s4 + $0x128] sm:$0xff] %vm896_vm2, %v869_v12  ;;  %v874_v24 = vmax.f32 %v810_v13, 0.0  ;;  %v557_v26 = vadd.f32 %v1267_v21, %v1489_v36  ;;  %v420_v27 = vpop.f32.mrf.mxu0  ;;  %v548_v33 = vpop.f32.mrf.mxu1  ;;  %v1121_v9 = vunpack.c.h.bf16 %v1663_v35  ;;  %v1068_v15 = vunpack.c.l.bf16 %v1698_v62 }
  0xdd   :  { %907 = vst.msk [vmem:[%s2009_s4 + $0x50] sm:$0xff] %vm896_vm2, %v842_v18  ;;  %v840_v30 = vmax.f32 %v776_v19, 0.0  ;;  %v779_v31 = vadd.f32 %v1053_v11, %v429_v20  ;;  %v421_v32 = vadd.f32 %v1489_v36, %v420_v27  ;;  %v872_v37 = vmax.f32 %v808_v25, 0.0 }
  0xde   :  { %939 = vst.msk [vmem:[%s2009_s4 + $0x150] sm:$0xff] %vm896_vm2, %v874_v24  ;;  %v811_v38 = vadd.f32 %v1117_v16, %v557_v26  ;;  %v549_v39 = vadd.f32 %v1489_v36, %v548_v33  ;;  %v1238_v40 = vpop.f32.mrf.mxu0  ;;  %v1270_v45 = vpop.f32.mrf.mxu1  ;;  %v1731_v16 = vld [vmem:[%s2007_s3 + $0xc0] sm:$0xff]   ;;  %v1132_v21 = vunpack.c.l.bf16 %v1709_v4  ;;  %v1064_v26 = vunpack.c.l.bf16 %v1720_v10 }
  0xdf   :  { %905 = vst.msk [vmem:[%s2009_s4 + $0x40] sm:$0xff] %vm896_vm2, %v840_v30  ;;  %v843_v42 = vmax.f32 %v779_v31, 0.0  ;;  %v777_v43 = vadd.f32 %v1049_v22, %v421_v32  ;;  %v442_v44 = vadd.f32 %v1238_v40, %v1489_v36  ;;  %937 = vst.msk [vmem:[%s2009_s4 + $0x140] sm:$0xff] %vm896_vm2, %v872_v37  ;;  %v570_v49 = vadd.f32 %v1270_v45, %v1489_v36 }
  0xe0   :  { %v875_v47 = vmax.f32 %v811_v38, 0.0  ;;  %v809_v48 = vadd.f32 %v1113_v28, %v549_v39  ;;  %v433_v50 = vpop.f32.mrf.mxu0  ;;  %v561_v55 = vpop.f32.mrf.mxu1  ;;  %v1128_v31 = vunpack.c.l.bf16 %v1731_v16  ;;  %v1069_v37 = vunpack.c.h.bf16 %v1698_v62 }
  0xe1   :  { %908 = vst.msk [vmem:[%s2009_s4 + $0x58] sm:$0xff] %vm896_vm2, %v843_v42  ;;  %v841_v52 = vmax.f32 %v777_v43, 0.0  ;;  %v782_v53 = vadd.f32 %v1060_v34, %v442_v44  ;;  %v434_v54 = vadd.f32 %v1489_v36, %v433_v50  ;;  %v814_v58 = vadd.f32 %v1124_v41, %v570_v49  ;;  %v1766_v43 = vld [vmem:[%s2007_s3 + $0x58] sm:$0xff]  }
  0xe2   :  { %940 = vst.msk [vmem:[%s2009_s4 + $0x158] sm:$0xff] %vm896_vm2, %v875_v47  ;;  %v873_v57 = vmax.f32 %v809_v48, 0.0  ;;  %v562_v59 = vadd.f32 %v1489_v36, %v561_v55  ;;  %v1239_v60 = vpop.f32.mrf.mxu0  ;;  %v1271_v2 = vpop.f32.mrf.mxu1  ;;  %v1133_v42 = vunpack.c.h.bf16 %v1709_v4  ;;  %v1065_v48 = vunpack.c.h.bf16 %v1720_v10  ;;  %v1777_v49 = vld [vmem:[%s2007_s3 + $0xd8] sm:$0xff]   ;;  %v1788_v55 = vld [vmem:[%s2007_s3 + $0x50] sm:$0xff]  }
  0xe3   :  { %906 = vst.msk [vmem:[%s2009_s4 + $0x48] sm:$0xff] %vm896_vm2, %v841_v52  ;;  %v846_v63 = vmax.f32 %v782_v53, 0.0  ;;  %v780_v0 = vadd.f32 %v1056_v46, %v434_v54  ;;  %v445_v1 = vadd.f32 %v1239_v60, %v1489_v36  ;;  %v878_v5 = vmax.f32 %v814_v58, 0.0 }
  0xe4   :  { %938 = vst.msk [vmem:[%s2009_s4 + $0x148] sm:$0xff] %vm896_vm2, %v873_v57  ;;  %v812_v6 = vadd.f32 %v1120_v51, %v562_v59  ;;  %v573_v7 = vadd.f32 %v1271_v2, %v1489_v36  ;;  %v436_v8 = vpop.f32.mrf.mxu0  ;;  %v564_v14 = vpop.f32.mrf.mxu1  ;;  %v1129_v54 = vunpack.c.h.bf16 %v1731_v16  ;;  %v1076_v60 = vunpack.c.l.bf16 %v1766_v43 }
  0xe5   :  { %911 = vst.msk [vmem:[%s2009_s4 + $0x70] sm:$0xff] %vm896_vm2, %v846_v63  ;;  %v844_v11 = vmax.f32 %v780_v0, 0.0  ;;  %v783_v12 = vadd.f32 %v1061_v56, %v445_v1  ;;  %v437_v13 = vadd.f32 %v1489_v36, %v436_v8  ;;  %943 = vst.msk [vmem:[%s2009_s4 + $0x170] sm:$0xff] %vm896_vm2, %v878_v5  ;;  %v565_v19 = vadd.f32 %v1489_v36, %v564_v14 }
  0xe6   :  { %v876_v17 = vmax.f32 %v812_v6, 0.0  ;;  %v815_v18 = vadd.f32 %v1125_v61, %v573_v7  ;;  %v1242_v20 = vpop.f32.mrf.mxu0  ;;  %v1274_v25 = vpop.f32.mrf.mxu1  ;;  %v1799_v61 = vld [vmem:[%s2007_s3 + $0xd0] sm:$0xff]   ;;  %v1140_v2 = vunpack.c.l.bf16 %v1777_v49  ;;  %v1072_v7 = vunpack.c.l.bf16 %v1788_v55 }
  0xe7   :  { %909 = vst.msk [vmem:[%s2009_s4 + $0x60] sm:$0xff] %vm896_vm2, %v844_v11  ;;  %v847_v22 = vmax.f32 %v783_v12, 0.0  ;;  %v781_v23 = vadd.f32 %v1057_v3, %v437_v13  ;;  %v458_v24 = vadd.f32 %v1242_v20, %v1489_v36  ;;  %v813_v28 = vadd.f32 %v1121_v9, %v565_v19 }
  0xe8   :  { %941 = vst.msk [vmem:[%s2009_s4 + $0x160] sm:$0xff] %vm896_vm2, %v876_v17  ;;  %v879_v27 = vmax.f32 %v815_v18, 0.0  ;;  %v586_v29 = vadd.f32 %v1274_v25, %v1489_v36  ;;  %v449_v30 = vpop.f32.mrf.mxu0  ;;  %v577_v35 = vpop.f32.mrf.mxu1  ;;  %v1136_v12 = vunpack.c.l.bf16 %v1799_v61  ;;  %v1077_v17 = vunpack.c.h.bf16 %v1766_v43 }
  0xe9   :  { %912 = vst.msk [vmem:[%s2009_s4 + $0x78] sm:$0xff] %vm896_vm2, %v847_v22  ;;  %v845_v32 = vmax.f32 %v781_v23, 0.0  ;;  %v786_v33 = vadd.f32 %v1068_v15, %v458_v24  ;;  %v450_v34 = vadd.f32 %v1489_v36, %v449_v30  ;;  %v877_v38 = vmax.f32 %v813_v28, 0.0  ;;  %v1834_v23 = vld [vmem:[%s2007_s3 + $0x68] sm:$0xff]  }
  0xea   :  { %944 = vst.msk [vmem:[%s2009_s4 + $0x178] sm:$0xff] %vm896_vm2, %v879_v27  ;;  %v818_v39 = vadd.f32 %v1132_v21, %v586_v29  ;;  %v578_v40 = vadd.f32 %v1489_v36, %v577_v35  ;;  %v1243_v41 = vpop.f32.mrf.mxu0  ;;  %v1275_v47 = vpop.f32.mrf.mxu1  ;;  %v1141_v22 = vunpack.c.h.bf16 %v1777_v49  ;;  %v1073_v28 = vunpack.c.h.bf16 %v1788_v55  ;;  %v1845_v29 = vld [vmem:[%s2007_s3 + $0xe8] sm:$0xff]   ;;  %v1856_v35 = vld [vmem:[%s2007_s3 + $0x60] sm:$0xff]  }
  0xeb   :  { %910 = vst.msk [vmem:[%s2009_s4 + $0x68] sm:$0xff] %vm896_vm2, %v845_v32  ;;  %v850_v44 = vmax.f32 %v786_v33, 0.0  ;;  %v784_v45 = vadd.f32 %v1064_v26, %v450_v34  ;;  %v461_v46 = vadd.f32 %v1243_v41, %v1489_v36  ;;  %942 = vst.msk [vmem:[%s2009_s4 + $0x168] sm:$0xff] %vm896_vm2, %v877_v38  ;;  %v589_v52 = vadd.f32 %v1275_v47, %v1489_v36 }
  0xec   :  { %v882_v50 = vmax.f32 %v818_v39, 0.0  ;;  %v816_v51 = vadd.f32 %v1128_v31, %v578_v40  ;;  %v452_v53 = vpop.f32.mrf.mxu0  ;;  %v580_v59 = vpop.f32.mrf.mxu1  ;;  %v1137_v34 = vunpack.c.h.bf16 %v1799_v61  ;;  %v1084_v41 = vunpack.c.l.bf16 %v1834_v23 }
  0xed   :  { %915 = vst.msk [vmem:[%s2009_s4 + $0x90] sm:$0xff] %vm896_vm2, %v850_v44  ;;  %v848_v56 = vmax.f32 %v784_v45, 0.0  ;;  %v787_v57 = vadd.f32 %v1069_v37, %v461_v46  ;;  %v453_v58 = vadd.f32 %v1489_v36, %v452_v53  ;;  %v819_v63 = vadd.f32 %v1133_v42, %v589_v52  ;;  %v1867_v42 = vld [vmem:[%s2007_s3 + $0xe0] sm:$0xff]  }
  0xee   :  { %947 = vst.msk [vmem:[%s2009_s4 + $0x190] sm:$0xff] %vm896_vm2, %v882_v50  ;;  %v880_v62 = vmax.f32 %v816_v51, 0.0  ;;  %v581_v0 = vadd.f32 %v1489_v36, %v580_v59  ;;  %v1246_v1 = vpop.f32.mrf.mxu0  ;;  %v1278_v6 = vpop.f32.mrf.mxu1  ;;  %v1148_v47 = vunpack.c.l.bf16 %v1845_v29  ;;  %v1080_v52 = vunpack.c.l.bf16 %v1856_v35 }
  0xef   :  { %913 = vst.msk [vmem:[%s2009_s4 + $0x80] sm:$0xff] %vm896_vm2, %v848_v56  ;;  %v851_v3 = vmax.f32 %v787_v57, 0.0  ;;  %v785_v4 = vadd.f32 %v1065_v48, %v453_v58  ;;  %v474_v5 = vadd.f32 %v1246_v1, %v1489_v36  ;;  %v883_v8 = vmax.f32 %v819_v63, 0.0 }
  0xf0   :  { %945 = vst.msk [vmem:[%s2009_s4 + $0x180] sm:$0xff] %vm896_vm2, %v880_v62  ;;  %v817_v9 = vadd.f32 %v1129_v54, %v581_v0  ;;  %v602_v10 = vadd.f32 %v1278_v6, %v1489_v36  ;;  %v465_v11 = vpop.f32.mrf.mxu0  ;;  %v593_v16 = vpop.f32.mrf.mxu1  ;;  %v1144_v57 = vunpack.c.l.bf16 %v1867_v42  ;;  %v1085_v62 = vunpack.c.h.bf16 %v1834_v23 }
  0xf1   :  { %916 = vst.msk [vmem:[%s2009_s4 + $0x98] sm:$0xff] %vm896_vm2, %v851_v3  ;;  %v849_v13 = vmax.f32 %v785_v4, 0.0  ;;  %v790_v14 = vadd.f32 %v1076_v60, %v474_v5  ;;  %v466_v15 = vadd.f32 %v1489_v36, %v465_v11  ;;  %948 = vst.msk [vmem:[%s2009_s4 + $0x198] sm:$0xff] %vm896_vm2, %v883_v8  ;;  %v594_v20 = vadd.f32 %v1489_v36, %v593_v16  ;;  %v1902_v4 = vld [vmem:[%s2007_s3 + $0x78] sm:$0xff]   ;;  %v1171_v16 = vld [vmem:[%s2007_s3 + $0x70] sm:$0xff]  }
  0xf2   :  { %v881_v18 = vmax.f32 %v817_v9, 0.0  ;;  %v822_v19 = vadd.f32 %v1140_v2, %v602_v10  ;;  %v1247_v21 = vpop.f32.mrf.mxu0  ;;  %v1279_v27 = vpop.f32.mrf.mxu1  ;;  %v1149_v3 = vunpack.c.h.bf16 %v1845_v29  ;;  %v1081_v9 = vunpack.c.h.bf16 %v1856_v35  ;;  %v1913_v10 = vld [vmem:[%s2007_s3 + $0xf8] sm:$0xff]  }
  0xf3   :  { %914 = vst.msk [vmem:[%s2009_s4 + $0x88] sm:$0xff] %vm896_vm2, %v849_v13  ;;  %v854_v24 = vmax.f32 %v790_v14, 0.0  ;;  %v788_v25 = vadd.f32 %v1072_v7, %v466_v15  ;;  %v477_v26 = vadd.f32 %v1247_v21, %v1489_v36  ;;  %v820_v31 = vadd.f32 %v1136_v12, %v594_v20 }
  0xf4   :  { %946 = vst.msk [vmem:[%s2009_s4 + $0x188] sm:$0xff] %vm896_vm2, %v881_v18  ;;  %v886_v30 = vmax.f32 %v822_v19, 0.0  ;;  %v605_v32 = vadd.f32 %v1279_v27, %v1489_v36  ;;  %v468_v33 = vpop.f32.mrf.mxu0  ;;  %v596_v40 = vpop.f32.mrf.mxu1  ;;  %v1145_v15 = vunpack.c.h.bf16 %v1867_v42  ;;  %v1092_v21 = vunpack.c.l.bf16 %v1902_v4 }
  0xf5   :  { %919 = vst.msk [vmem:[%s2009_s4 + $0xb0] sm:$0xff] %vm896_vm2, %v854_v24  ;;  %v852_v37 = vmax.f32 %v788_v25, 0.0  ;;  %v791_v38 = vadd.f32 %v1077_v17, %v477_v26  ;;  %v469_v39 = vadd.f32 %v1489_v36, %v468_v33  ;;  %v884_v43 = vmax.f32 %v820_v31, 0.0 }
  0xf6   :  { %951 = vst.msk [vmem:[%s2009_s4 + $0x1b0] sm:$0xff] %vm896_vm2, %v886_v30  ;;  %v823_v44 = vadd.f32 %v1141_v22, %v605_v32  ;;  %v597_v45 = vadd.f32 %v1489_v36, %v596_v40  ;;  %v1250_v46 = vpop.f32.mrf.mxu0  ;;  %v1282_v51 = vpop.f32.mrf.mxu1  ;;  %v1187_v22 = vld [vmem:[%s2007_s3 + $0xf0] sm:$0xff]   ;;  %v1156_v27 = vunpack.c.l.bf16 %v1913_v10  ;;  %v1088_v32 = vunpack.c.l.bf16 %v1171_v16 }
  0xf7   :  { %917 = vst.msk [vmem:[%s2009_s4 + $0xa0] sm:$0xff] %vm896_vm2, %v852_v37  ;;  %v855_v48 = vmax.f32 %v791_v38, 0.0  ;;  %v789_v49 = vadd.f32 %v1073_v28, %v469_v39  ;;  %v490_v50 = vadd.f32 %v1250_v46, %v1489_v36  ;;  %949 = vst.msk [vmem:[%s2009_s4 + $0x1a0] sm:$0xff] %vm896_vm2, %v884_v43  ;;  %v618_v55 = vadd.f32 %v1282_v51, %v1489_v36 }
  0xf8   :  { %v887_v53 = vmax.f32 %v823_v44, 0.0  ;;  %v821_v54 = vadd.f32 %v1137_v34, %v597_v45  ;;  %v481_v56 = vpop.f32.mrf.mxu0  ;;  %v609_v61 = vpop.f32.mrf.mxu1  ;;  %v1152_v38 = vunpack.c.l.bf16 %v1187_v22  ;;  %v1093_v43 = vunpack.c.h.bf16 %v1902_v4 }
  0xf9   :  { %920 = vst.msk [vmem:[%s2009_s4 + $0xb8] sm:$0xff] %vm896_vm2, %v855_v48  ;;  %v853_v58 = vmax.f32 %v789_v49, 0.0  ;;  %v794_v59 = vadd.f32 %v1084_v41, %v490_v50  ;;  %v482_v60 = vadd.f32 %v1489_v36, %v481_v56  ;;  %v826_v0 = vadd.f32 %v1148_v47, %v618_v55 }
  0xfa   :  { %952 = vst.msk [vmem:[%s2009_s4 + $0x1b8] sm:$0xff] %vm896_vm2, %v887_v53  ;;  %v885_v63 = vmax.f32 %v821_v54, 0.0  ;;  %v610_v1 = vadd.f32 %v1489_v36, %v609_v61  ;;  %v1251_v2 = vpop.f32.mrf.mxu0  ;;  %v1283_v8 = vpop.f32.mrf.mxu1  ;;  %v1157_v48 = vunpack.c.h.bf16 %v1913_v10  ;;  %v1089_v53 = vunpack.c.h.bf16 %v1171_v16 }
  0xfb   :  { %918 = vst.msk [vmem:[%s2009_s4 + $0xa8] sm:$0xff] %vm896_vm2, %v853_v58  ;;  %v858_v5 = vmax.f32 %v794_v59, 0.0  ;;  %v792_v6 = vadd.f32 %v1080_v52, %v482_v60  ;;  %v493_v7 = vadd.f32 %v1251_v2, %v1489_v36  ;;  %v890_v11 = vmax.f32 %v826_v0, 0.0 }
  0xfc   :  { %950 = vst.msk [vmem:[%s2009_s4 + $0x1a8] sm:$0xff] %vm896_vm2, %v885_v63  ;;  %v824_v12 = vadd.f32 %v1144_v57, %v610_v1  ;;  %v621_v13 = vadd.f32 %v1283_v8, %v1489_v36  ;;  %v484_v14 = vpop.f32.mrf.mxu0  ;;  %v612_v20 = vpop.f32.mrf.mxu1  ;;  %v1153_v58 = vunpack.c.h.bf16 %v1187_v22 }
  0xfd   :  { %923 = vst.msk [vmem:[%s2009_s4 + $0xd0] sm:$0xff] %vm896_vm2, %v858_v5  ;;  %v856_v17 = vmax.f32 %v792_v6, 0.0  ;;  %v795_v18 = vadd.f32 %v1085_v62, %v493_v7  ;;  %v485_v19 = vadd.f32 %v1489_v36, %v484_v14  ;;  %955 = vst.msk [vmem:[%s2009_s4 + $0x1d0] sm:$0xff] %vm896_vm2, %v890_v11  ;;  %v613_v25 = vadd.f32 %v1489_v36, %v612_v20 }
  0xfe   :  { %v888_v23 = vmax.f32 %v824_v12, 0.0  ;;  %v827_v24 = vadd.f32 %v1149_v3, %v621_v13  ;;  %v1254_v26 = vpop.f32.mrf.mxu0  ;;  %v1286_v31 = vpop.f32.mrf.mxu1 }
  0xff   :  { %921 = vst.msk [vmem:[%s2009_s4 + $0xc0] sm:$0xff] %vm896_vm2, %v856_v17  ;;  %v859_v28 = vmax.f32 %v795_v18, 0.0  ;;  %v793_v29 = vadd.f32 %v1081_v9, %v485_v19  ;;  %v506_v30 = vadd.f32 %v1254_v26, %v1489_v36  ;;  %v825_v34 = vadd.f32 %v1145_v15, %v613_v25 }
 0x100   :  { %953 = vst.msk [vmem:[%s2009_s4 + $0x1c0] sm:$0xff] %vm896_vm2, %v888_v23  ;;  %v891_v33 = vmax.f32 %v827_v24, 0.0  ;;  %v634_v35 = vadd.f32 %v1286_v31, %v1489_v36  ;;  %v497_v37 = vpop.f32.mrf.mxu0  ;;  %v625_v42 = vpop.f32.mrf.mxu1 }
 0x101   :  { %924 = vst.msk [vmem:[%s2009_s4 + $0xd8] sm:$0xff] %vm896_vm2, %v859_v28  ;;  %v857_v39 = vmax.f32 %v793_v29, 0.0  ;;  %v798_v40 = vadd.f32 %v1092_v21, %v506_v30  ;;  %v498_v41 = vadd.f32 %v1489_v36, %v497_v37  ;;  %v889_v44 = vmax.f32 %v825_v34, 0.0 }
 0x102   :  { %956 = vst.msk [vmem:[%s2009_s4 + $0x1d8] sm:$0xff] %vm896_vm2, %v891_v33  ;;  %v830_v45 = vadd.f32 %v1156_v27, %v634_v35  ;;  %v626_v46 = vadd.f32 %v1489_v36, %v625_v42  ;;  %v1255_v47 = vpop.f32.mrf.mxu0  ;;  %v1287_v52 = vpop.f32.mrf.mxu1 }
 0x103   :  { %922 = vst.msk [vmem:[%s2009_s4 + $0xc8] sm:$0xff] %vm896_vm2, %v857_v39  ;;  %v862_v49 = vmax.f32 %v798_v40, 0.0  ;;  %v796_v50 = vadd.f32 %v1088_v32, %v498_v41  ;;  %v509_v51 = vadd.f32 %v1255_v47, %v1489_v36  ;;  %954 = vst.msk [vmem:[%s2009_s4 + $0x1c8] sm:$0xff] %vm896_vm2, %v889_v44  ;;  %v637_v56 = vadd.f32 %v1287_v52, %v1489_v36 }
 0x104   :  { %v894_v54 = vmax.f32 %v830_v45, 0.0  ;;  %v828_v55 = vadd.f32 %v1152_v38, %v626_v46  ;;  %v500_v57 = vpop.f32.mrf.mxu0  ;;  %v628_v62 = vpop.f32.mrf.mxu1 }
 0x105   :  { %927 = vst.msk [vmem:[%s2009_s4 + $0xf0] sm:$0xff] %vm896_vm2, %v862_v49  ;;  %v860_v59 = vmax.f32 %v796_v50, 0.0  ;;  %v799_v60 = vadd.f32 %v1093_v43, %v509_v51  ;;  %v501_v61 = vadd.f32 %v1489_v36, %v500_v57  ;;  %v831_v0 = vadd.f32 %v1157_v48, %v637_v56 }
 0x106   :  { %959 = vst.msk [vmem:[%s2009_s4 + $0x1f0] sm:$0xff] %vm896_vm2, %v894_v54  ;;  %v892_v63 = vmax.f32 %v828_v55, 0.0  ;;  %v629_v1 = vadd.f32 %v1489_v36, %v628_v62 }
 0x107   :  { %925 = vst.msk [vmem:[%s2009_s4 + $0xe0] sm:$0xff] %vm896_vm2, %v860_v59  ;;  %v863_v2 = vmax.f32 %v799_v60, 0.0  ;;  %v797_v3 = vadd.f32 %v1089_v53, %v501_v61  ;;  %v895_v4 = vmax.f32 %v831_v0, 0.0 }
 0x108   :  { %957 = vst.msk [vmem:[%s2009_s4 + $0x1e0] sm:$0xff] %vm896_vm2, %v892_v63  ;;  %v829_v5 = vadd.f32 %v1153_v58, %v629_v1 }
 0x109   :  { %928 = vst.msk [vmem:[%s2009_s4 + $0xf8] sm:$0xff] %vm896_vm2, %v863_v2  ;;  %v861_v36 = vmax.f32 %v797_v3, 0.0  ;;  %960 = vst.msk [vmem:[%s2009_s4 + $0x1f8] sm:$0xff] %vm896_vm2, %v895_v4 }
 0x10a   :  { %v893_v6 = vmax.f32 %v829_v5, 0.0 }
 0x10b   :  { %926 = vst.msk [vmem:[%s2009_s4 + $0xe8] sm:$0xff] %vm896_vm2, %v861_v36 }
 0x10c   :  { %958 = vst.msk [vmem:[%s2009_s4 + $0x1e8] sm:$0xff] %vm896_vm2, %v893_v6 }

// kernel: bottleneck_forward.5
= control target key start
LH: loop header
LB: loop body
LE: loop exit
PB: predicated region body
PF: predicated region fallthrough
CT: control target
= control target key end

     0   :  { %s6007_s12 = smov 0   ;;  %s6009_s13 = smov 0   ;;  %s8891_s0 = inlined_call_operand.vmem [shape: bf16[2,18,18,4], index: 0, kind: input, shape index: {}]   ;;  %s8892_s1 = inlined_call_operand.vmem [shape: bf16[9,4,4], index: 1, kind: input, shape index: {}]   ;;  %s8893_s2 = inlined_call_operand.vmem [shape: f32[1,4], index: 2, kind: input, shape index: {}]   ;;  %s8894_s3 = inlined_call_operand.vmem [shape: bf16[2,16,16,4], index: 3, kind: output, shape index: {}]  }
   0x1   :  { %s6011_s14 = smov 0  }
   0x2 LB: > { %s25_s15 = sadd.s32 1, %s5981_s13  ;;  %p4907_p0 = scmp.ge.s32.totalorder %s5985_s14, 1  ;;  %s5985_s14 = sphi %s6011_s14, %s13_s14   ;;  %s5981_s13 = sphi %s6009_s13, %s9369_s13   ;;  %s5977_s12 = sphi %s6007_s12, %s9368_s12  }
   0x3   : > { %p27_p1 = scmp.ge.s32.totalorder %s25_s15, 2  ;;  %p151_p2 = scmp.lt.s32.totalorder %s5985_s14, 3 }
   0x5   : > { %s9371_s15 = smov (%p27_p1, %s25_s15), 0  ;;  %p152_p3 = pnand %p4907_p0, %p151_p2 }
   0x7   : > { %155 = sbr.rel (%p152_p3) target bundleno = 566 (0x236), region = 32 }
   0xc   : > { %v4911_v0 = vld [vmem:[%s8892_s1 + $0x2] sm:$0x3]  ;;  %vm736_vm0 = vcmask 1041408   ;;  %p180_p4 = scmp.lt.s32.totalorder %s5977_s12, 1  ;;  %v249_v2 = vld [vmem:[%s8892_s1] sm:$0x3] }
   0xd   : > { %5881 = vmatprep.subr.msk.bf16.mxu1 %vm736_vm0, %v4911_v0  ;;  %5880 = vmatprep.subr.msk.bf16.mxu0 %vm736_vm0, %v4911_v0  ;;  %v738_v1 = vsel %vm736_vm0, %v4911_v0, 0  ;;  %v4976_v3 = vld [vmem:[%s8892_s1 + $0x4] sm:$0x3]  ;;  %vm252_vm1 = vsmask.f32 3328  ;;  %v6048_v4 = vsel %vm736_vm0, %v249_v2, 0 }
   0xe   : > { %5879 = vmatpush3.bf16.msra.mxu1 %v738_v1  ;;  %5573 = vmatpush3.bf16.msra.mxu0 %v738_v1  ;;  %s9373_s12 = smov (!%p180_p4, %s5977_s12), 1  ;;  %vm253_vm2 = vsmask.f32 7440  ;;  %v6051_v5 = vsel %vm736_vm0, %v4976_v3, 0  ;;  %vm687_vm3 = vcmask 31744   ;;  %v8963_v32 = vmov 0 }
   0xf   : > { %5882 = vmatprep.subr.msk.bf16.mxu1 %vm736_vm0, %v249_v2  ;;  %5883 = vmatprep.subr.msk.bf16.mxu0 %vm736_vm0, %v4976_v3  ;;  %s5890_s22 = smul.u32 216, %s9373_s12  ;;  %vm6090_vm4 = vmor %vm252_vm1, %vm253_vm2  ;;  %vm1211_vm5 = vcmask 1042432   ;;  %vm1212_vm6 = vcmask 1046532   ;;  %s5386_s17 = sshll.u32 %s9373_s12, 7  ;;  %vm4773_vm8 = vcmask 27648  }
  0x10   : > { %v8964_v32 = vsel %vm6090_vm4, 4294967295, %v8963_v32  ;;  %vm6375_vm7 = vmor %vm1211_vm5, %vm1212_vm6  ;;  %s8712_s19 = scalar_lea.vmem %s8894_s3, %s5386_s17 }
  0x11   : > { %s6045_s25 = scalar_lea.vmem %s8891_s0, %s5890_s22  ;;  %8965 = vst [vmem:[#allocation2_spill] sm:$0xff] %v8964_v32 }
  0x12   : > { %v6054_v6 = vld [vmem:[%s6045_s25] sm:$0xf]  ;;  %v6057_v7 = vld [vmem:[%s6045_s25 + $0x4] sm:$0xf]  ;;  %v6060_v8 = vld [vmem:[%s6045_s25 + $0x8] sm:$0x1] }
  0x13   : > { %v256_v9 = vshrl.u32 %v6054_v6, 16  ;;  %v259_v10 = vshll.u32 %v6054_v6, 16  ;;  %v265_v11 = vshll.u32 %v6057_v7, 16  ;;  %v269_v12 = vshrl.u32 %v6057_v7, 16  ;;  %v6067_v13 = vld [vmem:[%s6045_s25 + $0x60] sm:$0xf] }
  0x14   : > { %v275_v14 = vshll.u32 %v6060_v8, 16  ;;  %v6072_v16 = vld [vmem:[%s6045_s25 + $0x64] sm:$0xf]  ;;  %v6075_v17 = vld [vmem:[%s6045_s25 + $0x68] sm:$0x1]  ;;  %v448_v23 = vshrl.u32 %v6067_v13, 16 }
  0x15   : > { %v258_v18 = vrot.slane %v256_v9, 4  ;;  %v261_v19 = vrot.slane %v259_v10, 5  ;;  %v267_v20 = vrot.slane %v265_v11, 5  ;;  %v271_v21 = vrot.slane %v269_v12, 4  ;;  %v6083_v30 = vld [vmem:[%s6045_s25 + $0xc] sm:$0xf] }
  0x16   : > { %v277_v22 = vrot.slane %v275_v14, 5  ;;  %v451_v24 = vshll.u32 %v6067_v13, 16  ;;  %v457_v25 = vshll.u32 %v6072_v16, 16  ;;  %v461_v28 = vshrl.u32 %v6072_v16, 16  ;;  %v6086_v31 = vld [vmem:[%s6045_s25 + $0x10] sm:$0xf] }
  0x17   : > { %v262_v26 = vor.u32 %v261_v19, %v258_v18  ;;  %v272_v27 = vor.u32 %v271_v21, %v267_v20  ;;  %v467_v29 = vshll.u32 %v6075_v17, 16  ;;  %v450_v33 = vrot.slane %v448_v23, 4  ;;  %v6097_v42 = vld [vmem:[%s6045_s25 + $0x14] sm:$0x1]  ;;  %v6108_v54 = vld [vmem:[%s6045_s25 + $0x6c] sm:$0xf] }
  0x18   : > { %v453_v34 = vrot.slane %v451_v24, 5  ;;  %v459_v35 = vrot.slane %v457_v25, 5  ;;  %v463_v39 = vrot.slane %v461_v28, 4  ;;  %v280_v43 = vshrl.u32 %v6083_v30, 16  ;;  %8966 = vst [vmem:[#allocation3_spill] sm:$0xff] %v6108_v54 }
  0x19   : > { %v263_v37 = vrot.slane %v262_v26, 4  ;;  %v273_v38 = vrot.slane %v272_v27, 4  ;;  %v469_v40 = vrot.slane %v467_v29, 5  ;;  %v283_v44 = vshll.u32 %v6083_v30, 16  ;;  %v6112_v59 = vld [vmem:[%s6045_s25 + $0x70] sm:$0xf] }
  0x1a   : > { %v454_v41 = vor.u32 %v453_v34, %v450_v33  ;;  %v289_v45 = vshll.u32 %v6086_v31, 16  ;;  %v464_v48 = vor.u32 %v463_v39, %v459_v35  ;;  %v293_v49 = vshrl.u32 %v6086_v31, 16  ;;  %v6120_v0 = vld [vmem:[%s6045_s25 + $0x74] sm:$0x1]  ;;  %v6126_v10 = vld [vmem:[%s6045_s25 + $0x18] sm:$0xf] }
  0x1b   : > { %v268_v46 = vsel %vm6090_vm4, %v263_v37, %v267_v20  ;;  %v278_v47 = vsel %vm6090_vm4, %v273_v38, %v277_v22  ;;  %v282_v52 = vrot.slane %v280_v43, 4  ;;  %v285_v53 = vrot.slane %v283_v44, 5  ;;  %8967 = vst [vmem:[#allocation4_spill] sm:$0xff] %v6120_v0  ;;  %v6133_v23 = vld [vmem:[%s6045_s25 + $0x1c] sm:$0xf] }
  0x1c   : > { %v4912_v50 = vcombine.low %v268_v46, %v278_v47  ;;  %v455_v51 = vrot.slane %v454_v41, 4  ;;  %v465_v55 = vrot.slane %v464_v48, 4  ;;  %v291_v56 = vrot.slane %v289_v45, 5  ;;  %v6139_v27 = vld [vmem:[%s6045_s25 + $0x20] sm:$0x1] }
  0x1d   : > { %v295_v57 = vrot.slane %v293_v49, 4  ;;  %v299_v58 = vshll.u32 %v6097_v42, 16  ;;  %v286_v61 = vor.u32 %v285_v53, %v282_v52  ;;  %v472_v9 = vshrl.u32 %v6108_v54, 16  ;;  %v6146_v37 = vld [vmem:[%s6045_s25 + $0x78] sm:$0xf] }
  0x1e   : > { %5574 = vmatprep.mubr.msk.bf16.mxu0 %vm687_vm3, %v4912_v50  ;;  %v460_v60 = vsel %vm6090_vm4, %v455_v51, %v459_v35  ;;  %v470_v1 = vsel %vm6090_vm4, %v465_v55, %v469_v40  ;;  %v475_v14 = vshll.u32 %v6108_v54, 16  ;;  %v481_v18 = vshll.u32 %v6112_v59, 16  ;;  %8968 = vst [vmem:[#allocation5_spill] sm:$0xff] %v6146_v37  ;;  %v6152_v43 = vld [vmem:[%s8892_s1 + $0x8] sm:$0x3] }
  0x1f   : > { %v296_v2 = vor.u32 %v295_v57, %v291_v56  ;;  %v301_v3 = vrot.slane %v299_v58, 5  ;;  %v4920_v11 = vcombine.low %v460_v60, %v470_v1  ;;  %v287_v12 = vrot.slane %v286_v61, 4  ;;  %v6157_v48 = vld [vmem:[%s6045_s25 + $0x7c] sm:$0xf]  ;;  %v6164_v58 = vld [vmem:[%s6045_s25 + $0x80] sm:$0x1] }
  0x20   : > { %v474_v20 = vrot.slane %v472_v9, 4  ;;  %v485_v21 = vshrl.u32 %v6112_v59, 16  ;;  %v491_v22 = vshll.u32 %v6120_v0, 16  ;;  %v477_v25 = vrot.slane %v475_v14, 5  ;;  %8969 = vst [vmem:[#allocation6_spill] sm:$0xff] %v6157_v48  ;;  %8970 = vst [vmem:[#allocation7_spill] sm:$0xff] %v6164_v58 }
  0x21   : > { %v297_v19 = vrot.slane %v296_v2, 4  ;;  %5590 = vmatprep.mubr.msk.bf16.mxu1 %vm687_vm3, %v4920_v11  ;;  %v292_v24 = vsel %vm6090_vm4, %v287_v12, %v291_v56  ;;  %v483_v26 = vrot.slane %v481_v18, 5  ;;  %v304_v28 = vshrl.u32 %v6126_v10, 16  ;;  %v6178_v14 = vld [vmem:[%s6045_s25 + $0x28] sm:$0xf] }
  0x22   : > { %v487_v33 = vrot.slane %v485_v21, 4  ;;  %v493_v34 = vrot.slane %v491_v22, 5  ;;  %v307_v35 = vshll.u32 %v6126_v10, 16  ;;  %v478_v39 = vor.u32 %v477_v25, %v474_v20  ;;  %v6184_v22 = vld [vmem:[%s8892_s1 + $0x6] sm:$0x3] }
  0x23   : > { %v302_v29 = vsel %vm6090_vm4, %v297_v19, %v301_v3  ;;  %v306_v40 = vrot.slane %v304_v28, 4  ;;  %v313_v41 = vshll.u32 %v6133_v23, 16  ;;  %v317_v46 = vshrl.u32 %v6133_v23, 16  ;;  %v6170_v3 = vld [vmem:[%s6045_s25 + $0x24] sm:$0xf] }
  0x24   : > { %v4913_v38 = vcombine.low %v292_v24, %v302_v29  ;;  %v488_v44 = vor.u32 %v487_v33, %v483_v26  ;;  %v309_v45 = vrot.slane %v307_v35, 5  ;;  %v323_v47 = vshll.u32 %v6139_v27, 16  ;;  %v6189_v28 = vld [vmem:[%s6045_s25 + $0x2c] sm:$0x1] }
  0x25   : > { %v479_v49 = vrot.slane %v478_v39, 4  ;;  %v315_v50 = vrot.slane %v313_v41, 5  ;;  %v496_v51 = vshrl.u32 %v6146_v37, 16  ;;  %v499_v52 = vshll.u32 %v6146_v37, 16  ;;  %v6196_v39 = vld [vmem:[%s6045_s25 + $0x84] sm:$0xf] }
  0x26   : > { %5575 = vmatmul.mubr.msk.bf16.vlgmr.msra.gmra.mxu0 %vm687_vm3, %v4913_v38  ;;  %v489_v53 = vrot.slane %v488_v44, 4  ;;  %v310_v55 = vor.u32 %v309_v45, %v306_v40  ;;  %v319_v56 = vrot.slane %v317_v46, 4  ;;  %v325_v57 = vrot.slane %v323_v47, 5  ;;  %v6203_v46 = vld [vmem:[%s6045_s25 + $0x88] sm:$0xf] }
  0x27   : > { %5641 = vmatpush3.bf16.msra.mxu0 %v6051_v5  ;;  %v484_v60 = vsel %vm6090_vm4, %v479_v49, %v483_v26  ;;  %v498_v61 = vrot.slane %v496_v51, 4  ;;  %v501_v1 = vrot.slane %v499_v52, 5  ;;  %v505_v2 = vshll.u32 %v6157_v48, 16 }
  0x28   : > { %5885 = vmatprep.subr.msk.bf16.mxu0 %vm736_vm0, %v6152_v43  ;;  %v494_v5 = vsel %vm6090_vm4, %v489_v53, %v493_v34  ;;  %v311_v9 = vrot.slane %v310_v55, 4  ;;  %v320_v11 = vor.u32 %v319_v56, %v315_v50  ;;  %v509_v12 = vshrl.u32 %v6157_v48, 16  ;;  %v6211_v55 = vld [vmem:[%s6045_s25 + $0x8c] sm:$0x1]  ;;  %v6342_v48 = vld [vmem:[%s6045_s25 + $0x5c] sm:$0x1] }
  0x29   : > { %v4921_v18 = vcombine.low %v484_v60, %v494_v5  ;;  %v502_v19 = vor.u32 %v501_v1, %v498_v61  ;;  %v507_v20 = vrot.slane %v505_v2, 5  ;;  %v515_v21 = vshll.u32 %v6164_v58, 16  ;;  %v6219_v2 = vld [vmem:[%s6045_s25 + $0x30] sm:$0xf] }
  0x2a   : > { %v316_v24 = vsel %vm6090_vm4, %v311_v9, %v315_v50  ;;  %v321_v25 = vrot.slane %v320_v11, 4  ;;  %v511_v26 = vrot.slane %v509_v12, 4  ;;  %v328_v29 = vshrl.u32 %v6170_v3, 16 }
  0x2b   : > { %5591 = vmatmul.mubr.msk.bf16.vlgmr.msra.gmra.mxu1 %vm687_vm3, %v4921_v18  ;;  %v503_v33 = vrot.slane %v502_v19, 4  ;;  %v517_v34 = vrot.slane %v515_v21, 5  ;;  %v331_v35 = vshll.u32 %v6170_v3, 16  ;;  %v337_v38 = vshll.u32 %v6178_v14, 16  ;;  %v6224_v18 = vld [vmem:[%s6045_s25 + $0x34] sm:$0xf] }
  0x2c   : > { %5607 = vmatpush3.bf16.msra.mxu1 %v6048_v4  ;;  %v326_v40 = vsel %vm6090_vm4, %v321_v25, %v325_v57  ;;  %v512_v41 = vor.u32 %v511_v26, %v507_v20  ;;  %v330_v44 = vrot.slane %v328_v29, 4  ;;  %v341_v45 = vshrl.u32 %v6178_v14, 16 }
  0x2d   : > { %v4914_v47 = vcombine.low %v316_v24, %v326_v40  ;;  %v508_v49 = vsel %vm6090_vm4, %v503_v33, %v507_v20  ;;  %v333_v50 = vrot.slane %v331_v35, 5  ;;  %v339_v51 = vrot.slane %v337_v38, 5  ;;  %5884 = vmatprep.subr.msk.bf16.mxu1 %vm736_vm0, %v6184_v22  ;;  %v6232_v38 = vld [vmem:[%s6045_s25 + $0x38] sm:$0x1] }
  0x2e   : > { %v513_v4 = vrot.slane %v512_v41, 4  ;;  %v343_v52 = vrot.slane %v341_v45, 4  ;;  %v347_v53 = vshll.u32 %v6189_v28, 16  ;;  %v520_v56 = vshrl.u32 %v6196_v39, 16 }
  0x2f   : > { %5578 = vmatprep.mubr.msk.bf16.mxu0 %vm687_vm3, %v4914_v47  ;;  %v334_v57 = vor.u32 %v333_v50, %v330_v44  ;;  %v523_v60 = vshll.u32 %v6196_v39, 16  ;;  %v529_v61 = vshll.u32 %v6203_v46, 16  ;;  %v533_v1 = vshrl.u32 %v6203_v46, 16  ;;  %v6237_v44 = vld [vmem:[%s6045_s25 + $0x90] sm:$0xf] }
  0x30   : > { %v518_v5 = vsel %vm6090_vm4, %v513_v4, %v517_v34  ;;  %v344_v9 = vor.u32 %v343_v52, %v339_v51  ;;  %v349_v11 = vrot.slane %v347_v53, 5  ;;  %v522_v12 = vrot.slane %v520_v56, 4  ;;  %v6242_v4 = vld [vmem:[%s6045_s25 + $0x94] sm:$0xf] }
  0x31   : > { %v4922_v19 = vcombine.low %v508_v49, %v518_v5  ;;  %v335_v20 = vrot.slane %v334_v57, 4  ;;  %v525_v21 = vrot.slane %v523_v60, 5  ;;  %v531_v24 = vrot.slane %v529_v61, 5 }
  0x32   : > { %v345_v25 = vrot.slane %v344_v9, 4  ;;  %v535_v26 = vrot.slane %v533_v1, 4  ;;  %v539_v29 = vshll.u32 %v6211_v55, 16  ;;  %v352_v33 = vshrl.u32 %v6219_v2, 16 }
  0x33   : > { %5594 = vmatprep.mubr.msk.bf16.mxu1 %vm687_vm3, %v4922_v19  ;;  %v340_v34 = vsel %vm6090_vm4, %v335_v20, %v339_v51  ;;  %v526_v35 = vor.u32 %v525_v21, %v522_v12  ;;  %v355_v40 = vshll.u32 %v6219_v2, 16  ;;  %v361_v41 = vshll.u32 %v6224_v18, 16  ;;  %v6256_v20 = vld [vmem:[%s6045_s25 + $0x3c] sm:$0xf] }
  0x34   : > { %v350_v45 = vsel %vm6090_vm4, %v345_v25, %v349_v11  ;;  %v536_v47 = vor.u32 %v535_v26, %v531_v24  ;;  %v541_v49 = vrot.slane %v539_v29, 5  ;;  %v354_v50 = vrot.slane %v352_v33, 4  ;;  %v6251_v11 = vld [vmem:[%s6045_s25 + $0x98] sm:$0x1]  ;;  %v6261_v33 = vld [vmem:[%s6045_s25 + $0x40] sm:$0xf] }
  0x35   : > { %v4915_v51 = vcombine.low %v340_v34, %v350_v45  ;;  %v527_v52 = vrot.slane %v526_v35, 4  ;;  %v357_v53 = vrot.slane %v355_v40, 5  ;;  %v363_v56 = vrot.slane %v361_v41, 5 }
  0x36   : > { %v537_v57 = vrot.slane %v536_v47, 4  ;;  %v365_v60 = vshrl.u32 %v6224_v18, 16  ;;  %v371_v61 = vshll.u32 %v6232_v38, 16  ;;  %v544_v1 = vshrl.u32 %v6237_v44, 16 }
  0x37   : > { %5579 = vmatmul.mubr.msk.bf16.gmra.mxu0 %vm687_vm3, %v4915_v51  ;;  %v532_v5 = vsel %vm6090_vm4, %v527_v52, %v531_v24  ;;  %v358_v9 = vor.u32 %v357_v53, %v354_v50  ;;  %v547_v12 = vshll.u32 %v6237_v44, 16  ;;  %v553_v19 = vshll.u32 %v6242_v4, 16  ;;  %v6270_v52 = vld [vmem:[%s6045_s25 + $0x44] sm:$0x1] }
  0x38   : > { %v542_v21 = vsel %vm6090_vm4, %v537_v57, %v541_v49  ;;  %v367_v25 = vrot.slane %v365_v60, 4  ;;  %v373_v26 = vrot.slane %v371_v61, 5  ;;  %v546_v29 = vrot.slane %v544_v1, 4  ;;  %v6275_v60 = vld [vmem:[%s6045_s25 + $0x9c] sm:$0xf] }
  0x39   : > { %v4923_v24 = vcombine.low %v532_v5, %v542_v21  ;;  %v359_v34 = vrot.slane %v358_v9, 4  ;;  %v549_v35 = vrot.slane %v547_v12, 5  ;;  %v555_v40 = vrot.slane %v553_v19, 5  ;;  %8971 = vst [vmem:[#allocation8_spill] sm:$0xff] %v6275_v60 }
  0x3a   : > { %v368_v41 = vor.u32 %v367_v25, %v363_v56  ;;  %v557_v45 = vshrl.u32 %v6242_v4, 16  ;;  %v563_v47 = vshll.u32 %v6251_v11, 16  ;;  %v376_v50 = vshrl.u32 %v6256_v20, 16 }
  0x3b   : > { %5595 = vmatmul.mubr.msk.bf16.gmra.mxu1 %vm687_vm3, %v4923_v24  ;;  %v364_v49 = vsel %vm6090_vm4, %v359_v34, %v363_v56  ;;  %v550_v51 = vor.u32 %v549_v35, %v546_v29  ;;  %v379_v53 = vshll.u32 %v6256_v20, 16  ;;  %v385_v57 = vshll.u32 %v6261_v33, 16  ;;  %v6282_v34 = vld [vmem:[%s6045_s25 + $0xa0] sm:$0xf] }
  0x3c   : > { %v369_v61 = vrot.slane %v368_v41, 4  ;;  %v559_v1 = vrot.slane %v557_v45, 4  ;;  %v565_v5 = vrot.slane %v563_v47, 5  ;;  %v378_v9 = vrot.slane %v376_v50, 4 }
  0x3d   : > { %v551_v12 = vrot.slane %v550_v51, 4  ;;  %v381_v19 = vrot.slane %v379_v53, 5  ;;  %v387_v21 = vrot.slane %v385_v57, 5  ;;  %v389_v56 = vshrl.u32 %v6261_v33, 16  ;;  %v6288_v51 = vld [vmem:[%s6045_s25 + $0xa4] sm:$0x1] }
  0x3e   : > { %v374_v25 = vsel %vm6090_vm4, %v369_v61, %v373_v26  ;;  %v560_v29 = vor.u32 %v559_v1, %v555_v40  ;;  %v395_v24 = vshll.u32 %v6270_v52, 16  ;;  %v568_v35 = vshrl.u32 %v6275_v60, 16  ;;  %8972 = vst [vmem:[#allocation9_spill] sm:$0xff] %v6288_v51  ;;  %v6291_v53 = vld [vmem:[%s6045_s25 + $0x48] sm:$0xf] }
  0x3f   : > { %v4916_v41 = vcombine.low %v364_v49, %v374_v25  ;;  %v556_v45 = vsel %vm6090_vm4, %v551_v12, %v555_v40  ;;  %v382_v47 = vor.u32 %v381_v19, %v378_v9  ;;  %v391_v50 = vrot.slane %v389_v56, 4  ;;  %v6301_v56 = vld [vmem:[%s6045_s25 + $0x4c] sm:$0xf] }
  0x40   : > { %v561_v57 = vrot.slane %v560_v29, 4  ;;  %v397_v26 = vrot.slane %v395_v24, 5  ;;  %v570_v61 = vrot.slane %v568_v35, 4  ;;  %v571_v1 = vshll.u32 %v6275_v60, 16 }
  0x41   : > { %5582 = vmatprep.mubr.msk.bf16.mxu0 %vm687_vm3, %v4916_v41  ;;  %v383_v36 = vrot.slane %v382_v47, 4  ;;  %v392_v49 = vor.u32 %v391_v50, %v387_v21  ;;  %v577_v25 = vshll.u32 %v6282_v34, 16  ;;  %v581_v40 = vshrl.u32 %v6282_v34, 16  ;;  %v6307_v50 = vld [vmem:[%s6045_s25 + $0x50] sm:$0x1] }
  0x42   : > { %v566_v9 = vsel %vm6090_vm4, %v561_v57, %v565_v5  ;;  %v573_v12 = vrot.slane %v571_v1, 5  ;;  %v587_v19 = vshll.u32 %v6288_v51, 16  ;;  %v400_v29 = vshrl.u32 %v6291_v53, 16  ;;  %v6310_v57 = vld [vmem:[%s6045_s25 + $0xa8] sm:$0xf] }
  0x43   : > { %v4924_v24 = vcombine.low %v556_v45, %v566_v9  ;;  %v388_v35 = vsel %vm6090_vm4, %v383_v36, %v387_v21  ;;  %v393_v41 = vrot.slane %v392_v49, 4  ;;  %v579_v47 = vrot.slane %v577_v25, 5  ;;  %8973 = vst [vmem:[#allocation10_spill] sm:$0xff] %v6310_v57  ;;  %v6320_v9 = vld [vmem:[%s6045_s25 + $0xac] sm:$0xf] }
  0x44   : > { %v574_v63 = vor.u32 %v573_v12, %v570_v61  ;;  %v583_v15 = vrot.slane %v581_v40, 4  ;;  %v589_v62 = vrot.slane %v587_v19, 5  ;;  %v402_v5 = vrot.slane %v400_v29, 4  ;;  %8974 = vst [vmem:[#allocation11_spill] sm:$0xff] %v6320_v9 }
  0x45   : > { %5598 = vmatprep.mubr.msk.bf16.mxu1 %vm687_vm3, %v4924_v24  ;;  %v398_v45 = vsel %vm6090_vm4, %v393_v41, %v397_v26  ;;  %v403_v1 = vshll.u32 %v6291_v53, 16  ;;  %v409_v36 = vshll.u32 %v6301_v56, 16  ;;  %v413_v21 = vshrl.u32 %v6301_v56, 16  ;;  %v6323_v24 = vld [vmem:[%s6045_s25 + $0xb0] sm:$0x1] }
  0x46   : > { %v4917_v49 = vcombine.low %v388_v35, %v398_v45  ;;  %v575_v25 = vrot.slane %v574_v63, 4  ;;  %v584_v61 = vor.u32 %v583_v15, %v579_v47  ;;  %v419_v40 = vshll.u32 %v6307_v50, 16  ;;  %8975 = vst [vmem:[#allocation12_spill] sm:$0xff] %v6323_v24 }
  0x47   : > { %v405_v12 = vrot.slane %v403_v1, 5  ;;  %v411_v19 = vrot.slane %v409_v36, 5  ;;  %v415_v29 = vrot.slane %v413_v21, 4  ;;  %v592_v26 = vshrl.u32 %v6310_v57, 16  ;;  %v6332_v36 = vld [vmem:[%s6045_s25 + $0x54] sm:$0xf] }
  0x48   : > { %5583 = vmatmul.mubr.msk.bf16.gmra.mxu0 %vm687_vm3, %v4917_v49  ;;  %v580_v35 = vsel %vm6090_vm4, %v575_v25, %v579_v47  ;;  %v585_v63 = vrot.slane %v584_v61, 4  ;;  %v421_v15 = vrot.slane %v419_v40, 5  ;;  %v595_v41 = vshll.u32 %v6310_v57, 16  ;;  %v6339_v61 = vld [vmem:[%s6045_s25 + $0x58] sm:$0xf] }
  0x49   : > { %v406_v45 = vor.u32 %v405_v12, %v402_v5  ;;  %v416_v58 = vor.u32 %v415_v29, %v411_v19  ;;  %v594_v37 = vrot.slane %v592_v26, 4  ;;  %v601_v1 = vshll.u32 %v6320_v9, 16 }
  0x4a   : > { %v590_v21 = vsel %vm6090_vm4, %v585_v63, %v589_v62  ;;  %v597_v49 = vrot.slane %v595_v41, 5  ;;  %v605_v47 = vshrl.u32 %v6320_v9, 16  ;;  %v611_v25 = vshll.u32 %v6323_v24, 16  ;;  %v6366_v24 = vld [vmem:[%s6045_s25 + $0xbc] sm:$0x1] }
  0x4b   : > { %v4925_v5 = vcombine.low %v580_v35, %v590_v21  ;;  %v407_v40 = vrot.slane %v406_v45, 4  ;;  %v417_v12 = vrot.slane %v416_v58, 4  ;;  %v603_v29 = vrot.slane %v601_v1, 5  ;;  %v6353_v45 = vld [vmem:[%s6045_s25 + $0xb4] sm:$0xf] }
  0x4c   : > { %v598_v26 = vor.u32 %v597_v49, %v594_v37  ;;  %v607_v0 = vrot.slane %v605_v47, 4  ;;  %v613_v54 = vrot.slane %v611_v25, 5  ;;  %v424_v62 = vshrl.u32 %v6332_v36, 16  ;;  %8976 = vst [vmem:[#allocation13_spill] sm:$0xff] %v6353_v45  ;;  %v6356_v47 = vld [vmem:[%s6045_s25 + $0xb8] sm:$0xf] }
  0x4d   : > { %5599 = vmatmul.mubr.msk.bf16.gmra.mxu1 %vm687_vm3, %v4925_v5  ;;  %v412_v63 = vsel %vm6090_vm4, %v407_v40, %v411_v19  ;;  %v422_v41 = vsel %vm6090_vm4, %v417_v12, %v421_v15  ;;  %v427_v35 = vshll.u32 %v6332_v36, 16  ;;  %v433_v58 = vshll.u32 %v6339_v61, 16 }
  0x4e   : > { %v4918_v37 = vcombine.low %v412_v63, %v422_v41  ;;  %v599_v1 = vrot.slane %v598_v26, 4  ;;  %v608_v21 = vor.u32 %v607_v0, %v603_v29  ;;  %v426_v49 = vrot.slane %v424_v62, 4 }
  0x4f   : > { %v429_v25 = vrot.slane %v427_v35, 5  ;;  %v435_v5 = vrot.slane %v433_v58, 5  ;;  %v437_v19 = vshrl.u32 %v6339_v61, 16  ;;  %v443_v40 = vshll.u32 %v6342_v48, 16 }
  0x50   : > { %5586 = vmatprep.mubr.msk.bf16.mxu0 %vm687_vm3, %v4918_v37  ;;  %v604_v15 = vsel %vm6090_vm4, %v599_v1, %v603_v29  ;;  %v609_v12 = vrot.slane %v608_v21, 4  ;;  %v616_v63 = vshrl.u32 %v6353_v45, 16  ;;  %v619_v26 = vshll.u32 %v6353_v45, 16 }
  0x51   : > { %v430_v0 = vor.u32 %v429_v25, %v426_v49  ;;  %v439_v62 = vrot.slane %v437_v19, 4  ;;  %v445_v41 = vrot.slane %v443_v40, 5  ;;  %v625_v35 = vshll.u32 %v6356_v47, 16 }
  0x52   : > { %v614_v58 = vsel %vm6090_vm4, %v609_v12, %v613_v54  ;;  %v618_v57 = vrot.slane %v616_v63, 4  ;;  %v621_v37 = vrot.slane %v619_v26, 5  ;;  %v629_v9 = vshrl.u32 %v6356_v47, 16 }
  0x53   : > { %v4926_v29 = vcombine.low %v604_v15, %v614_v58  ;;  %v431_v1 = vrot.slane %v430_v0, 4  ;;  %v440_v21 = vor.u32 %v439_v62, %v435_v5  ;;  %v627_v51 = vrot.slane %v625_v35, 5 }
  0x54   : > { %v622_v60 = vor.u32 %v621_v37, %v618_v57  ;;  %v631_v45 = vrot.slane %v629_v9, 4  ;;  %v635_v49 = vshll.u32 %v6366_v24, 16  ;;  %v8977_v25 = vmov 0 }
  0x55   : > { %v8978_v25 = vsel %vm6375_vm7, 4294967295, %v8977_v25  ;;  %v4977_v54 = vrot.slane %v6054_v6, 9  ;;  %5602 = vmatprep.mubr.msk.bf16.mxu1 %vm687_vm3, %v4926_v29  ;;  %v436_v19 = vsel %vm6090_vm4, %v431_v1, %v435_v5  ;;  %v441_v40 = vrot.slane %v440_v21, 4 }
  0x56   : > { %8979 = vst [vmem:[#allocation14_spill] sm:$0xff] %v8978_v25  ;;  %v1216_v15 = vrot.slane %v6057_v7, 5  ;;  %v4945_v57 = vcombine.low %v6083_v30, %v6086_v31  ;;  %v623_v9 = vrot.slane %v622_v60, 4  ;;  %v632_v12 = vor.u32 %v631_v45, %v627_v51 }
  0x57   : > { %v637_v63 = vrot.slane %v635_v49, 5  ;;  %v4978_v26 = vrot.slane %v6083_v30, 9  ;;  %v446_v0 = vsel %vm6090_vm4, %v441_v40, %v445_v41  ;;  %v8980_v5 = vrot.slane %v6086_v31, 5 }
  0x58   : > { %v1217_v62 = vsel %vm6375_vm7, %v4977_v54, %v1216_v15  ;;  %v1218_v35 = vrot.slane %v1216_v15, 4  ;;  %v4919_v37 = vcombine.low %v436_v19, %v446_v0  ;;  %v628_v29 = vsel %vm6090_vm4, %v623_v9, %v627_v51 }
  0x59   : > { %v1225_v58 = vrot.slane %v8980_v5, 4  ;;  %v633_v1 = vrot.slane %v632_v12, 4  ;;  %v8981_v60 = vmov %v8980_v5  ;;  %v8982_v45 = vrot.slane %v6060_v8, 5 }
  0x5a   : > { %v1224_v30 = vsel %vm6375_vm7, %v4978_v26, %v8981_v60  ;;  %v8983_v21 = vrot.slane %v6097_v42, 5  ;;  %v4946_v54 = vcombine.low %v6126_v10, %v6133_v23  ;;  %v4979_v51 = vrot.slane %v6126_v10, 9  ;;  %5587 = vmatmul.mubr.msk.bf16.gmra.mxu0 %vm687_vm3, %v4919_v37 }
  0x5b   : > { %v1220_v41 = vsel %vm6375_vm7, %v1218_v35, %v8982_v45  ;;  %v638_v31 = vsel %vm6090_vm4, %v633_v1, %v637_v63  ;;  %v1230_v40 = vrot.slane %v6133_v23, 5  ;;  %v1233_v42 = vrot.slane %v6139_v27, 5 }
  0x5c   : > { %v1227_v49 = vsel %vm6375_vm7, %v1225_v58, %v8983_v21  ;;  %v4993_v19 = vcombine.low %v1217_v62, %v1220_v41  ;;  %v4927_v15 = vcombine.low %v628_v29, %v638_v31  ;;  %v1237_v10 = vrot.slane %v6178_v14, 5  ;;  %v6459_v31 = vld [vmem:[%s8892_s1 + $0xa] sm:$0x3] }
  0x5d   : > { %v4994_v8 = vcombine.low %v1224_v30, %v1227_v49  ;;  %v1231_v9 = vsel %vm6375_vm7, %v4979_v51, %v1230_v40  ;;  %v1232_v12 = vrot.slane %v1230_v40, 4  ;;  %v4980_v26 = vrot.slane %v6170_v3, 9 }
  0x5e   : > { %5642 = vmatprep.mubr.msk.bf16.mxu0 %vm687_vm3, %v4993_v19  ;;  %5603 = vmatmul.mubr.msk.bf16.gmra.mxu1 %vm687_vm3, %v4927_v15  ;;  %v4981_v63 = vrot.slane %v6219_v2, 9  ;;  %v1244_v0 = vrot.slane %v6224_v18, 5  ;;  %v8984_v23 = vcombine.low %v6054_v6, %v6057_v7  ;;  %v1239_v62 = vrot.slane %v1237_v10, 4 }
  0x5f   : > { %v1234_v27 = vsel %vm6375_vm7, %v1232_v12, %v1233_v42  ;;  %v1240_v35 = vrot.slane %v6189_v28, 5  ;;  %v1247_v5 = vrot.slane %v6232_v38, 5  ;;  %v2479_v29 = vsel %vm736_vm0, %v6152_v43, 0  ;;  %v6444_v38 = vld [vmem:[%s8892_s1 + $0xc] sm:$0x3] }
  0x60   : > { %5608 = vmatprep.mubr.msk.bf16.mxu1 %vm687_vm3, %v8984_v23  ;;  %v4995_v58 = vcombine.low %v1231_v9, %v1234_v27  ;;  %v1246_v37 = vrot.slane %v1244_v0, 4  ;;  %v1251_v1 = vrot.slane %v6261_v33, 5  ;;  %v1801_v6 = vsel %vm736_vm0, %v6184_v22, 0 }
  0x61   : > { %v1238_v7 = vsel %vm6375_vm7, %v4980_v26, %v1237_v10  ;;  %v1245_v60 = vsel %vm6375_vm7, %v4981_v63, %v1244_v0  ;;  %v1258_v28 = vrot.slane %v6301_v56, 5  ;;  %v1241_v43 = vsel %vm6375_vm7, %v1239_v62, %v1240_v35 }
  0x62   : > { %5643 = vmatmul.mubr.msk.bf16.vlgmr.msra.gmra.mxu0 %vm687_vm3, %v4994_v8  ;;  %v1248_v22 = vsel %vm6375_vm7, %v1246_v37, %v1247_v5  ;;  %v4982_v30 = vrot.slane %v6256_v20, 9  ;;  %v1254_v45 = vrot.slane %v6270_v52, 5  ;;  %v1253_v41 = vrot.slane %v1251_v1, 4 }
  0x63   : > { %5709 = vmatpush3.bf16.msra.mxu0 %v2479_v29  ;;  %5646 = vmatprep.mubr.msk.bf16.mxu0 %vm687_vm3, %v4995_v58  ;;  %v4983_v21 = vrot.slane %v6291_v53, 9  ;;  %v1260_v49 = vrot.slane %v1258_v28, 4  ;;  %v1261_v51 = vrot.slane %v6307_v50, 5  ;;  %v4996_v52 = vcombine.low %v1238_v7, %v1241_v43  ;;  %v8985_v29 = vld [vmem:[#allocation8_spill] sm:$0xff] }
  0x64   : > { %5887 = vmatprep.subr.msk.bf16.mxu0 %vm736_vm0, %v6444_v38  ;;  %v4997_v19 = vcombine.low %v1245_v60, %v1248_v22  ;;  %v1252_v8 = vsel %vm6375_vm7, %v4982_v30, %v1251_v1  ;;  %v1255_v50 = vsel %vm6375_vm7, %v1253_v41, %v1254_v45  ;;  %v1265_v42 = vrot.slane %v6339_v61, 5  ;;  %v8986_v30 = vld [vmem:[#allocation9_spill] sm:$0xff]  ;;  %v8987_v41 = vld [vmem:[#allocation11_spill] sm:$0xff] }
  0x65   : > { %v1259_v40 = vsel %vm6375_vm7, %v4983_v21, %v1258_v28  ;;  %v1262_v15 = vsel %vm6375_vm7, %v1260_v49, %v1261_v51  ;;  %v4985_v9 = vrot.slane %v6067_v13, 9  ;;  %v1272_v12 = vrot.slane %v6072_v16, 5  ;;  %v8988_v21 = vld [vmem:[#allocation10_spill] sm:$0xff]  ;;  %v6672_v49 = vld [vmem:[%s6045_s25 + $0x2c] sm:$0x1] }
  0x66   : > { %5609 = vmatmul.mubr.msk.bf16.vlgmr.msra.gmra.mxu1 %vm687_vm3, %v4945_v57  ;;  %v1275_v57 = vrot.slane %v6075_v17, 5  ;;  %v4947_v10 = vcombine.low %v6170_v3, %v6178_v14  ;;  %v4948_v26 = vcombine.low %v6219_v2, %v6224_v18  ;;  %v4949_v63 = vcombine.low %v6256_v20, %v6261_v33 }
  0x67   : > { %5675 = vmatpush3.bf16.msra.mxu1 %v1801_v6  ;;  %5612 = vmatprep.mubr.msk.bf16.mxu1 %vm687_vm3, %v4946_v54  ;;  %v4984_v54 = vrot.slane %v6332_v36, 9  ;;  %v4950_v0 = vcombine.low %v6291_v53, %v6301_v56  ;;  %v4998_v17 = vcombine.low %v1252_v8, %v1255_v50  ;;  %v4999_v23 = vcombine.low %v1259_v40, %v1262_v15  ;;  %v8989_v8 = vld [vmem:[#allocation12_spill] sm:$0xff] }
  0x68   : > { %5886 = vmatprep.subr.msk.bf16.mxu1 %vm736_vm0, %v6459_v31  ;;  %v1268_v27 = vrot.slane %v6342_v48, 5  ;;  %v1267_v3 = vrot.slane %v1265_v42, 4  ;;  %v4988_v14 = vrot.slane %v6196_v39, 9  ;;  %v1293_v2 = vrot.slane %v6203_v46, 5 }
  0x69   : > { %v1296_v18 = vrot.slane %v6211_v55, 5  ;;  %v1266_v20 = vsel %vm6375_vm7, %v4984_v54, %v1265_v42  ;;  %v1273_v33 = vsel %vm6375_vm7, %v4985_v9, %v1272_v12  ;;  %v1274_v53 = vrot.slane %v1272_v12, 4  ;;  %v8990_v54 = vld [vmem:[#allocation13_spill] sm:$0xff] }
  0x6a   : > { %5647 = vmatmul.mubr.msk.bf16.gmra.mxu0 %vm687_vm3, %v4996_v52  ;;  %v6505_v56 = vsel %vm6375_vm7, %v4988_v14, %v1293_v2  ;;  %v1295_v35 = vrot.slane %v1293_v2, 4  ;;  %v4989_v5 = vrot.slane %v6237_v44, 9  ;;  %v1300_v55 = vrot.slane %v6242_v4, 5 }
  0x6b   : > { %5650 = vmatprep.mubr.msk.bf16.mxu0 %vm687_vm3, %v4997_v19  ;;  %v1279_v58 = vrot.slane %v6112_v59, 5  ;;  %v1303_v37 = vrot.slane %v6251_v11, 5  ;;  %v4990_v6 = vrot.slane %v8985_v29, 9  ;;  %v1269_v7 = vsel %vm6375_vm7, %v1267_v3, %v1268_v27  ;;  %v8991_v3 = vld [vmem:[#allocation6_spill] sm:$0xff] }
  0x6c   : > { %v6519_v60 = vsel %vm6375_vm7, %v1295_v35, %v1296_v18  ;;  %v6523_v28 = vsel %vm6375_vm7, %v4989_v5, %v1300_v55  ;;  %v1302_v43 = vrot.slane %v1300_v55, 4  ;;  %v1307_v22 = vrot.slane %v6282_v34, 5  ;;  %v6678_v11 = vld [vmem:[%s6045_s25 + $0x40] sm:$0xf] }
  0x6d   : > { %v1310_v45 = vrot.slane %v8986_v30, 5  ;;  %v4991_v52 = vrot.slane %v8988_v21, 9  ;;  %v1314_v19 = vrot.slane %v8987_v41, 5  ;;  %v1317_v50 = vrot.slane %v8989_v8, 5  ;;  %v8995_v8 = vld [vmem:[#allocation7_spill] sm:$0xff]  ;;  %8999 = vst [vmem:[#allocation10_spill] sm:$0xff] %v6678_v11 }
  0x6e   : > { %5613 = vmatmul.mubr.msk.bf16.gmra.mxu1 %vm687_vm3, %v4947_v10  ;;  %v6533_v51 = vsel %vm6375_vm7, %v1302_v43, %v1303_v37  ;;  %v6543_v15 = vsel %vm6375_vm7, %v4990_v6, %v1307_v22  ;;  %v1309_v42 = vrot.slane %v1307_v22, 4  ;;  %v1276_v27 = vsel %vm6375_vm7, %v1274_v53, %v1275_v57  ;;  %v8993_v43 = vld [vmem:[#allocation4_spill] sm:$0xff] }
  0x6f   : > { %5616 = vmatprep.mubr.msk.bf16.mxu1 %vm687_vm3, %v4948_v26  ;;  %v6550_v12 = vsel %vm6375_vm7, %v4991_v52, %v1314_v19  ;;  %v1316_v10 = vrot.slane %v1314_v19, 4  ;;  %v4992_v26 = vrot.slane %v8990_v54, 9  ;;  %v1286_v14 = vrot.slane %v8991_v3, 5 }
  0x70   : > { %v6559_v2 = vsel %vm6375_vm7, %v1309_v42, %v1310_v45  ;;  %v5000_v5 = vcombine.low %v1266_v20, %v1269_v7  ;;  %v5001_v37 = vcombine.low %v1273_v33, %v1276_v27  ;;  %v1281_v6 = vrot.slane %v1279_v58, 4  ;;  %v8994_v45 = vld [vmem:[#allocation5_spill] sm:$0xff]  ;;  %v6589_v7 = vld [vmem:[%s6045_s25 + $0xc] sm:$0xf]  ;;  %v6595_v42 = vld [vmem:[%s6045_s25 + $0x10] sm:$0xf] }
  0x71   : > { %v6567_v35 = vsel %vm6375_vm7, %v1316_v10, %v1317_v50  ;;  %v1282_v22 = vrot.slane %v8993_v43, 5  ;;  %v4987_v52 = vrot.slane %v8994_v45, 9  ;;  %v1288_v19 = vrot.slane %v1286_v14, 4  ;;  %v6611_v27 = vld [vmem:[%s6045_s25 + $0x14] sm:$0x1] }
  0x72   : > { %5651 = vmatmul.mubr.msk.bf16.gmra.mxu0 %vm687_vm3, %v4998_v17  ;;  %v1321_v17 = vrot.slane %v6356_v47, 5  ;;  %v4951_v33 = vcombine.low %v6332_v36, %v6339_v61  ;;  %v4952_v50 = vcombine.low %v6067_v13, %v6072_v16  ;;  %v1999_v13 = vshrl.u32 %v6589_v7, 16  ;;  %8996 = vst [vmem:[#allocation8_spill] sm:$0xff] %v6611_v27 }
  0x73   : > { %5654 = vmatprep.mubr.msk.bf16.mxu0 %vm687_vm3, %v4999_v23  ;;  %v1324_v23 = vrot.slane %v6366_v24, 5  ;;  %v8992_v24 = vld [vmem:[#allocation3_spill] sm:$0xff]  ;;  %v1287_v36 = vsel %vm6375_vm7, %v4987_v52, %v1286_v14  ;;  %v2002_v16 = vshll.u32 %v6589_v7, 16  ;;  %v2018_v43 = vshll.u32 %v6611_v27, 16 }
  0x74   : > { %v6571_v57 = vsel %vm6375_vm7, %v4992_v26, %v1321_v17  ;;  %v1323_v53 = vrot.slane %v1321_v17, 4  ;;  %v4986_v55 = vrot.slane %v8992_v24, 9  ;;  %v1283_v26 = vsel %vm6375_vm7, %v1281_v6, %v1282_v22  ;;  %v6627_v52 = vld [vmem:[%s6045_s25 + $0x28] sm:$0xf] }
  0x75   : > { %v2012_v17 = vshrl.u32 %v6595_v42, 16  ;;  %v2004_v6 = vrot.slane %v2002_v16, 5  ;;  %v9002_v27 = vcombine.low %v6523_v28, %v6533_v51  ;;  %v9003_v28 = vcombine.low %v6196_v39, %v6203_v46 }
  0x76   : > { %5617 = vmatmul.mubr.msk.bf16.gmra.mxu1 %vm687_vm3, %v4949_v63  ;;  %v6580_v30 = vsel %vm6375_vm7, %v1323_v53, %v1324_v23  ;;  %v1280_v10 = vsel %vm6375_vm7, %v4986_v55, %v1279_v58  ;;  %v6614_v58 = vld [vmem:[%s6045_s25 + $0x18] sm:$0xf]  ;;  %v2008_v23 = vshll.u32 %v6595_v42, 16  ;;  %v6622_v55 = vld [vmem:[%s6045_s25 + $0x24] sm:$0xf] }
  0x77   : > { %5620 = vmatprep.mubr.msk.bf16.mxu1 %vm687_vm3, %v4950_v0  ;;  %v1289_v0 = vrot.slane %v8995_v8, 5  ;;  %v5002_v14 = vcombine.low %v1280_v10, %v1283_v26  ;;  %v2023_v22 = vshrl.u32 %v6614_v58, 16  ;;  %v4954_v8 = vcombine.low %v8994_v45, %v8991_v3 }
  0x78   : > { %v6639_v10 = vrot.slane %v2008_v23, 5  ;;  %v2026_v26 = vshll.u32 %v6614_v58, 16  ;;  %v2047_v3 = vshrl.u32 %v6622_v55, 16  ;;  %v2050_v45 = vshll.u32 %v6622_v55, 16  ;;  %v6657_v23 = vld [vmem:[%s6045_s25 + $0x20] sm:$0x1] }
  0x79   : > { %v1290_v61 = vsel %vm6375_vm7, %v1288_v19, %v1289_v0  ;;  %v4953_v19 = vcombine.low %v8992_v24, %v6112_v59  ;;  %v6645_v24 = vld [vmem:[%s6045_s25 + $0x34] sm:$0xf]  ;;  %8997 = vst [vmem:[#allocation9_spill] sm:$0xff] %v6657_v23  ;;  %v2025_v0 = vrot.slane %v2023_v22, 4  ;;  %v2042_v40 = vshll.u32 %v6657_v23, 16 }
  0x7a   : > { %5655 = vmatmul.mubr.msk.bf16.gmra.mxu0 %vm687_vm3, %v5000_v5  ;;  %v5003_v53 = vcombine.low %v1287_v36, %v1290_v61  ;;  %v6619_v5 = vld [vmem:[%s6045_s25 + $0x1c] sm:$0xf]  ;;  %v2060_v61 = vshrl.u32 %v6627_v52, 16  ;;  %v2084_v20 = vshrl.u32 %v6645_v24, 16  ;;  %v2049_v1 = vrot.slane %v2047_v3, 4 }
  0x7b   : > { %5658 = vmatprep.mubr.msk.bf16.mxu0 %vm687_vm3, %v5001_v37  ;;  %v2001_v37 = vrot.slane %v1999_v13, 4  ;;  %v2036_v36 = vshrl.u32 %v6619_v5, 16  ;;  %v2032_v59 = vshll.u32 %v6619_v5, 16  ;;  %v2056_v13 = vshll.u32 %v6627_v52, 16 }
  0x7c   : > { %v2052_v63 = vrot.slane %v2050_v45, 5  ;;  %v2062_v48 = vrot.slane %v2060_v61, 4  ;;  %v2086_v3 = vrot.slane %v2084_v20, 4  ;;  %v9001_v45 = vcombine.low %v6505_v56, %v6519_v60 }
  0x7d   : > { %v2005_v16 = vor.u32 %v2004_v6, %v2001_v37  ;;  %v2080_v37 = vshll.u32 %v6645_v24, 16  ;;  %v6665_v6 = vld [vmem:[%s6045_s25 + $0x3c] sm:$0xf]  ;;  %v6669_v22 = vrot.slane %v2032_v59, 5  ;;  %v6674_v18 = vrot.slane %v2056_v13, 5 }
  0x7e   : > { %5621 = vmatmul.mubr.msk.bf16.gmra.mxu1 %vm687_vm3, %v4951_v33  ;;  %v2014_v33 = vrot.slane %v2012_v17, 4  ;;  %v6652_v17 = vrot.slane %v2018_v43, 5  ;;  %8998 = vst [vmem:[#allocation11_spill] sm:$0xff] %v6665_v6  ;;  %v2066_v23 = vshll.u32 %v6672_v49, 16  ;;  %v2104_v56 = vshll.u32 %v6678_v11, 16 }
  0x7f   : > { %5624 = vmatprep.mubr.msk.bf16.mxu1 %vm687_vm3, %v4952_v50  ;;  %v6636_v50 = vld [vmem:[%s6045_s25 + $0x30] sm:$0xf]  ;;  %v2006_v62 = vrot.slane %v2005_v16, 4  ;;  %v6685_v25 = vrot.slane %v2080_v37, 5  ;;  %v2063_v20 = vor.u32 %v2062_v48, %v6674_v18  ;;  %v6702_v60 = vsel %vm736_vm0, %v6459_v31, 0 }
  0x80   : > { %v2074_v9 = vshll.u32 %v6636_v50, 16  ;;  %v2015_v43 = vor.u32 %v2014_v33, %v6639_v10  ;;  %v2098_v33 = vshll.u32 %v6665_v6, 16  ;;  %v6714_v31 = vld [vmem:[%s6045_s25 + $0x48] sm:$0xf] }
  0x81   : > { %v2011_v48 = vsel %vm6090_vm4, %v2006_v62, %v6639_v10  ;;  %9004 = vst [vmem:[#allocation13_spill] sm:$0xff] %v6714_v31  ;;  %v6724_v62 = vld [vmem:[%s6045_s25 + $0x4c] sm:$0xf]  ;;  %v2064_v10 = vrot.slane %v2063_v20, 4  ;;  %v6746_v20 = vsel %vm736_vm0, %v6444_v38, 0 }
  0x82   : > { %5659 = vmatmul.mubr.msk.bf16.gmra.mxu0 %vm687_vm3, %v5002_v14  ;;  %v2028_v14 = vrot.slane %v2026_v26, 5  ;;  %v6683_v26 = vld [vmem:[%s6045_s25 + $0x38] sm:$0x1]  ;;  %v2016_v61 = vrot.slane %v2015_v43, 4  ;;  %v2100_v37 = vrot.slane %v2098_v33, 5  ;;  %9006 = vst [vmem:[#allocation6_spill] sm:$0xff] %v6724_v62 }
  0x83   : > { %5662 = vmatprep.mubr.msk.bf16.mxu0 %vm687_vm3, %v5003_v53  ;;  %v2071_v53 = vshrl.u32 %v6636_v50, 16  ;;  %9000 = vst [vmem:[#allocation12_spill] sm:$0xff] %v6683_v26 }
  0x84   : > { %v2029_v13 = vor.u32 %v2028_v14, %v2025_v0  ;;  %v2090_v0 = vshll.u32 %v6683_v26, 16  ;;  %v2021_v39 = vsel %vm6090_vm4, %v2016_v61, %v6652_v17  ;;  %v2128_v61 = vshll.u32 %v6724_v62, 16  ;;  %v7058_v26 = vld [vmem:[%s6045_s25 + $0xc0] sm:$0xf] }
  0x85   : > { %v2073_v59 = vrot.slane %v2071_v53, 4  ;;  %v2108_v53 = vshrl.u32 %v6678_v11, 16 }
  0x86   : > { %5625 = vmatmul.mubr.msk.bf16.gmra.mxu1 %vm687_vm3, %v4953_v19  ;;  %v2038_v19 = vrot.slane %v2036_v36, 4  ;;  %v2076_v36 = vrot.slane %v2074_v9, 5  ;;  %v2053_v9 = vor.u32 %v2052_v63, %v2049_v1  ;;  %v2044_v1 = vrot.slane %v2042_v40, 5 }
  0x87   : > { %5628 = vmatprep.mubr.msk.bf16.mxu1 %vm687_vm3, %v4954_v8  ;;  %v2095_v8 = vshrl.u32 %v6665_v6, 16  ;;  %v2087_v63 = vor.u32 %v2086_v3, %v6685_v25  ;;  %v2030_v46 = vrot.slane %v2029_v13, 4  ;;  %v2110_v33 = vrot.slane %v2108_v53, 4 }
  0x88   : > { %v2039_v16 = vor.u32 %v2038_v19, %v6669_v22  ;;  %v2077_v51 = vor.u32 %v2076_v36, %v2073_v59  ;;  %v2068_v19 = vrot.slane %v2066_v23, 5  ;;  %v2054_v40 = vrot.slane %v2053_v9, 4  ;;  %v6729_v36 = vld [vmem:[%s6045_s25 + $0x44] sm:$0x1] }
  0x89   : > { %v2097_v14 = vrot.slane %v2095_v8, 4  ;;  %v6726_v8 = vrot.slane %v2104_v56, 5  ;;  %v2092_v59 = vrot.slane %v2090_v0, 5  ;;  %9007 = vst [vmem:[#allocation3_spill] sm:$0xff] %v6729_v36  ;;  %v2122_v3 = vshll.u32 %v6714_v31, 16 }
  0x8a   : > { %5663 = vmatmul.mubr.msk.bf16.gmra.mxu0 %vm687_vm3, %v9001_v45  ;;  %v2040_v43 = vrot.slane %v2039_v16, 4  ;;  %v2078_v45 = vrot.slane %v2077_v51, 4  ;;  %v2088_v17 = vrot.slane %v2087_v63, 4  ;;  %v2132_v23 = vshrl.u32 %v6724_v62, 16  ;;  %v6778_v63 = vld [vmem:[%s6045_s25 + $0x54] sm:$0xf] }
  0x8b   : > { %5666 = vmatprep.mubr.msk.bf16.mxu0 %vm687_vm3, %v9002_v27  ;;  %v9005_v27 = vcombine.low %v6237_v44, %v6242_v4  ;;  %v2101_v44 = vor.u32 %v2100_v37, %v2097_v14  ;;  %v2119_v4 = vshrl.u32 %v6714_v31, 16  ;;  %v9008_v13 = vcombine.low %v6543_v15, %v6559_v2  ;;  %9012 = vst [vmem:[#allocation5_spill] sm:$0xff] %v6778_v63 }
  0x8c   : > { %v2035_v16 = vsel %vm6090_vm4, %v2030_v46, %v6669_v22  ;;  %v2045_v9 = vsel %vm6090_vm4, %v2040_v43, %v2044_v1  ;;  %v5076_v53 = vcombine.low %v6622_v55, %v6627_v52  ;;  %v9009_v56 = vcombine.low %v6550_v12, %v6567_v35  ;;  %v6764_v12 = vld [vmem:[%s6045_s25 + $0x50] sm:$0x1]  ;;  %v6793_v46 = vld [vmem:[%s6045_s25 + $0x58] sm:$0xf]  ;;  %v6796_v43 = vld [vmem:[%s6045_s25 + $0x60] sm:$0xf] }
  0x8d   : > { %v2059_v15 = vsel %vm6090_vm4, %v2054_v40, %v6674_v18  ;;  %v2069_v2 = vsel %vm6090_vm4, %v2064_v10, %v2068_v19  ;;  %v2111_v22 = vor.u32 %v2110_v33, %v6726_v8  ;;  %v2114_v38 = vshll.u32 %v6729_v36, 16  ;;  %9010 = vst [vmem:[#allocation4_spill] sm:$0xff] %v6764_v12  ;;  %9014 = vst [vmem:[#allocation7_spill] sm:$0xff] %v6793_v46  ;;  %v6802_v10 = vld [vmem:[%s6045_s25 + $0x64] sm:$0xf] }
  0x8e   : > { %5629 = vmatmul.mubr.msk.bf16.gmra.mxu1 %vm687_vm3, %v9003_v28  ;;  %v5107_v0 = vcombine.low %v2011_v48, %v2021_v39  ;;  %v6761_v14 = vrot.slane %v2101_v44, 4  ;;  %v2121_v35 = vrot.slane %v2119_v4, 4  ;;  %v2124_v37 = vrot.slane %v2122_v3, 5  ;;  %9015 = vst [vmem:[#allocation15_spill] sm:$0xff] %v6796_v43  ;;  %9016 = vst [vmem:[#allocation16_spill] sm:$0xff] %v6802_v10 }
  0x8f   : > { %5632 = vmatprep.mubr.msk.bf16.mxu1 %vm687_vm3, %v9005_v27  ;;  %v9011_v28 = vcombine.low %v8985_v29, %v6282_v34  ;;  %v2083_v18 = vsel %vm6090_vm4, %v2078_v45, %v6685_v25  ;;  %v2093_v48 = vsel %vm6090_vm4, %v2088_v17, %v2092_v59  ;;  %v6775_v1 = vrot.slane %v2128_v61, 5  ;;  %v6812_v3 = vld [vmem:[%s6045_s25 + $0x6c] sm:$0xf]  ;;  %v7024_v36 = vld [vmem:[%s6045_s25 + $0xb8] sm:$0xf] }
  0x90   : > { %v2134_v51 = vrot.slane %v2132_v23, 4  ;;  %v9013_v27 = vcombine.low %v8988_v21, %v8987_v41  ;;  %v6784_v34 = vcombine.low %v2035_v16, %v2045_v9  ;;  %v6786_v29 = vcombine.low %v2059_v15, %v2069_v2 }
  0x91   : > { %v2112_v19 = vrot.slane %v2111_v22, 4  ;;  %v2116_v41 = vrot.slane %v2114_v38, 5  ;;  %v2138_v40 = vshll.u32 %v6764_v12, 16  ;;  %v6804_v33 = vcombine.low %v2083_v18, %v2093_v48 }
  0x92   : > { %5667 = vmatmul.mubr.msk.bf16.gmra.mxu0 %vm687_vm3, %v9008_v13  ;;  %v2107_v59 = vsel %vm6090_vm4, %v6761_v14, %v6726_v8  ;;  %v2125_v44 = vor.u32 %v2124_v37, %v2121_v35  ;;  %v2143_v4 = vshrl.u32 %v6778_v63, 16  ;;  %v2135_v45 = vor.u32 %v2134_v51, %v6775_v1  ;;  %v6819_v13 = vld [vmem:[%s6045_s25 + $0x70] sm:$0xf]  ;;  %v6839_v14 = vld [vmem:[%s6045_s25 + $0x5c] sm:$0x1] }
  0x93   : > { %5670 = vmatprep.mubr.msk.bf16.mxu0 %vm687_vm3, %v9009_v56  ;;  %v2146_v17 = vshll.u32 %v6778_v63, 16  ;;  %v2156_v23 = vshrl.u32 %v6793_v46, 16  ;;  %v2152_v61 = vshll.u32 %v6793_v46, 16  ;;  %v9017_v16 = vcombine.low %v6571_v57, %v6580_v30  ;;  %9018 = vst [vmem:[#allocation17_spill] sm:$0xff] %v6839_v14 }
  0x94   : > { %v2167_v8 = vshrl.u32 %v6796_v43, 16  ;;  %v2170_v9 = vshll.u32 %v6796_v43, 16  ;;  %v2180_v56 = vshrl.u32 %v6802_v10, 16  ;;  %v2176_v15 = vshll.u32 %v6802_v10, 16 }
  0x95   : > { %v2117_v2 = vsel %vm6090_vm4, %v2112_v19, %v2116_v41  ;;  %v6832_v22 = vrot.slane %v2138_v40, 5  ;;  %v2191_v57 = vshrl.u32 %v6812_v3, 16  ;;  %v2194_v30 = vshll.u32 %v6812_v3, 16  ;;  %v6855_v41 = vld [vmem:[%s6045_s25 + $0x7c] sm:$0xf] }
  0x96   : > { %5633 = vmatmul.mubr.msk.bf16.gmra.mxu1 %vm687_vm3, %v9011_v28  ;;  %v6836_v38 = vrot.slane %v2125_v44, 4  ;;  %v2145_v35 = vrot.slane %v2143_v4, 4  ;;  %v2204_v37 = vshrl.u32 %v6819_v13, 16  ;;  %v6844_v28 = vld [vmem:[%s6045_s25 + $0x78] sm:$0xf]  ;;  %v9019_v18 = vcombine.low %v8990_v54, %v6356_v47 }
  0x97   : > { %5636 = vmatprep.mubr.msk.bf16.mxu1 %vm687_vm3, %v9013_v27  ;;  %v6850_v48 = vrot.slane %v2135_v45, 4  ;;  %v2148_v51 = vrot.slane %v2146_v17, 5  ;;  %v6852_v27 = vrot.slane %v2152_v61, 5  ;;  %v2158_v19 = vrot.slane %v2156_v23, 4  ;;  %v6862_v44 = vld [vmem:[%s6045_s25 + $0x68] sm:$0x1] }
  0x98   : > { %v9020_v40 = vcombine.low %v6589_v7, %v6595_v42  ;;  %9021 = vst [vmem:[#allocation18_spill] sm:$0xff] %v6862_v44  ;;  %v2169_v4 = vrot.slane %v2167_v8, 4  ;;  %v2172_v47 = vrot.slane %v2170_v9, 5  ;;  %v6864_v54 = vrot.slane %v2176_v15, 5  ;;  %v6869_v61 = vld [vmem:[%s6045_s25 + $0x74] sm:$0x1] }
  0x99   : > { %v2193_v45 = vrot.slane %v2191_v57, 4  ;;  %v2215_v17 = vshrl.u32 %v6844_v28, 16  ;;  %v2218_v23 = vshll.u32 %v6844_v28, 16  ;;  %9022 = vst [vmem:[#allocation19_spill] sm:$0xff] %v6869_v61  ;;  %v2206_v39 = vrot.slane %v2204_v37, 4 }
  0x9a   : > { %5671 = vmatmul.mubr.msk.bf16.gmra.mxu0 %vm687_vm3, %v9017_v16  ;;  %v2182_v16 = vrot.slane %v2180_v56, 4  ;;  %v2224_v25 = vshll.u32 %v6855_v41, 16  ;;  %v2149_v8 = vor.u32 %v2148_v51, %v2145_v35  ;;  %v2159_v9 = vor.u32 %v2158_v19, %v6852_v27  ;;  %v6881_v57 = vld [vmem:[%s8892_s1 + $0x10] sm:$0x3]  ;;  %v6899_v19 = vld [vmem:[%s6045_s25 + $0x84] sm:$0xf] }
  0x9b   : > { %5710 = vmatprep.mubr.msk.bf16.mxu0 %vm687_vm3, %v5107_v0  ;;  %v2200_v0 = vshll.u32 %v6819_v13, 16  ;;  %v2162_v56 = vshll.u32 %v6839_v14, 16  ;;  %v2186_v15 = vshll.u32 %v6862_v44, 16  ;;  %v2131_v35 = vsel %vm6090_vm4, %v6836_v38, %v6775_v1 }
  0x9c   : > { %v2173_v37 = vor.u32 %v2172_v47, %v2169_v4  ;;  %v2220_v51 = vrot.slane %v2218_v23, 5  ;;  %v6902_v4 = vrot.slane %v2224_v25, 5  ;;  %v6905_v47 = vld [vmem:[%s6045_s25 + $0x88] sm:$0xf]  ;;  %v2239_v23 = vshrl.u32 %v6899_v19, 16 }
  0x9d   : > { %v6871_v21 = vrot.slane %v2200_v0, 5  ;;  %v2183_v0 = vor.u32 %v2182_v16, %v6864_v54  ;;  %v2164_v25 = vrot.slane %v2162_v56, 5  ;;  %v2188_v16 = vrot.slane %v2186_v15, 5 }
  0x9e   : > { %5637 = vmatmul.mubr.msk.bf16.gmra.mxu1 %vm687_vm3, %v9019_v18  ;;  %v2196_v18 = vrot.slane %v2194_v30, 5  ;;  %v5111_v30 = vcombine.low %v2107_v59, %v2117_v2  ;;  %v2210_v59 = vshll.u32 %v6869_v61, 16  ;;  %v2217_v2 = vrot.slane %v2215_v17, 4 }
  0x9f   : > { %5676 = vmatprep.mubr.msk.bf16.mxu1 %vm687_vm3, %v9020_v40  ;;  %v2228_v40 = vshrl.u32 %v6855_v41, 16  ;;  %v2207_v38 = vor.u32 %v2206_v39, %v6871_v21  ;;  %v2160_v39 = vrot.slane %v2159_v9, 4  ;;  %v2184_v17 = vrot.slane %v2183_v0, 4  ;;  %v6959_v0 = vld [vmem:[%s6045_s25 + $0x90] sm:$0xf] }
  0xa0   : > { %v2197_v1 = vor.u32 %v2196_v18, %v2193_v45  ;;  %v6919_v45 = vld [vmem:[%s6045_s25 + $0x80] sm:$0x1]  ;;  %v2174_v18 = vrot.slane %v2173_v37, 4  ;;  %v2252_v9 = vshrl.u32 %v6905_v47, 16  ;;  %v2248_v56 = vshll.u32 %v6905_v47, 16 }
  0xa1   : > { %9024 = vst [vmem:[#allocation20_spill] sm:$0xff] %v6919_v45  ;;  %v2208_v15 = vrot.slane %v2207_v38, 4  ;;  %v2234_v37 = vshll.u32 %v6919_v45, 16  ;;  %v2189_v38 = vsel %vm6090_vm4, %v2184_v17, %v2188_v16  ;;  %v6967_v17 = vld [vmem:[%s6045_s25 + $0x94] sm:$0xf] }
  0xa2   : > { %5711 = vmatmul.mubr.msk.bf16.vlgmr.msra.gmra.mxu0 %vm687_vm3, %v6784_v34  ;;  %v2141_v34 = vsel %vm6090_vm4, %v6850_v48, %v6832_v22  ;;  %v9023_v22 = vcombine.low %v6614_v58, %v6619_v5  ;;  %v2150_v48 = vrot.slane %v2149_v8, 4  ;;  %v2221_v8 = vor.u32 %v2220_v51, %v2217_v2  ;;  %v7018_v45 = vld [vmem:[%s6045_s25 + $0xb4] sm:$0xf] }
  0xa3   : > { %5777 = vmatpush3.bf16.msra.mxu0 %v6746_v20  ;;  %5714 = vmatprep.mubr.msk.bf16.mxu0 %vm687_vm3, %v6786_v29  ;;  %v2230_v20 = vrot.slane %v2228_v40, 4  ;;  %v6910_v29 = vld [vmem:[%s8892_s1 + $0xe] sm:$0x3]  ;;  %v2242_v40 = vshll.u32 %v6899_v19, 16  ;;  %v2165_v2 = vsel %vm6090_vm4, %v2160_v39, %v2164_v25  ;;  %v5112_v39 = vcombine.low %v2131_v35, %v2141_v34 }
  0xa4   : > { %5889 = vmatprep.subr.msk.bf16.mxu0 %vm736_vm0, %v6881_v57  ;;  %v6954_v25 = vrot.slane %v2221_v8, 4  ;;  %v2254_v51 = vrot.slane %v2252_v9, 4  ;;  %v9026_v35 = vcombine.low %v6636_v50, %v6645_v24  ;;  %v6983_v8 = vld [vmem:[%s6045_s25 + $0xa0] sm:$0xf]  ;;  %v9027_v9 = vcombine.low %v6665_v6, %v6678_v11 }
  0xa5   : > { %v9030_v11 = vcombine.low %v6778_v63, %v6793_v46 }
  0xa6   : > { %5677 = vmatmul.mubr.msk.bf16.vlgmr.msra.gmra.mxu1 %vm687_vm3, %v9023_v22  ;;  %v2212_v22 = vrot.slane %v2210_v59, 5  ;;  %v2155_v59 = vsel %vm6090_vm4, %v2150_v48, %v6852_v27  ;;  %v2241_v27 = vrot.slane %v2239_v23, 4  ;;  %v2244_v48 = vrot.slane %v2242_v40, 5 }
  0xa7   : > { %5743 = vmatpush3.bf16.msra.mxu1 %v6702_v60  ;;  %5680 = vmatprep.mubr.msk.bf16.mxu1 %vm687_vm3, %v5076_v53  ;;  %v2198_v60 = vrot.slane %v2197_v1, 4  ;;  %v2231_v53 = vor.u32 %v2230_v20, %v6902_v4  ;;  %v2179_v1 = vsel %vm6090_vm4, %v2174_v18, %v6864_v54  ;;  %v6951_v20 = vld [vmem:[%s6045_s25 + $0x8c] sm:$0x1]  ;;  %v5113_v34 = vcombine.low %v2155_v59, %v2165_v2 }
  0xa8   : > { %5888 = vmatprep.subr.msk.bf16.mxu1 %vm736_vm0, %v6910_v29  ;;  %9025 = vst [vmem:[#allocation21_spill] sm:$0xff] %v6951_v20  ;;  %v2213_v16 = vsel %vm6090_vm4, %v2208_v15, %v2212_v22  ;;  %v6973_v23 = vcombine.low %v2179_v1, %v2189_v38  ;;  %v6980_v22 = vld [vmem:[%s6045_s25 + $0x9c] sm:$0xf]  ;;  %v2263_v15 = vshrl.u32 %v6959_v0, 16  ;;  %v2227_v2 = vsel %vm6090_vm4, %v6954_v25, %v6902_v4 }
  0xa9   : > { %v2203_v54 = vsel %vm6090_vm4, %v2198_v60, %v6871_v21  ;;  %v2232_v18 = vrot.slane %v2231_v53, 4  ;;  %v2258_v60 = vshll.u32 %v6951_v20, 16  ;;  %v2266_v53 = vshll.u32 %v6959_v0, 16 }
  0xaa   : > { %5715 = vmatmul.mubr.msk.bf16.gmra.mxu0 %vm687_vm3, %v6804_v33  ;;  %v6956_v33 = vrot.slane %v2248_v56, 5  ;;  %v2245_v56 = vor.u32 %v2244_v48, %v2241_v27  ;;  %v5115_v59 = vcombine.low %v2203_v54, %v2213_v16  ;;  %v2276_v38 = vshrl.u32 %v6967_v17, 16  ;;  %v7007_v54 = vld [vmem:[%s6045_s25 + $0xac] sm:$0xf]  ;;  %v7010_v16 = vld [vmem:[%s6045_s25 + $0x98] sm:$0x1] }
  0xab   : > { %5718 = vmatprep.mubr.msk.bf16.mxu0 %vm687_vm3, %v5111_v30  ;;  %v2236_v30 = vrot.slane %v2234_v37, 5  ;;  %v6993_v37 = vld [vmem:[%s6045_s25 + $0xa8] sm:$0xf]  ;;  %v2272_v48 = vshll.u32 %v6967_v17, 16  ;;  %9028 = vst [vmem:[#allocation22_spill] sm:$0xff] %v7010_v16  ;;  %v2300_v4 = vshrl.u32 %v6983_v8, 16 }
  0xac   : > { %v2255_v1 = vor.u32 %v2254_v51, %v6956_v33  ;;  %v2296_v51 = vshll.u32 %v6983_v8, 16  ;;  %v2311_v25 = vshrl.u32 %v6993_v37, 16  ;;  %v2314_v21 = vshll.u32 %v6993_v37, 16 }
  0xad   : > { %v2237_v27 = vsel %vm6090_vm4, %v2232_v18, %v2236_v30  ;;  %v2246_v18 = vrot.slane %v2245_v56, 4  ;;  %v2260_v30 = vrot.slane %v2258_v60, 5  ;;  %v2265_v40 = vrot.slane %v2263_v15, 4 }
  0xae   : > { %5681 = vmatmul.mubr.msk.bf16.gmra.mxu1 %vm687_vm3, %v9026_v35  ;;  %v2287_v35 = vshrl.u32 %v6980_v22, 16  ;;  %v2268_v20 = vrot.slane %v2266_v53, 5  ;;  %v2256_v61 = vrot.slane %v2255_v1, 4  ;;  %v2278_v44 = vrot.slane %v2276_v38, 4 }
  0xaf   : > { %5684 = vmatprep.mubr.msk.bf16.mxu1 %vm687_vm3, %v9027_v9  ;;  %v2290_v9 = vshll.u32 %v6980_v22, 16  ;;  %v2324_v14 = vshrl.u32 %v7007_v54, 16  ;;  %v2320_v12 = vshll.u32 %v7007_v54, 16  ;;  %v7026_v6 = vrot.slane %v2272_v48, 5  ;;  %v7040_v48 = vld [vmem:[%s6045_s25 + $0xa4] sm:$0x1] }
  0xb0   : > { %v2289_v56 = vrot.slane %v2287_v35, 4  ;;  %v9029_v15 = vcombine.low %v6714_v31, %v6724_v62  ;;  %v2302_v53 = vrot.slane %v2300_v4, 4  ;;  %v2313_v1 = vrot.slane %v2311_v25, 4  ;;  %9031 = vst [vmem:[#allocation23_spill] sm:$0xff] %v7040_v48  ;;  %v7055_v62 = vld [vmem:[%s6045_s25 + $0xb0] sm:$0x1] }
  0xb1   : > { %v2292_v60 = vrot.slane %v2290_v9, 5  ;;  %v2316_v38 = vrot.slane %v2314_v21, 5  ;;  %v2335_v35 = vshrl.u32 %v7018_v45, 16  ;;  %v2338_v9 = vshll.u32 %v7018_v45, 16  ;;  %9032 = vst [vmem:[#allocation24_spill] sm:$0xff] %v7055_v62 }
  0xb2   : > { %5719 = vmatmul.mubr.msk.bf16.gmra.mxu0 %vm687_vm3, %v5112_v39  ;;  %v2282_v39 = vshll.u32 %v7010_v16, 16  ;;  %v2344_v4 = vshll.u32 %v7024_v36, 16  ;;  %v2251_v21 = vsel %vm6090_vm4, %v2246_v18, %v6956_v33  ;;  %v7049_v25 = vrot.slane %v2320_v12, 5  ;;  %v7063_v18 = vld [vmem:[%s6045_s25 + $0xc4] sm:$0xf] }
  0xb3   : > { %5722 = vmatprep.mubr.msk.bf16.mxu0 %vm687_vm3, %v5113_v34  ;;  %v7033_v34 = vrot.slane %v2296_v51, 5  ;;  %v5116_v51 = vcombine.low %v2227_v2, %v2237_v27  ;;  %v2326_v16 = vrot.slane %v2324_v14, 4  ;;  %v2269_v63 = vor.u32 %v2268_v20, %v2265_v40 }
  0xb4   : > { %v2279_v46 = vor.u32 %v2278_v44, %v7026_v6  ;;  %v2284_v31 = vrot.slane %v2282_v39, 5  ;;  %v2293_v2 = vor.u32 %v2292_v60, %v2289_v56  ;;  %v2306_v33 = vshll.u32 %v7040_v48, 16  ;;  %v7073_v39 = vld [vmem:[%s6045_s25 + $0xbc] sm:$0x1] }
  0xb5   : > { %v2303_v27 = vor.u32 %v2302_v53, %v7033_v34  ;;  %v2317_v12 = vor.u32 %v2316_v38, %v2313_v1  ;;  %v2337_v14 = vrot.slane %v2335_v35, 4  ;;  %v7067_v44 = vrot.slane %v2344_v4, 5 }
  0xb6   : > { %5685 = vmatmul.mubr.msk.bf16.gmra.mxu1 %vm687_vm3, %v9029_v15  ;;  %v2348_v15 = vshrl.u32 %v7024_v36, 16  ;;  %v2327_v40 = vor.u32 %v2326_v16, %v7049_v25  ;;  %v2359_v56 = vshrl.u32 %v7058_v26, 16  ;;  %v2362_v60 = vshll.u32 %v7058_v26, 16 }
  0xb7   : > { %5688 = vmatprep.mubr.msk.bf16.mxu1 %vm687_vm3, %v9030_v11  ;;  %v2261_v11 = vsel %vm6090_vm4, %v2256_v61, %v2260_v30  ;;  %v2340_v61 = vrot.slane %v2338_v9, 5  ;;  %v2330_v30 = vshll.u32 %v7055_v62, 16  ;;  %v2270_v1 = vrot.slane %v2269_v63, 4 }
  0xb8   : > { %v2350_v20 = vrot.slane %v2348_v15, 4  ;;  %v5117_v53 = vcombine.low %v2251_v21, %v2261_v11  ;;  %v2368_v38 = vshll.u32 %v7063_v18, 16  ;;  %v9033_v35 = vcombine.low %v6796_v43, %v6802_v10 }
  0xb9   : > { %v2294_v16 = vrot.slane %v2293_v2, 4  ;;  %v2304_v9 = vrot.slane %v2303_v27, 4  ;;  %v2308_v15 = vrot.slane %v2306_v33, 5  ;;  %v9034_v4 = vcombine.low %v6812_v3, %v6819_v13  ;;  %v7094_v27 = vld [vmem:[%s6045_s25 + $0xc8] sm:$0x1] }
  0xba   : > { %5723 = vmatmul.mubr.msk.bf16.gmra.mxu0 %vm687_vm3, %v6973_v23  ;;  %v2372_v23 = vshrl.u32 %v7063_v18, 16  ;;  %v2318_v63 = vrot.slane %v2317_v12, 4  ;;  %v2341_v21 = vor.u32 %v2340_v61, %v2337_v14  ;;  %v2351_v11 = vor.u32 %v2350_v20, %v7067_v44 }
  0xbb   : > { %5726 = vmatprep.mubr.msk.bf16.mxu0 %vm687_vm3, %v5115_v59  ;;  %v2280_v59 = vrot.slane %v2279_v46, 4  ;;  %v2354_v48 = vshll.u32 %v7073_v39, 16  ;;  %v2328_v62 = vrot.slane %v2327_v40, 4  ;;  %v2332_v43 = vrot.slane %v2330_v30, 5 }
  0xbc   : > { %v2361_v10 = vrot.slane %v2359_v56, 4  ;;  %v5084_v46 = vcombine.low %v6899_v19, %v6905_v47  ;;  %v5085_v2 = vcombine.low %v6959_v0, %v6967_v17  ;;  %v7096_v33 = vrot.slane %v2368_v38, 5 }
  0xbd   : > { %v2374_v12 = vrot.slane %v2372_v23, 4  ;;  %v2275_v14 = vsel %vm6090_vm4, %v2270_v1, %v7026_v6  ;;  %v2285_v61 = vsel %vm6090_vm4, %v2280_v59, %v2284_v31  ;;  %v2299_v20 = vsel %vm6090_vm4, %v2294_v16, %v7033_v34 }
  0xbe   : > { %5689 = vmatmul.mubr.msk.bf16.gmra.mxu1 %vm687_vm3, %v9033_v35  ;;  %v2364_v35 = vrot.slane %v2362_v60, 5  ;;  %v2309_v40 = vsel %vm6090_vm4, %v2304_v9, %v2308_v15  ;;  %v2323_v30 = vsel %vm6090_vm4, %v2318_v63, %v7049_v25  ;;  %v2342_v56 = vrot.slane %v2341_v21, 4  ;;  %v7142_v63 = vld [vmem:[%s6045_s25 + $0x1c] sm:$0xf] }
  0xbf   : > { %5692 = vmatprep.mubr.msk.bf16.mxu1 %vm687_vm3, %v9034_v4  ;;  %v2352_v60 = vrot.slane %v2351_v11, 4  ;;  %v2356_v23 = vrot.slane %v2354_v48, 5  ;;  %v2333_v6 = vsel %vm6090_vm4, %v2328_v62, %v2332_v43  ;;  %v2378_v34 = vshll.u32 %v7094_v27, 16  ;;  %v7139_v4 = vld [vmem:[%s6045_s25 + $0x18] sm:$0xf] }
  0xc0   : > { %v2365_v31 = vor.u32 %v2364_v35, %v2361_v10  ;;  %v2694_v1 = vrot.slane %v6595_v42, 5  ;;  %v5086_v38 = vcombine.low %v6980_v22, %v6983_v8  ;;  %v5087_v25 = vcombine.low %v6993_v37, %v7007_v54  ;;  %v9036_v35 = vld [vmem:[#allocation8_spill] sm:$0xff] }
  0xc1   : > { %v2375_v48 = vor.u32 %v2374_v12, %v7096_v33  ;;  %v5119_v62 = vcombine.low %v2299_v20, %v2309_v40  ;;  %v5088_v42 = vcombine.low %v7018_v45, %v7024_v36  ;;  %v2701_v10 = vrot.slane %v6619_v5, 5  ;;  %v7151_v40 = vld [vmem:[%s6045_s25 + $0x28] sm:$0xf] }
  0xc2   : > { %5727 = vmatmul.mubr.msk.bf16.gmra.mxu0 %vm687_vm3, %v5116_v51  ;;  %v5118_v51 = vcombine.low %v2275_v14, %v2285_v61  ;;  %v5120_v59 = vcombine.low %v2323_v30, %v2333_v6  ;;  %v2347_v16 = vsel %vm6090_vm4, %v2342_v56, %v7067_v44  ;;  %v2357_v9 = vsel %vm6090_vm4, %v2352_v60, %v2356_v23  ;;  %v9038_v44 = vld [vmem:[#allocation9_spill] sm:$0xff] }
  0xc3   : > { %5730 = vmatprep.mubr.msk.bf16.mxu0 %vm687_vm3, %v5117_v53  ;;  %v9035_v53 = vcombine.low %v6844_v28, %v6855_v41  ;;  %v5140_v15 = vrot.slane %v6589_v7, 9  ;;  %v2366_v21 = vrot.slane %v2365_v31, 4  ;;  %v2380_v11 = vrot.slane %v2378_v34, 5 }
  0xc4   : > { %v2696_v5 = vrot.slane %v2694_v1, 4  ;;  %v2697_v12 = vrot.slane %v9036_v35, 5  ;;  %v2376_v14 = vrot.slane %v2375_v48, 4  ;;  %v5141_v61 = vrot.slane %v6614_v58, 9  ;;  %v9054_v58 = vld [vmem:[#allocation4_spill] sm:$0xff] }
  0xc5   : > { %v2704_v20 = vrot.slane %v9038_v44, 5  ;;  %v2703_v30 = vrot.slane %v2701_v10, 4  ;;  %v3510_v60 = vshll.u32 %v7151_v40, 16  ;;  %v3514_v23 = vshrl.u32 %v7151_v40, 16 }
  0xc6   : > { %5693 = vmatmul.mubr.msk.bf16.gmra.mxu1 %vm687_vm3, %v9035_v53  ;;  %v5121_v6 = vcombine.low %v2347_v16, %v2357_v9  ;;  %v7160_v34 = vsel %vm6375_vm7, %v5140_v15, %v2694_v1  ;;  %v2371_v53 = vsel %vm6090_vm4, %v2366_v21, %v7096_v33  ;;  %v7171_v35 = vsel %vm6375_vm7, %v2696_v5, %v2697_v12  ;;  %v7278_v12 = vld [vmem:[%s6045_s25 + $0x48] sm:$0xf] }
  0xc7   : > { %5696 = vmatprep.mubr.msk.bf16.mxu1 %vm687_vm3, %v5084_v46  ;;  %v7146_v46 = vld [vmem:[%s6045_s25 + $0x24] sm:$0xf]  ;;  %v2708_v1 = vrot.slane %v6627_v52, 5  ;;  %v2381_v16 = vsel %vm6090_vm4, %v2376_v14, %v2380_v11  ;;  %v8936_v33 = vrot.slane %v7151_v40, 5  ;;  %v7185_v15 = vsel %vm6375_vm7, %v2703_v30, %v2704_v20  ;;  %v7197_v14 = vld [vmem:[%s6045_s25 + $0x30] sm:$0xf] }
  0xc8   : > { %9037 = vst [vmem:[#allocation8_spill] sm:$0xff] %v7146_v46  ;;  %v3501_v7 = vshrl.u32 %v7146_v46, 16  ;;  %v3504_v56 = vshll.u32 %v7146_v46, 16  ;;  %v7187_v5 = vrot.slane %v3510_v60, 5  ;;  %v3516_v52 = vrot.slane %v3514_v23, 4 }
  0xc9   : > { %v5122_v44 = vcombine.low %v2371_v53, %v2381_v16  ;;  %v2710_v20 = vrot.slane %v2708_v1, 4  ;;  %v7213_v60 = vsel %vm736_vm0, %v6910_v29, 0  ;;  %v5143_v29 = vrot.slane %v6636_v50, 9  ;;  %v7288_v11 = vld [vmem:[%s6045_s25 + $0x4c] sm:$0xf] }
  0xca   : > { %5731 = vmatmul.mubr.msk.bf16.gmra.mxu0 %vm687_vm3, %v5118_v51  ;;  %v3503_v9 = vrot.slane %v3501_v7, 4  ;;  %v3506_v21 = vrot.slane %v3504_v56, 5  ;;  %9040 = vst [vmem:[#allocation9_spill] sm:$0xff] %v7187_v5  ;;  %v2711_v7 = vrot.slane %v6672_v49, 5  ;;  %v3517_v53 = vor.u32 %v3516_v52, %v7187_v5  ;;  %v7231_v52 = vld [vmem:[%s6045_s25 + $0x3c] sm:$0xf] }
  0xcb   : > { %5734 = vmatprep.mubr.msk.bf16.mxu0 %vm687_vm3, %v5119_v62  ;;  %v7179_v62 = vsel %vm6375_vm7, %v5141_v61, %v2701_v10  ;;  %v7200_v61 = vld [vmem:[%s6045_s25 + $0x34] sm:$0xf]  ;;  %v7218_v49 = vsel %vm736_vm0, %v6881_v57, 0  ;;  %v3552_v50 = vshll.u32 %v7231_v52, 16  ;;  %v9046_v51 = vld [vmem:[#allocation6_spill] sm:$0xff]  ;;  %v9058_v5 = vld [vmem:[#allocation5_spill] sm:$0xff] }
  0xcc   : > { %v3507_v23 = vor.u32 %v3506_v21, %v3503_v9  ;;  %v9042_v9 = vld [vmem:[#allocation12_spill] sm:$0xff]  ;;  %v7236_v57 = vsel %vm6375_vm7, %v2710_v20, %v2711_v7  ;;  %v7253_v7 = vrot.slane %v3517_v53, 4  ;;  %v2729_v56 = vrot.slane %v9046_v51, 5  ;;  %v9047_v53 = vld [vmem:[#allocation11_spill] sm:$0xff] }
  0xcd   : > { %v2718_v21 = vrot.slane %v9042_v9, 5 }
  0xce   : > { %5697 = vmatmul.mubr.msk.bf16.gmra.mxu1 %vm687_vm3, %v5085_v2  ;;  %v5142_v2 = vrot.slane %v6622_v55, 9  ;;  %v7209_v55 = vrot.slane %v8936_v33, 4  ;;  %v7251_v20 = vrot.slane %v3507_v23, 4  ;;  %v2731_v43 = vrot.slane %v2729_v56, 4 }
  0xcf   : > { %5700 = vmatprep.mubr.msk.bf16.mxu1 %vm687_vm3, %v5086_v38  ;;  %v2715_v38 = vrot.slane %v6645_v24, 5  ;;  %v9049_v24 = vld [vmem:[#allocation3_spill] sm:$0xff] }
  0xd0   : > { %9041 = vst [vmem:[#allocation14_spill] sm:$0xff] %v7209_v55  ;;  %v7225_v16 = vsel %vm6375_vm7, %v5142_v2, %v2708_v1  ;;  %v3549_v1 = vshrl.u32 %v7231_v52, 16  ;;  %v9043_v2 = vld [vmem:[#allocation10_spill] sm:$0xff]  ;;  %9044 = vst [vmem:[#allocation12_spill] sm:$0xff] %v7251_v20  ;;  %v2725_v48 = vrot.slane %v9049_v24, 5  ;;  %v9059_v20 = vcombine.low %v7160_v34, %v7171_v35  ;;  %v9071_v55 = vld [vmem:[#allocation19_spill] sm:$0xff] }
  0xd1   : > { %v2717_v33 = vrot.slane %v2715_v38, 4  ;;  %v2722_v10 = vrot.slane %v9043_v2, 5  ;;  %9045 = vst [vmem:[#allocation10_spill] sm:$0xff] %v7253_v7  ;;  %v5144_v2 = vrot.slane %v9047_v53, 9  ;;  %v2732_v7 = vrot.slane %v9054_v58, 5 }
  0xd2   : > { %5735 = vmatmul.mubr.msk.bf16.gmra.mxu0 %vm687_vm3, %v5120_v59  ;;  %v7239_v59 = vld [vmem:[%s6045_s25 + $0x40] sm:$0xf]  ;;  %v7274_v30 = vrot.slane %v3549_v1, 4  ;;  %v7294_v24 = vld [vmem:[%s6045_s25 + $0x54] sm:$0xf]  ;;  %v9056_v58 = vcombine.low %v7139_v4, %v7142_v63 }
  0xd3   : > { %5738 = vmatprep.mubr.msk.bf16.mxu0 %vm687_vm3, %v5121_v6  ;;  %v3558_v9 = vshll.u32 %v7239_v59, 16  ;;  %v3562_v6 = vshrl.u32 %v7239_v59, 16  ;;  %v7272_v51 = vsel %vm6375_vm7, %v2717_v33, %v2718_v21  ;;  %v9053_v21 = vld [vmem:[#allocation13_spill] sm:$0xff]  ;;  %v3597_v53 = vshrl.u32 %v7294_v24, 16  ;;  %v9055_v33 = vld [vmem:[#allocation7_spill] sm:$0xff] }
  0xd4   : > { %9048 = vst [vmem:[#allocation6_spill] sm:$0xff] %v7274_v30  ;;  %v5145_v1 = vrot.slane %v9053_v21, 9  ;;  %v2736_v21 = vrot.slane %v9055_v33, 5  ;;  %v7334_v32 = vsel %vm6375_vm7, %v2731_v43, %v2732_v7  ;;  %v7347_v43 = vld [vmem:[%s6045_s25 + $0x60] sm:$0xf]  ;;  %v9061_v7 = vld [vmem:[#allocation16_spill] sm:$0xff] }
  0xd5   : > { %v7284_v23 = vrot.slane %v3562_v6, 4  ;;  %v7304_v6 = vld [vmem:[%s6045_s25 + $0x58] sm:$0xf]  ;;  %v7350_v33 = vrot.slane %v3597_v53, 4  ;;  %v7359_v35 = vld [vmem:[%s6045_s25 + $0x64] sm:$0xf] }
  0xd6   : > { %5701 = vmatmul.mubr.msk.bf16.gmra.mxu1 %vm687_vm3, %v5087_v25  ;;  %v7265_v25 = vsel %vm6375_vm7, %v5143_v29, %v2715_v38  ;;  %v7280_v38 = vrot.slane %v3552_v50, 5  ;;  %v7282_v29 = vrot.slane %v3558_v9, 5  ;;  %v7301_v9 = vsel %vm6375_vm7, %v5144_v2, %v2722_v10  ;;  %v7366_v30 = vld [vmem:[%s6045_s25 + $0x6c] sm:$0xf] }
  0xd7   : > { %5704 = vmatprep.mubr.msk.bf16.mxu1 %vm687_vm3, %v5088_v42  ;;  %v2724_v42 = vrot.slane %v2722_v10, 4  ;;  %9052 = vst [vmem:[#allocation25_spill] sm:$0xff] %v7284_v23  ;;  %v3600_v50 = vshll.u32 %v7294_v24, 16  ;;  %v3606_v10 = vshll.u32 %v7304_v6, 16  ;;  %v3610_v2 = vshrl.u32 %v7304_v6, 16  ;;  %9062 = vst [vmem:[#allocation13_spill] sm:$0xff] %v7350_v33 }
  0xd8   : > { %9050 = vst [vmem:[#allocation11_spill] sm:$0xff] %v7280_v38  ;;  %9051 = vst [vmem:[#allocation3_spill] sm:$0xff] %v7282_v29  ;;  %v2743_v29 = vrot.slane %v9061_v7, 5  ;;  %v2750_v53 = vrot.slane %v6819_v13, 5  ;;  %v9068_v7 = vld [vmem:[#allocation18_spill] sm:$0xff] }
  0xd9   : > { %v7352_v38 = vrot.slane %v3600_v50, 5  ;;  %v7356_v34 = vrot.slane %v3610_v2, 4 }
  0xda   : > { %5739 = vmatmul.mubr.msk.bf16.gmra.mxu0 %vm687_vm3, %v5122_v44  ;;  %v7314_v44 = vsel %vm6375_vm7, %v2724_v42, %v2725_v48  ;;  %v9057_v48 = vcombine.low %v7058_v26, %v7063_v18  ;;  %v7330_v42 = vsel %vm6375_vm7, %v5145_v1, %v2729_v56  ;;  %v2738_v56 = vrot.slane %v2736_v21, 4  ;;  %v9060_v1 = vld [vmem:[#allocation17_spill] sm:$0xff] }
  0xdb   : > { %5778 = vmatprep.mubr.msk.bf16.mxu0 %vm687_vm3, %v9056_v58  ;;  %v5146_v58 = vrot.slane %v9058_v5, 9  ;;  %v2739_v23 = vrot.slane %v9060_v1, 5  ;;  %9063 = vst [vmem:[#allocation4_spill] sm:$0xff] %v7352_v38  ;;  %v7354_v5 = vrot.slane %v3606_v10, 5  ;;  %9065 = vst [vmem:[#allocation5_spill] sm:$0xff] %v7356_v34  ;;  %v9067_v10 = vld [vmem:[#allocation15_spill] sm:$0xff]  ;;  %v9069_v1 = vcombine.low %v7146_v46, %v7151_v40 }
  0xdc   : > { %9066 = vst [vmem:[#allocation17_spill] sm:$0xff] %v7366_v30  ;;  %v5147_v2 = vrot.slane %v9067_v10, 9  ;;  %v2746_v34 = vrot.slane %v9068_v7, 5  ;;  %v9070_v10 = vcombine.low %v7197_v14, %v7200_v61  ;;  %v2752_v33 = vrot.slane %v2750_v53, 4 }
  0xdd   : > { %9064 = vst [vmem:[#allocation7_spill] sm:$0xff] %v7354_v5  ;;  %v7371_v50 = vsel %vm6375_vm7, %v5146_v58, %v2736_v21  ;;  %v7376_v5 = vld [vmem:[%s6045_s25 + $0x70] sm:$0xf]  ;;  %v7385_v13 = vsel %vm6375_vm7, %v2738_v56, %v2739_v23  ;;  %v3648_v21 = vshll.u32 %v7366_v30, 16  ;;  %v5148_v56 = vrot.slane %v6812_v3, 9 }
  0xde   : > { %5705 = vmatmul.mubr.msk.bf16.gmra.mxu1 %vm687_vm3, %v9057_v48  ;;  %v2745_v48 = vrot.slane %v2743_v29, 4  ;;  %v3654_v58 = vshll.u32 %v7376_v5, 16  ;;  %v2757_v46 = vrot.slane %v6855_v41, 5  ;;  %v7410_v3 = vsel %vm6375_vm7, %v5147_v2, %v2743_v29  ;;  %v7416_v41 = vld [vmem:[%s6045_s25 + $0x78] sm:$0xf] }
  0xdf   : > { %5744 = vmatprep.mubr.msk.bf16.mxu1 %vm687_vm3, %v9059_v20  ;;  %v3645_v20 = vshrl.u32 %v7366_v30, 16  ;;  %9073 = vst [vmem:[#allocation16_spill] sm:$0xff] %v7416_v41  ;;  %v7429_v2 = vrot.slane %v3648_v21, 5  ;;  %v7434_v23 = vld [vmem:[%s6045_s25 + $0x7c] sm:$0xf]  ;;  %v9091_v7 = vcombine.low %v7301_v9, %v7314_v44  ;;  %v9099_v9 = vcombine.low %v7294_v24, %v7304_v6 }
  0xe0   : > { %9076 = vst [vmem:[#allocation18_spill] sm:$0xff] %v7434_v23  ;;  %v7451_v21 = vld [vmem:[%s6045_s25 + $0x88] sm:$0xf]  ;;  %v7528_v44 = vld [vmem:[%s6045_s25 + $0x9c] sm:$0xf] }
  0xe1   : > { %v7427_v29 = vrot.slane %v3645_v20, 4  ;;  %v2759_v20 = vrot.slane %v2757_v46, 4 }
  0xe2   : > { %5779 = vmatmul.mubr.msk.bf16.vlgmr.msra.gmra.mxu0 %vm687_vm3, %v9069_v1 }
  0xe3   : > { %5845 = vmatpush3.bf16.msra.mxu0 %v7218_v49  ;;  %5782 = vmatprep.mubr.msk.bf16.mxu0 %vm687_vm3, %v9070_v10  ;;  %v2753_v49 = vrot.slane %v9071_v55, 5  ;;  %v9072_v10 = vcombine.low %v7179_v62, %v7185_v15  ;;  %v3658_v55 = vshrl.u32 %v7376_v5, 16  ;;  %v9074_v62 = vcombine.low %v7225_v16, %v7236_v57  ;;  %v9077_v57 = vld [vmem:[#allocation20_spill] sm:$0xff] }
  0xe4   : > { %v7425_v15 = vsel %vm6375_vm7, %v2745_v48, %v2746_v34  ;;  %v5149_v16 = vrot.slane %v6844_v28, 9  ;;  %v7444_v48 = vld [vmem:[%s6045_s25 + $0x84] sm:$0xf]  ;;  %9079 = vst [vmem:[#allocation20_spill] sm:$0xff] %v7451_v21  ;;  %v3706_v28 = vshrl.u32 %v7451_v21, 16 }
  0xe5   : > { %9078 = vst [vmem:[#allocation19_spill] sm:$0xff] %v7444_v48  ;;  %v7448_v34 = vsel %vm6375_vm7, %v2752_v33, %v2753_v49  ;;  %v3696_v38 = vshll.u32 %v7444_v48, 16  ;;  %v9081_v33 = vcombine.low %v7231_v52, %v7239_v59  ;;  %v9088_v49 = vcombine.low %v7265_v25, %v7272_v51 }
  0xe6   : > { %5745 = vmatmul.mubr.msk.bf16.vlgmr.msra.gmra.mxu1 %vm687_vm3, %v9072_v10  ;;  %v7431_v10 = vrot.slane %v3654_v58, 5  ;;  %v3693_v58 = vshrl.u32 %v7444_v48, 16  ;;  %v7468_v1 = vpop.f32.mrf.mxu0  ;;  %v7515_v25 = vrot.slane %v3706_v28, 4  ;;  %v2771_v28 = vrot.slane %v6967_v17, 5 }
  0xe7   : > { %5811 = vmatpush3.bf16.msra.mxu1 %v7213_v60  ;;  %5748 = vmatprep.mubr.msk.bf16.mxu1 %vm687_vm3, %v9074_v62  ;;  %v7439_v60 = vsel %vm6375_vm7, %v5148_v56, %v2750_v53  ;;  %v2760_v62 = vrot.slane %v9077_v57, 5  ;;  %v7457_v56 = vrot.slane %v3658_v55, 4  ;;  %v2764_v57 = vrot.slane %v6905_v47, 5  ;;  %9082 = vst [vmem:[#allocation27_spill] sm:$0xff] %v7468_v1  ;;  %v7498_v53 = vld [vmem:[%s6045_s25 + $0x94] sm:$0xf] }
  0xe8   : > { %9075 = vst [vmem:[#allocation15_spill] sm:$0xff] %v7431_v10  ;;  %v3702_v55 = vshll.u32 %v7451_v21, 16  ;;  %v9083_v47 = vcombine.low %v7278_v12, %v7288_v11  ;;  %v7484_v1 = vsel %vm6375_vm7, %v5149_v16, %v2757_v46  ;;  %v7490_v10 = vrot.slane %v3693_v58, 4  ;;  %9087 = vst [vmem:[#allocation31_spill] sm:$0xff] %v7498_v53  ;;  %v7517_v51 = vpop.f32.mrf.mxu0 }
  0xe9   : > { %9080 = vst [vmem:[#allocation26_spill] sm:$0xff] %v7457_v56  ;;  %v7488_v56 = vsel %vm6375_vm7, %v2759_v20, %v2760_v62  ;;  %v5150_v16 = vrot.slane %v6899_v19, 9  ;;  %v2766_v62 = vrot.slane %v2764_v57, 4  ;;  %v9090_v20 = vld [vmem:[#allocation21_spill] sm:$0xff]  ;;  %9093 = vst [vmem:[#allocation33_spill] sm:$0xff] %v7515_v25  ;;  %v9095_v19 = vld [vmem:[#allocation24_spill] sm:$0xff] }
  0xea   : > { %5783 = vmatmul.mubr.msk.bf16.gmra.mxu0 %vm687_vm3, %v9081_v33  ;;  %9084 = vst [vmem:[#allocation28_spill] sm:$0xff] %v7490_v10  ;;  %v7495_v33 = vld [vmem:[%s6045_s25 + $0x90] sm:$0xf]  ;;  %v2767_v58 = vrot.slane %v9090_v20, 5  ;;  %9094 = vst [vmem:[#allocation34_spill] sm:$0xff] %v7517_v51  ;;  %v5151_v17 = vrot.slane %v6959_v0, 9  ;;  %v9101_v0 = vcombine.low %v7347_v43, %v7359_v35 }
  0xeb   : > { %5786 = vmatprep.mubr.msk.bf16.mxu0 %vm687_vm3, %v9083_v47  ;;  %v7492_v47 = vrot.slane %v3696_v38, 5  ;;  %9086 = vst [vmem:[#allocation30_spill] sm:$0xff] %v7495_v33  ;;  %v7504_v46 = vpop.f32.mrf.mxu1  ;;  %v5153_v38 = vrot.slane %v6993_v37, 9  ;;  %9096 = vst [vmem:[#allocation24_spill] sm:$0xff] %v7528_v44  ;;  %v7543_v37 = vsel %vm6375_vm7, %v5150_v16, %v2764_v57  ;;  %v3741_v57 = vshrl.u32 %v7528_v44, 16 }
  0xec   : > { %9089 = vst [vmem:[#allocation32_spill] sm:$0xff] %v7504_v46  ;;  %v2788_v46 = vrot.slane %v9095_v19, 5  ;;  %v7547_v10 = vsel %vm6375_vm7, %v2766_v62, %v2767_v58  ;;  %v2778_v16 = vrot.slane %v6983_v8, 5  ;;  %v9102_v58 = vld [vmem:[#allocation22_spill] sm:$0xff]  ;;  %v5155_v8 = vrot.slane %v7058_v26, 9 }
  0xed   : > { %9085 = vst [vmem:[#allocation29_spill] sm:$0xff] %v7492_v47  ;;  %v7513_v47 = vrot.slane %v3702_v55, 5  ;;  %v7533_v55 = vld [vmem:[%s6045_s25 + $0xa0] sm:$0xf]  ;;  %v7539_v20 = vpop.f32.mrf.mxu1  ;;  %v2799_v25 = vrot.slane %v7063_v18, 5 }
  0xee   : > { %5749 = vmatmul.mubr.msk.bf16.gmra.mxu1 %vm687_vm3, %v9088_v49  ;;  %v2785_v49 = vrot.slane %v7007_v54, 5  ;;  %9097 = vst [vmem:[#allocation35_spill] sm:$0xff] %v7533_v55  ;;  %9098 = vst [vmem:[#allocation36_spill] sm:$0xff] %v7539_v20  ;;  %v5152_v20 = vrot.slane %v6980_v22, 9  ;;  %v2802_v22 = vrot.slane %v7094_v27, 5 }
  0xef   : > { %5752 = vmatprep.mubr.msk.bf16.mxu1 %vm687_vm3, %v9091_v7  ;;  %9092 = vst [vmem:[#allocation21_spill] sm:$0xff] %v7513_v47  ;;  %v2774_v7 = vrot.slane %v9102_v58, 5  ;;  %v7582_v58 = vpop.f32.mrf.mxu1  ;;  %v9105_v47 = vcombine.low %v7371_v50, %v7385_v13  ;;  %v7604_v18 = vld [vmem:[%s6045_s25 + $0xa8] sm:$0xf]  ;;  %v2792_v50 = vrot.slane %v7024_v36, 5  ;;  %v7609_v13 = vsel %vm6375_vm7, %v5155_v8, %v2799_v25 }
  0xf0   : > { %v7537_v54 = vsel %vm6375_vm7, %v5153_v38, %v2785_v49  ;;  %v2787_v19 = vrot.slane %v2785_v49, 4  ;;  %v7555_v38 = vpop.f32.mrf.mxu0  ;;  %v3744_v49 = vshll.u32 %v7528_v44, 16  ;;  %9104 = vst [vmem:[#allocation22_spill] sm:$0xff] %v7582_v58  ;;  %v7627_v36 = vsel %vm6375_vm7, %v5152_v20, %v2778_v16  ;;  %v7630_v8 = vld [vmem:[%s6045_s25 + $0xac] sm:$0xf] }
  0xf1   : > { %9100 = vst [vmem:[#allocation37_spill] sm:$0xff] %v7555_v38  ;;  %v3754_v38 = vshrl.u32 %v7533_v55, 16 }
  0xf2   : > { %5787 = vmatmul.mubr.msk.bf16.gmra.mxu0 %vm687_vm3, %v9099_v9  ;;  %v7562_v62 = vsel %vm6375_vm7, %v2787_v19, %v2788_v46  ;;  %v2773_v46 = vrot.slane %v2771_v28, 4  ;;  %v3750_v19 = vshll.u32 %v7533_v55, 16  ;;  %v7586_v9 = vsel %vm6375_vm7, %v5151_v17, %v2771_v28  ;;  %v9108_v28 = vld [vmem:[#allocation23_spill] sm:$0xff] }
  0xf3   : > { %5790 = vmatprep.mubr.msk.bf16.mxu0 %vm687_vm3, %v9101_v0  ;;  %v9103_v0 = vcombine.low %v7330_v42, %v7334_v32  ;;  %v7595_v32 = vpop.f32.mrf.mxu0  ;;  %v7597_v42 = vrot.slane %v3741_v57, 4  ;;  %v2781_v17 = vrot.slane %v9108_v28, 5  ;;  %v7601_v26 = vrot.slane %v3744_v49, 5  ;;  %v7621_v49 = vld [vmem:[%s6045_s25 + $0xb4] sm:$0xf] }
  0xf4   : > { %9106 = vst [vmem:[#allocation38_spill] sm:$0xff] %v7595_v32  ;;  %v7613_v57 = vsel %vm6375_vm7, %v2773_v46, %v2774_v7  ;;  %v7615_v58 = vrot.slane %v3750_v19, 5  ;;  %v7617_v28 = vrot.slane %v3754_v38, 4  ;;  %v3789_v7 = vshrl.u32 %v7621_v49, 16  ;;  %v7684_v32 = vld [vmem:[%s6045_s25 + $0xc4] sm:$0xf] }
  0xf5   : > { %9107 = vst [vmem:[#allocation39_spill] sm:$0xff] %v7597_v42  ;;  %9109 = vst [vmem:[#allocation23_spill] sm:$0xff] %v7601_v26  ;;  %v7623_v26 = vpop.f32.mrf.mxu1  ;;  %v3792_v46 = vshll.u32 %v7621_v49, 16  ;;  %v9113_v19 = vcombine.low %v7366_v30, %v7376_v5  ;;  %v7701_v42 = vld [vmem:[%s6045_s25 + $0xcc] sm:$0xf] }
  0xf6   : > { %5753 = vmatmul.mubr.msk.bf16.gmra.mxu1 %vm687_vm3, %v9103_v0  ;;  %v2780_v0 = vrot.slane %v2778_v16, 4  ;;  %9110 = vst [vmem:[#allocation40_spill] sm:$0xff] %v7615_v58  ;;  %9111 = vst [vmem:[#allocation41_spill] sm:$0xff] %v7617_v28  ;;  %v7681_v28 = vld [vmem:[%s6045_s25 + $0xc0] sm:$0xf] }
  0xf7   : > { %5756 = vmatprep.mubr.msk.bf16.mxu1 %vm687_vm3, %v9105_v47  ;;  %v2801_v47 = vrot.slane %v2799_v25, 4  ;;  %9112 = vst [vmem:[#allocation42_spill] sm:$0xff] %v7623_v26  ;;  %v7633_v25 = vld [vmem:[%s6045_s25 + $0xb8] sm:$0xf]  ;;  %v7645_v27 = vpop.f32.mrf.mxu0 }
  0xf8   : > { %9114 = vst [vmem:[#allocation43_spill] sm:$0xff] %v7645_v27  ;;  %v7649_v20 = vsel %vm6375_vm7, %v2780_v0, %v2781_v17  ;;  %v3798_v16 = vshll.u32 %v7633_v25, 16  ;;  %v3802_v26 = vshrl.u32 %v7633_v25, 16  ;;  %v2794_v0 = vrot.slane %v2792_v50, 4 }
  0xf9   : > { %v7639_v38 = vsel %vm6375_vm7, %v2801_v47, %v2802_v22  ;;  %v9115_v22 = vcombine.low %v7416_v41, %v7434_v23  ;;  %v2795_v17 = vrot.slane %v7073_v39, 5  ;;  %v3486_v27 = vshll.u32 %v7142_v63, 16  ;;  %v7784_v41 = vld [vmem:[%s6045_s25 + $0x44] sm:$0x1] }
  0xfa   : > { %5791 = vmatmul.mubr.msk.bf16.gmra.mxu0 %vm687_vm3, %v9113_v19  ;;  %v5154_v19 = vrot.slane %v7018_v45, 9  ;;  %v7694_v47 = vrot.slane %v3792_v46, 5  ;;  %v7696_v58 = vrot.slane %v3798_v16, 5  ;;  %v7698_v39 = vrot.slane %v3802_v26, 4  ;;  %v5190_v16 = vld [vmem:[%s6045_s25 + $0x20] sm:$0x1] }
  0xfb   : > { %5794 = vmatprep.mubr.msk.bf16.mxu0 %vm687_vm3, %v9115_v22  ;;  %v9116_v22 = vcombine.low %v7410_v3, %v7425_v15  ;;  %v7672_v45 = vpop.f32.mrf.mxu1  ;;  %v9118_v3 = vcombine.low %v7439_v60, %v7448_v34  ;;  %v7690_v15 = vpop.f32.mrf.mxu0  ;;  %v7710_v34 = vsel %vm6375_vm7, %v2794_v0, %v2795_v17  ;;  %v3837_v46 = vshrl.u32 %v7701_v42, 16 }
  0xfc   : > { %9117 = vst [vmem:[#allocation44_spill] sm:$0xff] %v7672_v45  ;;  %9119 = vst [vmem:[#allocation45_spill] sm:$0xff] %v7690_v15  ;;  %v7706_v60 = vsel %vm6375_vm7, %v5154_v19, %v2792_v50  ;;  %v9124_v26 = vshrl.u32 %v7139_v4, 16  ;;  %v7721_v45 = vrot.slane %v3486_v27, 5  ;;  %v9126_v50 = vshrl.u32 %v7142_v63, 16 }
  0xfd   : > { %9121 = vst [vmem:[#allocation47_spill] sm:$0xff] %v7694_v47  ;;  %9122 = vst [vmem:[#allocation48_spill] sm:$0xff] %v7696_v58  ;;  %v7725_v47 = vpop.f32.mrf.mxu1  ;;  %v3840_v15 = vshll.u32 %v7701_v42, 16  ;;  %v7737_v27 = vpop.f32.mrf.mxu0  ;;  %v4172_v17 = vrot.slane %v7142_v63, 5  ;;  %v3496_v0 = vshll.u32 %v5190_v16, 16 }
  0xfe   : > { %5757 = vmatmul.mubr.msk.bf16.gmra.mxu1 %vm687_vm3, %v9116_v22  ;;  %v7692_v22 = vrot.slane %v3789_v7, 4  ;;  %9123 = vst [vmem:[#allocation49_spill] sm:$0xff] %v7698_v39  ;;  %v7713_v7 = vld [vmem:[%s6045_s25 + $0xd0] sm:$0xf]  ;;  %v9125_v39 = vshll.u32 %v7139_v4, 16  ;;  %v3492_v19 = vrot.slane %v9126_v50, 4 }
  0xff   : > { %5760 = vmatprep.mubr.msk.bf16.mxu1 %vm687_vm3, %v9118_v3  ;;  %v3479_v3 = vrot.slane %v9124_v26, 4  ;;  %9127 = vst [vmem:[#allocation50_spill] sm:$0xff] %v7725_v47  ;;  %v5193_v26 = vld [vmem:[%s6045_s25 + $0x2c] sm:$0x1]  ;;  %9129 = vst [vmem:[#allocation51_spill] sm:$0xff] %v7737_v27  ;;  %v3846_v27 = vshll.u32 %v7713_v7, 16 }
 0x100   : > { %9120 = vst [vmem:[#allocation46_spill] sm:$0xff] %v7692_v22  ;;  %v3482_v58 = vrot.slane %v9125_v39, 5  ;;  %v9128_v39 = vcombine.low %v7444_v48, %v7451_v21  ;;  %v9130_v22 = vcombine.low %v7495_v33, %v7498_v53  ;;  %v3534_v50 = vshll.u32 %v7200_v61, 16 }
 0x101   : > { %v3493_v21 = vor.u32 %v3492_v19, %v7721_v45  ;;  %v3520_v63 = vshll.u32 %v5193_v26, 16  ;;  %v9132_v33 = vcombine.low %v7484_v1, %v7488_v56  ;;  %v7761_v48 = vrot.slane %v3840_v15, 5 }
 0x102   : > { %5795 = vmatmul.mubr.msk.bf16.gmra.mxu0 %vm687_vm3, %v9128_v39  ;;  %v7750_v39 = vrot.slane %v3837_v46, 4  ;;  %v3483_v47 = vor.u32 %v3482_v58, %v3479_v3  ;;  %v3850_v46 = vshrl.u32 %v7713_v7, 16  ;;  %v4175_v53 = vrot.slane %v5190_v16, 5  ;;  %v7769_v3 = vpop.f32.mrf.mxu0  ;;  %v5196_v16 = vld [vmem:[%s6045_s25 + $0x38] sm:$0x1] }
 0x103   : > { %5798 = vmatprep.mubr.msk.bf16.mxu0 %vm687_vm3, %v9130_v22  ;;  %v7759_v22 = vpop.f32.mrf.mxu1  ;;  %9134 = vst [vmem:[#allocation54_spill] sm:$0xff] %v7761_v48  ;;  %v9135_v58 = vcombine.low %v7543_v37, %v7547_v10  ;;  %9136 = vst [vmem:[#allocation55_spill] sm:$0xff] %v7769_v3  ;;  %v4174_v1 = vrot.slane %v4172_v17, 4  ;;  %v4182_v56 = vrot.slane %v5193_v26, 5  ;;  %v9138_v15 = vshll.u32 %v7197_v14, 16 }
 0x104   : > { %9131 = vst [vmem:[#allocation52_spill] sm:$0xff] %v7750_v39  ;;  %9133 = vst [vmem:[#allocation53_spill] sm:$0xff] %v7759_v22  ;;  %v5303_v39 = vrot.slane %v7139_v4, 9  ;;  %v7775_v48 = vrot.slane %v3846_v27, 5  ;;  %v7779_v51 = vrot.slane %v3534_v50, 5  ;;  %v9140_v10 = vshrl.u32 %v7200_v61, 16 }
 0x105   : > { %v3530_v22 = vrot.slane %v9138_v15, 5  ;;  %v3494_v3 = vrot.slane %v3493_v21, 4  ;;  %v3498_v30 = vrot.slane %v3496_v0, 5  ;;  %v3522_v26 = vrot.slane %v3520_v63, 5  ;;  %v9144_v15 = vld [vmem:[#allocation8_spill] sm:$0xff] }
 0x106   : > { %5761 = vmatmul.mubr.msk.bf16.gmra.mxu1 %vm687_vm3, %v9132_v33  ;;  %v9137_v33 = vshrl.u32 %v7197_v14, 16  ;;  %9139 = vst [vmem:[#allocation56_spill] sm:$0xff] %v7775_v48  ;;  %v3540_v37 = vrot.slane %v9140_v10, 4  ;;  %v7788_v23 = vrot.slane %v3850_v46, 4  ;;  %v7792_v27 = vsel %vm6375_vm7, %v5303_v39, %v4172_v17  ;;  %v9155_v48 = vld [vmem:[#allocation12_spill] sm:$0xff] }
 0x107   : > { %5764 = vmatprep.mubr.msk.bf16.mxu1 %vm687_vm3, %v9135_v58  ;;  %v3484_v58 = vrot.slane %v3483_v47, 4  ;;  %v9143_v50 = vrot.slane %v7151_v40, 5  ;;  %v9145_v4 = vrot.slane %v9144_v15, 9  ;;  %v4186_v21 = vrot.slane %v7200_v61, 5  ;;  %v9147_v40 = vld [vmem:[#allocation14_spill] sm:$0xff]  ;;  %v9150_v15 = vld [vmem:[#allocation11_spill] sm:$0xff] }
 0x108   : > { %v3527_v19 = vrot.slane %v9137_v33, 4  ;;  %v7786_v33 = vpop.f32.mrf.mxu1  ;;  %9142 = vst [vmem:[#allocation58_spill] sm:$0xff] %v7788_v23  ;;  %v9146_v0 = vcombine.low %v7528_v44, %v7533_v55  ;;  %v7807_v63 = vpop.f32.mrf.mxu0  ;;  %v7811_v17 = vsel %vm6375_vm7, %v4174_v1, %v4175_v53  ;;  %v7816_v39 = vsel %vm6375_vm7, %v9147_v40, %v4182_v56  ;;  %v9152_v53 = vld [vmem:[#allocation25_spill] sm:$0xff] }
 0x109   : > { %9141 = vst [vmem:[#allocation57_spill] sm:$0xff] %v7786_v33  ;;  %v7800_v47 = vsel %vm6375_vm7, %v9145_v4, %v9143_v50  ;;  %v3544_v4 = vshll.u32 %v5196_v16, 16  ;;  %v9148_v61 = vcombine.low %v7604_v18, %v7630_v8  ;;  %v3541_v10 = vor.u32 %v3540_v37, %v7779_v51  ;;  %v9149_v50 = vld [vmem:[#allocation6_spill] sm:$0xff]  ;;  %v9151_v33 = vld [vmem:[#allocation3_spill] sm:$0xff]  ;;  %v9154_v40 = vld [vmem:[#allocation9_spill] sm:$0xff] }
 0x10a   : > { %5799 = vmatmul.mubr.msk.bf16.gmra.mxu0 %vm687_vm3, %v9146_v0  ;;  %v3531_v46 = vor.u32 %v3530_v22, %v3527_v19  ;;  %v3555_v0 = vor.u32 %v9150_v15, %v9149_v50  ;;  %v3565_v1 = vor.u32 %v9152_v53, %v9151_v33  ;;  %v3568_v23 = vshll.u32 %v7784_v41, 16 }
 0x10b   : > { %5802 = vmatprep.mubr.msk.bf16.mxu0 %vm687_vm3, %v9148_v61  ;;  %v3489_v22 = vsel %vm6090_vm4, %v3484_v58, %v7721_v45  ;;  %v3499_v19 = vsel %vm6090_vm4, %v3494_v3, %v3498_v30  ;;  %v3513_v37 = vsel %vm6090_vm4, %v9155_v48, %v9154_v40  ;;  %v9156_v61 = vld [vmem:[#allocation10_spill] sm:$0xff]  ;;  %v9157_v15 = vcombine.low %v7586_v9, %v7613_v57  ;;  %v7852_v40 = vpop.f32.mrf.mxu0 }
 0x10c   : > { %v3523_v50 = vsel %vm6090_vm4, %v9156_v61, %v3522_v26  ;;  %v5305_v45 = vrot.slane %v7197_v14, 9  ;;  %v4188_v58 = vrot.slane %v4186_v21, 4  ;;  %v4189_v30 = vrot.slane %v5196_v16, 5  ;;  %9160 = vst [vmem:[#allocation14_spill] sm:$0xff] %v7852_v40 }
 0x10d   : > { %v7844_v53 = vpop.f32.mrf.mxu1  ;;  %v3582_v3 = vshll.u32 %v7288_v11, 16  ;;  %v9159_v48 = vcombine.low %v7627_v36, %v7649_v20  ;;  %v3532_v26 = vrot.slane %v3531_v46, 4  ;;  %v3546_v14 = vrot.slane %v3544_v4, 5  ;;  %v7877_v4 = vld [vmem:[%s6045_s25 + $0x50] sm:$0x1] }
 0x10e   : > { %5765 = vmatmul.mubr.msk.bf16.gmra.mxu1 %vm687_vm3, %v9157_v15  ;;  %9158 = vst [vmem:[#allocation8_spill] sm:$0xff] %v7844_v53  ;;  %v3542_v61 = vrot.slane %v3541_v10, 4  ;;  %v3556_v16 = vrot.slane %v3555_v0, 4  ;;  %v3566_v15 = vrot.slane %v3565_v1, 4  ;;  %v3570_v53 = vrot.slane %v3568_v23, 5 }
 0x10f   : > { %5768 = vmatprep.mubr.msk.bf16.mxu1 %vm687_vm3, %v9159_v48  ;;  %v7858_v44 = vcombine.low %v3489_v22, %v3499_v19  ;;  %v7860_v36 = vcombine.low %v3513_v37, %v3523_v50  ;;  %v9161_v20 = vshrl.u32 %v7278_v12, 16  ;;  %v9162_v55 = vshll.u32 %v7278_v12, 16  ;;  %v7866_v40 = vpop.f32.mrf.mxu1  ;;  %v7887_v22 = vpop.f32.mrf.mxu0 }
 0x110   : > { %9163 = vst [vmem:[#allocation6_spill] sm:$0xff] %v7866_v40  ;;  %v7870_v46 = vsel %vm6375_vm7, %v5305_v45, %v4186_v21  ;;  %v7874_v23 = vsel %vm6375_vm7, %v4188_v58, %v4189_v30  ;;  %v7879_v10 = vrot.slane %v3582_v3, 5  ;;  %v9164_v0 = vshrl.u32 %v7288_v11, 16  ;;  %v7904_v3 = vld [vmem:[%s6045_s25 + $0x5c] sm:$0x1] }
 0x111   : > { %v3575_v48 = vrot.slane %v9161_v20, 4  ;;  %v3578_v9 = vrot.slane %v9162_v55, 5  ;;  %v9165_v55 = vcombine.low %v7621_v49, %v7633_v25  ;;  %v3537_v21 = vsel %vm6090_vm4, %v3532_v26, %v7779_v51  ;;  %v7962_v40 = vld [vmem:[%s6045_s25 + $0x74] sm:$0x1] }
 0x112   : > { %v3588_v1 = vrot.slane %v9164_v0, 4  ;;  %v9166_v19 = vrot.slane %v7239_v59, 5  ;;  %v9167_v37 = vrot.slane %v7231_v52, 9  ;;  %v4196_v30 = vrot.slane %v7784_v41, 5 }
 0x113   : > { %5803 = vmatmul.mubr.msk.bf16.gmra.mxu0 %vm687_vm3, %v9165_v55  ;;  %v9169_v20 = vcombine.low %v7681_v28, %v7684_v32  ;;  %v3547_v51 = vsel %vm6090_vm4, %v3542_v61, %v3546_v14  ;;  %v3561_v52 = vsel %vm6090_vm4, %v3556_v16, %v9151_v33  ;;  %v3571_v59 = vsel %vm6090_vm4, %v3566_v15, %v3570_v53  ;;  %v7926_v61 = vpop.f32.mrf.mxu1  ;;  %v9172_v53 = vld [vmem:[#allocation13_spill] sm:$0xff]  ;;  %v9173_v16 = vld [vmem:[#allocation4_spill] sm:$0xff] }
 0x114   : > { %v7898_v50 = vsel %vm6375_vm7, %v9167_v37, %v9166_v19  ;;  %v9168_v45 = vmov %v9166_v19  ;;  %v3630_v26 = vshll.u32 %v7359_v35, 16  ;;  %v3579_v0 = vor.u32 %v3578_v9, %v3575_v48  ;;  %9171 = vst [vmem:[#allocation11_spill] sm:$0xff] %v7926_v61  ;;  %v9174_v37 = vld [vmem:[#allocation7_spill] sm:$0xff]  ;;  %v7934_v48 = vpop.f32.mrf.mxu0 }
 0x115   : > { %v4195_v58 = vrot.slane %v9168_v45, 4  ;;  %5806 = vmatprep.mubr.msk.bf16.mxu0 %vm687_vm3, %v9169_v20  ;;  %v3592_v55 = vshll.u32 %v7877_v4, 16  ;;  %v4200_v19 = vrot.slane %v7288_v11, 5  ;;  %v9170_v14 = vcombine.low %v7537_v54, %v7562_v62  ;;  %v9175_v45 = vld [vmem:[#allocation5_spill] sm:$0xff] }
 0x116   : > { %v3589_v33 = vor.u32 %v3588_v1, %v7879_v10  ;;  %v3603_v15 = vor.u32 %v9173_v16, %v9172_v53  ;;  %v3613_v20 = vor.u32 %v9175_v45, %v9174_v37  ;;  %v3616_v9 = vshll.u32 %v7904_v3, 16 }
 0x117   : > { %5769 = vmatmul.mubr.msk.bf16.gmra.mxu1 %vm687_vm3, %v9170_v14  ;;  %v9176_v11 = vcombine.low %v7706_v60, %v7710_v34  ;;  %v7940_v54 = vcombine.low %v3537_v21, %v3547_v51  ;;  %v7942_v62 = vcombine.low %v3561_v52, %v3571_v59  ;;  %v7946_v1 = vsel %vm6375_vm7, %v4195_v58, %v4196_v30  ;;  %v5208_v30 = vld [vmem:[%s6045_s25 + $0x68] sm:$0x1] }
 0x118   : > { %v5307_v14 = vrot.slane %v7278_v12, 9  ;;  %v9177_v53 = vshrl.u32 %v7347_v43, 16  ;;  %v9178_v45 = vshll.u32 %v7347_v43, 16  ;;  %v7953_v60 = vrot.slane %v3630_v26, 5 }
 0x119   : > { %5772 = vmatprep.mubr.msk.bf16.mxu1 %vm687_vm3, %v9176_v11  ;;  %v9179_v34 = vshrl.u32 %v7359_v35, 16  ;;  %v3580_v51 = vrot.slane %v3579_v0, 4  ;;  %v3594_v52 = vrot.slane %v3592_v55, 5  ;;  %v4202_v59 = vrot.slane %v4200_v19, 4  ;;  %v7959_v11 = vpop.f32.mrf.mxu1 }
 0x11a   : > { %v3623_v16 = vrot.slane %v9177_v53, 4  ;;  %v3626_v41 = vrot.slane %v9178_v45, 5  ;;  %v4203_v58 = vrot.slane %v7877_v4, 5  ;;  %9180 = vst [vmem:[#allocation3_spill] sm:$0xff] %v7959_v11  ;;  %v3590_v12 = vrot.slane %v3589_v33, 4  ;;  %v7964_v45 = vpop.f32.mrf.mxu0 }
 0x11b   : > { %v3636_v21 = vrot.slane %v9179_v34, 4  ;;  %v3604_v57 = vrot.slane %v3603_v15, 4  ;;  %v3614_v61 = vrot.slane %v3613_v20, 4  ;;  %v3618_v53 = vrot.slane %v3616_v9, 5 }
 0x11c   : > { %v9181_v26 = vcombine.low %v7701_v42, %v7713_v7  ;;  %v7972_v0 = vsel %vm6375_vm7, %v5307_v14, %v4200_v19  ;;  %v9182_v4 = vrot.slane %v7304_v6, 5  ;;  %v4210_v33 = vrot.slane %v7904_v3, 5  ;;  %v7985_v14 = vpop.f32.mrf.mxu0 }
 0x11d   : > { %v4214_v15 = vrot.slane %v7359_v35, 5  ;;  %v9183_v20 = vcombine.low %v7792_v27, %v7811_v17  ;;  %v3627_v9 = vor.u32 %v3626_v41, %v3623_v16  ;;  %v3637_v34 = vor.u32 %v3636_v21, %v7953_v60  ;;  %v9186_v17 = vld [vmem:[#allocation15_spill] sm:$0xff]  ;;  %v9187_v41 = vld [vmem:[#allocation26_spill] sm:$0xff] }
 0x11e   : > { %5807 = vmatmul.mubr.msk.bf16.gmra.mxu0 %vm687_vm3, %v9181_v26  ;;  %v4209_v55 = vrot.slane %v9182_v4, 4  ;;  %v3640_v26 = vshll.u32 %v5208_v30, 16  ;;  %v3651_v19 = vor.u32 %v7429_v2, %v7427_v29  ;;  %v3585_v3 = vsel %vm6090_vm4, %v3580_v51, %v7879_v10  ;;  %v8001_v29 = vpop.f32.mrf.mxu1 }
 0x11f   : > { %5846 = vmatprep.mubr.msk.bf16.mxu0 %vm687_vm3, %v9183_v20  ;;  %v9184_v35 = vmov %v9182_v4  ;;  %v9185_v4 = vrot.slane %v7294_v24, 9  ;;  %v3661_v16 = vor.u32 %v9187_v41, %v9186_v17  ;;  %v3664_v21 = vshll.u32 %v7962_v40, 16  ;;  %9188 = vst [vmem:[#allocation25_spill] sm:$0xff] %v8001_v29  ;;  %v8018_v20 = vpop.f32.mrf.mxu0 }
 0x120   : > { %v9189_v2 = vcombine.low %v7609_v13, %v7639_v38  ;;  %v3595_v6 = vsel %vm6090_vm4, %v3590_v12, %v3594_v52  ;;  %v8011_v24 = vsel %vm6375_vm7, %v4202_v59, %v4203_v58  ;;  %v3609_v10 = vsel %vm6090_vm4, %v3604_v57, %v9174_v37  ;;  %v8027_v58 = vpop.f32.mrf.mxu1 }
 0x121   : > { %v7996_v27 = vsel %vm6375_vm7, %v9185_v4, %v9184_v35  ;;  %v3619_v51 = vsel %vm6090_vm4, %v3614_v61, %v3618_v53  ;;  %v8024_v13 = vsel %vm6375_vm7, %v4209_v55, %v4210_v33  ;;  %v5309_v38 = vrot.slane %v7347_v43, 9  ;;  %9190 = vst [vmem:[#allocation2_spill] sm:$0xff] %v8027_v58  ;;  %v8029_v61 = vpop.f32.mrf.mxu0  ;;  %v9273_v56 = vld [vmem:[#allocation3_spill] sm:$0xff] }
 0x122   : > { %5773 = vmatmul.mubr.msk.bf16.gmra.mxu1 %vm687_vm3, %v9189_v2  ;;  %v4216_v52 = vrot.slane %v4214_v15, 4  ;;  %v4217_v59 = vrot.slane %v5208_v30, 5  ;;  %v3628_v12 = vrot.slane %v3627_v9, 4  ;;  %v3638_v57 = vrot.slane %v3637_v34, 4  ;;  %v8034_v33 = vpop.f32.mrf.mxu1  ;;  %v9193_v34 = vld [vmem:[#allocation18_spill] sm:$0xff] }
 0x123   : > { %5812 = vmatprep.mubr.msk.bf16.mxu1 %vm687_vm3, %v7858_v44  ;;  %v3642_v37 = vrot.slane %v3640_v26, 5  ;;  %v3652_v35 = vrot.slane %v3651_v19, 4  ;;  %v3662_v53 = vrot.slane %v3661_v16, 4  ;;  %v3666_v4 = vrot.slane %v3664_v21, 5  ;;  %9192 = vst [vmem:[#allocation9_spill] sm:$0xff] %v8034_v33  ;;  %v5644_v19 = vpop.f32.mrf.mxu0 }
 0x124   : > { %v9191_v44 = vrot.slane %v7376_v5, 5  ;;  %v4224_v55 = vrot.slane %v7962_v40, 5  ;;  %v5322_v43 = vcombine.low %v7898_v50, %v7946_v1  ;;  %v8038_v30 = vcombine.low %v3585_v3, %v3595_v6  ;;  %v9195_v1 = vld [vmem:[#allocation16_spill] sm:$0xff]  ;;  %v8059_v6 = vpop.f32.mrf.mxu1 }
 0x125   : > { %v5323_v9 = vcombine.low %v7972_v0, %v8011_v24  ;;  %v3678_v26 = vshll.u32 %v9193_v34, 16  ;;  %v9194_v16 = vcombine.low %v7800_v47, %v7816_v39  ;;  %v8049_v40 = vsel %vm6375_vm7, %v5309_v38, %v4214_v15  ;;  %9198 = vst [vmem:[#allocation12_spill] sm:$0xff] %v8059_v6 }
 0x126   : > { %v4223_v41 = vrot.slane %v9191_v44, 4  ;;  %v8053_v50 = vsel %vm6375_vm7, %v4216_v52, %v4217_v59  ;;  %v9196_v3 = vshrl.u32 %v9195_v1, 16  ;;  %v9197_v0 = vshll.u32 %v9195_v1, 16  ;;  %v5214_v52 = vld [vmem:[%s6045_s25 + $0x80] sm:$0x1]  ;;  %v1459_v59 = vpop.f32.mrf.mxu0 }
 0x127   : > { %5847 = vmatmul.mubr.msk.bf16.vlgmr.msra.gmra.mxu0 %vm687_vm3, %v9194_v16  ;;  %v9199_v47 = vcombine.low %v7870_v46, %v7874_v23  ;;  %v8065_v39 = vcombine.low %v3609_v10, %v3619_v51  ;;  %v3633_v24 = vsel %vm6090_vm4, %v3628_v12, %v7953_v60  ;;  %v3643_v38 = vsel %vm6090_vm4, %v3638_v57, %v3642_v37  ;;  %v9201_v51 = vld [vmem:[#allocation17_spill] sm:$0xff]  ;;  %v5610_v12 = vpop.f32.mrf.mxu1 }
 0x128   : > { %v3671_v21 = vrot.slane %v9196_v3, 4  ;;  %v3674_v2 = vrot.slane %v9197_v0, 5  ;;  %v3657_v46 = vsel %vm6090_vm4, %v3652_v35, %v9186_v17  ;;  %v3667_v23 = vsel %vm6090_vm4, %v3662_v53, %v3666_v4  ;;  %v8102_v53 = vld [vmem:[%s6045_s25 + $0x8c] sm:$0x1] }
 0x129   : > { %5850 = vmatprep.mubr.msk.bf16.mxu0 %vm687_vm3, %v9199_v47  ;;  %v9200_v10 = vmov %v9191_v44  ;;  %v9202_v44 = vrot.slane %v9201_v51, 9  ;;  %v8090_v60 = vsel %vm6375_vm7, %v4223_v41, %v4224_v55  ;;  %v8096_v57 = vrot.slane %v3678_v26, 5  ;;  %v9204_v4 = vld [vmem:[#allocation27_spill] sm:$0xff]  ;;  %v5645_v41 = vpop.f32.mrf.mxu0  ;;  %v1066_v47 = vpop.f32.mrf.mxu1  ;;  %v9205_v51 = vld [vmem:[#allocation28_spill] sm:$0xff] }
 0x12a   : > { %5813 = vmatmul.mubr.msk.bf16.vlgmr.msra.gmra.mxu1 %vm687_vm3, %v7860_v36  ;;  %v9203_v5 = vshrl.u32 %v9193_v34, 16  ;;  %v4228_v35 = vrot.slane %v9193_v34, 5  ;;  %v1075_v3 = vadd.f32 %v5610_v12, %v9204_v4  ;;  %v8107_v55 = vcombine.low %v3633_v24, %v3643_v38  ;;  %v9208_v4 = vld [vmem:[#allocation34_spill] sm:$0xff]  ;;  %v9209_v24 = vld [vmem:[#allocation21_spill] sm:$0xff] }
 0x12b   : > { %v8086_v16 = vsel %vm6375_vm7, %v9202_v44, %v9200_v10  ;;  %5816 = vmatprep.mubr.msk.bf16.mxu1 %vm687_vm3, %v7940_v54  ;;  %v3675_v36 = vor.u32 %v3674_v2, %v3671_v21  ;;  %v3688_v0 = vshll.u32 %v5214_v52, 16  ;;  %v8109_v26 = vcombine.low %v3657_v46, %v3667_v23  ;;  %v9206_v44 = vld [vmem:[#allocation29_spill] sm:$0xff]  ;;  %v1462_v54 = vpop.f32.mrf.mxu0  ;;  %v5611_v46 = vpop.f32.mrf.mxu1 }
 0x12c   : > { %v3684_v37 = vrot.slane %v9203_v5, 4  ;;  %v5311_v34 = vrot.slane %v9195_v1, 9  ;;  %v3699_v5 = vor.u32 %v9206_v44, %v9205_v51  ;;  %v8116_v12 = vadd.f32 %v5644_v19, %v1075_v3  ;;  %v9210_v38 = vld [vmem:[#allocation33_spill] sm:$0xff]  ;;  %v9211_v1 = vld [vmem:[#allocation31_spill] sm:$0xff] }
 0x12d   : > { %v1067_v17 = vadd.f32 %v1066_v47, %v9208_v4  ;;  %v3709_v21 = vor.u32 %v9210_v38, %v9209_v24  ;;  %v3712_v2 = vshll.u32 %v8102_v53, 16  ;;  %v4230_v10 = vrot.slane %v4228_v35, 4  ;;  %v9213_v19 = vld [vmem:[#allocation37_spill] sm:$0xff]  ;;  %v5648_v51 = vpop.f32.mrf.mxu0  ;;  %v1069_v4 = vpop.f32.mrf.mxu1 }
 0x12e   : > { %9207 = vst [vmem:[#allocation10_spill] sm:$0xff] %v8116_v12  ;;  %v3685_v23 = vor.u32 %v3684_v37, %v8096_v57  ;;  %v4231_v15 = vrot.slane %v5214_v52, 5  ;;  %v3726_v6 = vshll.u32 %v9211_v1, 16  ;;  %v1078_v3 = vadd.f32 %v5611_v46, %v9213_v19 }
 0x12f   : > { %v8124_v33 = vadd.f32 %v1459_v59, %v1067_v17  ;;  %5851 = vmatmul.mubr.msk.bf16.gmra.mxu0 %vm687_vm3, %v5322_v43  ;;  %v8128_v47 = vrot.slane %v3675_v36, 4  ;;  %v8130_v44 = vrot.slane %v3688_v0, 5  ;;  %v8135_v37 = vsel %vm6375_vm7, %v5311_v34, %v4228_v35  ;;  %v8140_v59 = vld [vmem:[%s6045_s25 + $0x98] sm:$0x1]  ;;  %v9214_v17 = vld [vmem:[#allocation30_spill] sm:$0xff]  ;;  %v1475_v12 = vpop.f32.mrf.mxu0  ;;  %v5614_v35 = vpop.f32.mrf.mxu1 }
 0x130   : > { %5854 = vmatprep.mubr.msk.bf16.mxu0 %vm687_vm3, %v5323_v9  ;;  %v8137_v52 = vrot.slane %v3699_v5, 4  ;;  %v9215_v38 = vshrl.u32 %v9214_v17, 16  ;;  %v9216_v43 = vshll.u32 %v9214_v17, 16  ;;  %v8146_v19 = vadd.f32 %v5645_v41, %v1078_v3  ;;  %v9218_v0 = vld [vmem:[#allocation38_spill] sm:$0xff] }
 0x131   : > { %9212 = vst [vmem:[#allocation13_spill] sm:$0xff] %v8124_v33  ;;  %v1070_v33 = vadd.f32 %v1069_v4, %v9218_v0  ;;  %v8149_v9 = vrot.slane %v3709_v21, 4  ;;  %v8151_v58 = vrot.slane %v3712_v2, 5  ;;  %v3686_v34 = vrot.slane %v3685_v23, 4  ;;  %v9221_v21 = vld [vmem:[#allocation43_spill] sm:$0xff]  ;;  %v5649_v2 = vpop.f32.mrf.mxu0 }
 0x132   : > { %v3719_v46 = vrot.slane %v9215_v38, 4  ;;  %v3722_v36 = vrot.slane %v9216_v43, 5  ;;  %9217 = vst [vmem:[#allocation4_spill] sm:$0xff] %v8146_v19  ;;  %5817 = vmatmul.mubr.msk.bf16.gmra.mxu1 %vm687_vm3, %v7942_v62  ;;  %v8157_v5 = vsel %vm6375_vm7, %v4230_v10, %v4231_v15  ;;  %v8159_v38 = vrot.slane %v3726_v6, 5  ;;  %v1082_v6 = vpop.f32.mrf.mxu1  ;;  %v9222_v10 = vld [vmem:[#allocation20_spill] sm:$0xff]  ;;  %v9224_v23 = vld [vmem:[#allocation19_spill] sm:$0xff] }
 0x133   : > { %v9219_v41 = vshrl.u32 %v9211_v1, 16  ;;  %v8163_v4 = vadd.f32 %v1462_v54, %v1070_v33  ;;  %v1091_v43 = vadd.f32 %v5614_v35, %v9221_v21  ;;  %5820 = vmatprep.mubr.msk.bf16.mxu1 %vm687_vm3, %v8038_v30  ;;  %v3681_v62 = vsel %vm6090_vm4, %v8128_v47, %v8096_v57 }
 0x134   : > { %v3736_v15 = vshll.u32 %v8140_v59, 16  ;;  %v9223_v54 = vrot.slane %v9222_v10, 5  ;;  %v9225_v0 = vrot.slane %v9224_v23, 9  ;;  %v3723_v35 = vor.u32 %v3722_v36, %v3719_v46  ;;  %v5615_v11 = vpop.f32.mrf.mxu1  ;;  %v8203_v36 = vld [vmem:[%s6045_s25 + $0xa4] sm:$0x1]  ;;  %v9232_v10 = vld [vmem:[#allocation23_spill] sm:$0xff] }
 0x135   : > { %v3732_v3 = vrot.slane %v9219_v41, 4  ;;  %9220 = vst [vmem:[#allocation7_spill] sm:$0xff] %v8163_v4  ;;  %v4242_v57 = vrot.slane %v9211_v1, 5  ;;  %v8186_v47 = vadd.f32 %v5648_v51, %v1091_v43  ;;  %v9226_v41 = vld [vmem:[#allocation45_spill] sm:$0xff]  ;;  %v1478_v4 = vpop.f32.mrf.mxu0  ;;  %v5327_v19 = vcombine.low %v8135_v37, %v8157_v5  ;;  %v9228_v5 = vld [vmem:[#allocation51_spill] sm:$0xff] }
 0x136   : > { %v8183_v30 = vsel %vm6375_vm7, %v9225_v0, %v9223_v54  ;;  %v1083_v21 = vadd.f32 %v1082_v6, %v9226_v41  ;;  %v9227_v33 = vmov %v9223_v54  ;;  %v3691_v54 = vsel %vm6090_vm4, %v3686_v34, %v8130_v44  ;;  %v9234_v41 = vld [vmem:[#allocation40_spill] sm:$0xff] }
 0x137   : > { %v4237_v29 = vrot.slane %v9227_v33, 4  ;;  %v3715_v1 = vsel %vm6090_vm4, %v8149_v9, %v8151_v58  ;;  %v4238_v51 = vrot.slane %v8102_v53, 5  ;;  %v3733_v46 = vor.u32 %v3732_v3, %v8159_v38  ;;  %v5652_v6 = vpop.f32.mrf.mxu0  ;;  %v1085_v58 = vpop.f32.mrf.mxu1 }
 0x138   : > { %v8205_v37 = vadd.f32 %v1475_v12, %v1083_v21  ;;  %v1094_v43 = vadd.f32 %v5615_v11, %v9228_v5  ;;  %v9229_v33 = vcombine.low %v7996_v27, %v8024_v13  ;;  %v3738_v44 = vrot.slane %v3736_v15, 5  ;;  %v9231_v11 = vld [vmem:[#allocation39_spill] sm:$0xff] }
 0x139   : > { %v5313_v34 = vrot.slane %v9214_v17, 9  ;;  %v9230_v53 = vcombine.low %v8049_v40, %v8053_v50  ;;  %v3724_v9 = vrot.slane %v3723_v35, 4  ;;  %v4244_v12 = vrot.slane %v4242_v57, 4  ;;  %v9233_v27 = vld [vmem:[#allocation55_spill] sm:$0xff]  ;;  %v1491_v15 = vpop.f32.mrf.mxu0  ;;  %v9235_v17 = vld [vmem:[#allocation41_spill] sm:$0xff]  ;;  %v5618_v40 = vpop.f32.mrf.mxu1 }
 0x13a   : > { %5855 = vmatmul.mubr.msk.bf16.gmra.mxu0 %vm687_vm3, %v9229_v33  ;;  %v4245_v3 = vrot.slane %v8140_v59, 5  ;;  %v3747_v23 = vor.u32 %v9232_v10, %v9231_v11  ;;  %v8220_v0 = vadd.f32 %v5649_v2, %v1094_v43  ;;  %v1086_v13 = vadd.f32 %v1085_v58, %v9233_v27  ;;  %5821 = vmatmul.mubr.msk.bf16.gmra.mxu1 %vm687_vm3, %v8065_v39 }
 0x13b   : > { %5858 = vmatprep.mubr.msk.bf16.mxu0 %vm687_vm3, %v9230_v53  ;;  %v3757_v21 = vor.u32 %v9235_v17, %v9234_v41  ;;  %v3760_v5 = vshll.u32 %v8203_v36, 16  ;;  %v3734_v50 = vrot.slane %v3733_v46, 4  ;;  %v9236_v59 = vshrl.u32 %v7604_v18, 16  ;;  %v5653_v11 = vpop.f32.mrf.mxu0  ;;  %5824 = vmatprep.mubr.msk.bf16.mxu1 %vm687_vm3, %v8107_v55  ;;  %v1098_v46 = vpop.f32.mrf.mxu1 }
 0x13c   : > { %v9237_v33 = vshll.u32 %v7604_v18, 16  ;;  %v3774_v43 = vshll.u32 %v7630_v8, 16  ;;  %v8233_v58 = vadd.f32 %v1478_v4, %v1086_v13  ;;  %v1107_v53 = vadd.f32 %v5618_v40, %v7807_v63 }
 0x13d   : > { %v3767_v35 = vrot.slane %v9236_v59, 4  ;;  %v5278_v10 = vcombine.low %v3681_v62, %v3691_v54  ;;  %v8240_v39 = vsel %vm6375_vm7, %v4237_v29, %v4238_v51  ;;  %v3729_v27 = vsel %vm6090_vm4, %v3724_v9, %v8159_v38  ;;  %v9238_v62 = vld [vmem:[#allocation14_spill] sm:$0xff]  ;;  %v1494_v54 = vpop.f32.mrf.mxu0  ;;  %v5619_v40 = vpop.f32.mrf.mxu1 }
 0x13e   : > { %v3770_v2 = vrot.slane %v9237_v33, 5  ;;  %v8247_v4 = vsel %vm6375_vm7, %v5313_v34, %v4242_v57  ;;  %v8251_v63 = vsel %vm6375_vm7, %v4244_v12, %v4245_v3  ;;  %v3748_v13 = vrot.slane %v3747_v23, 4 }
 0x13f   : > { %v8253_v55 = vadd.f32 %v5652_v6, %v1107_v53  ;;  %v1099_v29 = vadd.f32 %v1098_v46, %v9238_v62  ;;  %v3758_v51 = vrot.slane %v3757_v21, 4  ;;  %v3762_v17 = vrot.slane %v3760_v5, 5  ;;  %v5656_v23 = vpop.f32.mrf.mxu0  ;;  %v9241_v21 = vld [vmem:[#allocation35_spill] sm:$0xff] }
 0x140   : > { %v3739_v38 = vsel %vm6090_vm4, %v3734_v50, %v3738_v44  ;;  %v3771_v9 = vor.u32 %v3770_v2, %v3767_v35  ;;  %v8258_v57 = vrot.slane %v3774_v43, 5  ;;  %v9239_v34 = vshrl.u32 %v7630_v8, 16  ;;  %v5226_v50 = vld [vmem:[%s6045_s25 + $0xb0] sm:$0x1]  ;;  %v1101_v35 = vpop.f32.mrf.mxu1 }
 0x141   : > { %v8262_v3 = vadd.f32 %v1491_v15, %v1099_v29  ;;  %v1110_v6 = vadd.f32 %v5619_v40, %v7887_v22  ;;  %v9240_v59 = vcombine.low %v8086_v16, %v8090_v60  ;;  %v9242_v5 = vrot.slane %v9241_v21, 5  ;;  %v1507_v43 = vpop.f32.mrf.mxu0  ;;  %v9247_v29 = vld [vmem:[#allocation46_spill] sm:$0xff] }
 0x142   : > { %v3780_v12 = vrot.slane %v9239_v34, 4  ;;  %v4252_v44 = vrot.slane %v8203_v36, 5  ;;  %v9243_v22 = vsel %vm6090_vm4, %v8137_v52, %v9209_v24  ;;  %v5328_v16 = vcombine.low %v8183_v30, %v8240_v39  ;;  %v5622_v52 = vpop.f32.mrf.mxu1  ;;  %5825 = vmatmul.mubr.msk.bf16.gmra.mxu1 %vm687_vm3, %v8109_v26 }
 0x143   : > { %5859 = vmatmul.mubr.msk.bf16.gmra.mxu0 %vm687_vm3, %v9240_v59  ;;  %v4251_v33 = vrot.slane %v9242_v5, 4  ;;  %v5279_v15 = vcombine.low %v9243_v22, %v3715_v1  ;;  %v5329_v60 = vcombine.low %v8247_v4, %v8251_v63  ;;  %v3753_v36 = vsel %vm6090_vm4, %v3748_v13, %v9234_v41  ;;  %v5657_v46 = vpop.f32.mrf.mxu0  ;;  %5828 = vmatprep.mubr.msk.bf16.mxu1 %vm687_vm3, %v5278_v10 }
 0x144   : > { %5862 = vmatprep.mubr.msk.bf16.mxu0 %vm687_vm3, %v5327_v19  ;;  %v8286_v2 = vadd.f32 %v5653_v11, %v1110_v6  ;;  %v1102_v19 = vadd.f32 %v1101_v35, %v7934_v48  ;;  %v3763_v53 = vsel %vm6090_vm4, %v3758_v51, %v3762_v17  ;;  %v4256_v24 = vrot.slane %v7630_v8, 5  ;;  %v9245_v8 = vld [vmem:[#allocation24_spill] sm:$0xff]  ;;  %v1114_v13 = vpop.f32.mrf.mxu1 }
 0x145   : > { %v5280_v30 = vcombine.low %v3729_v27, %v3739_v38  ;;  %v8294_v1 = vrot.slane %v3771_v9, 4  ;;  %v3781_v39 = vor.u32 %v3780_v12, %v8258_v57  ;;  %v3784_v41 = vshll.u32 %v5226_v50, 16  ;;  %v1510_v38 = vpop.f32.mrf.mxu0 }
 0x146   : > { %v8297_v11 = vadd.f32 %v1494_v54, %v1102_v19  ;;  %v1123_v48 = vadd.f32 %v5622_v52, %v7964_v45  ;;  %v9244_v4 = vmov %v9242_v5  ;;  %v9246_v63 = vrot.slane %v9245_v8, 9  ;;  %v9248_v54 = vld [vmem:[#allocation47_spill] sm:$0xff]  ;;  %v5623_v12 = vpop.f32.mrf.mxu1  ;;  %v9253_v8 = vld [vmem:[#allocation49_spill] sm:$0xff] }
 0x147   : > { %v8311_v27 = vsel %vm6375_vm7, %v4251_v33, %v4252_v44  ;;  %v8313_v62 = vcombine.low %v3753_v36, %v3763_v53  ;;  %v5315_v45 = vrot.slane %v7604_v18, 9  ;;  %v3795_v10 = vor.u32 %v9248_v54, %v9247_v29  ;;  %v5229_v33 = vld [vmem:[%s6045_s25 + $0xbc] sm:$0x1] }
 0x148   : > { %v8307_v26 = vsel %vm6375_vm7, %v9246_v63, %v9244_v4  ;;  %v3822_v51 = vshll.u32 %v7684_v32, 16  ;;  %v8319_v17 = vadd.f32 %v5656_v23, %v1123_v48  ;;  %v1115_v40 = vadd.f32 %v1114_v13, %v7985_v14  ;;  %v5660_v14 = vpop.f32.mrf.mxu0  ;;  %v1117_v36 = vpop.f32.mrf.mxu1  ;;  %v9252_v4 = vld [vmem:[#allocation48_spill] sm:$0xff] }
 0x149   : > { %v4258_v9 = vrot.slane %v4256_v24, 4  ;;  %v4259_v34 = vrot.slane %v5226_v50, 5  ;;  %v5330_v6 = vcombine.low %v8307_v26, %v8311_v27  ;;  %v3777_v18 = vsel %vm6090_vm4, %v8294_v1, %v8258_v57  ;;  %v9255_v13 = vld [vmem:[#allocation32_spill] sm:$0xff] }
 0x14a   : > { %v3782_v59 = vrot.slane %v3781_v39, 4  ;;  %v3786_v21 = vrot.slane %v3784_v41, 5  ;;  %v8328_v5 = vadd.f32 %v1507_v43, %v1115_v40  ;;  %v1126_v23 = vadd.f32 %v5623_v12, %v8018_v20  ;;  %v1523_v1 = vpop.f32.mrf.mxu0  ;;  %v5232_v41 = vld [vmem:[%s6045_s25 + $0xc8] sm:$0x1]  ;;  %v5626_v48 = vpop.f32.mrf.mxu1  ;;  %5829 = vmatmul.mubr.msk.bf16.gmra.mxu1 %vm687_vm3, %v5279_v15  ;;  %v9256_v12 = vld [vmem:[#allocation36_spill] sm:$0xff] }
 0x14b   : > { %5863 = vmatmul.mubr.msk.bf16.gmra.mxu0 %vm687_vm3, %v5328_v16  ;;  %v9249_v44 = vshrl.u32 %v7681_v28, 16  ;;  %v9250_v35 = vshll.u32 %v7681_v28, 16  ;;  %v4257_v57 = vsel %vm6375_vm7, %v5315_v45, %v4256_v24  ;;  %v8340_v19 = vrot.slane %v3795_v10, 4  ;;  %5832 = vmatprep.mubr.msk.bf16.mxu1 %vm687_vm3, %v5280_v30 }
 0x14c   : > { %5866 = vmatprep.mubr.msk.bf16.mxu0 %vm687_vm3, %v5329_v60  ;;  %v8342_v20 = vrot.slane %v3822_v51, 5  ;;  %v9251_v43 = vshrl.u32 %v7684_v32, 16  ;;  %v8346_v53 = vadd.f32 %v5657_v46, %v1126_v23  ;;  %v1118_v52 = vadd.f32 %v1117_v36, %v8029_v61  ;;  %v5661_v29 = vpop.f32.mrf.mxu0  ;;  %v1130_v15 = vpop.f32.mrf.mxu1 }
 0x14d   : > { %v3815_v50 = vrot.slane %v9249_v44, 4  ;;  %v3818_v22 = vrot.slane %v9250_v35, 5  ;;  %v4260_v39 = vsel %vm6375_vm7, %v4258_v9, %v4259_v34  ;;  %v4270_v60 = vrot.slane %v7684_v32, 5 }
 0x14e   : > { %v3828_v16 = vrot.slane %v9251_v43, 4  ;;  %v3787_v24 = vsel %vm6090_vm4, %v3782_v59, %v3786_v21  ;;  %v3805_v63 = vor.u32 %v9253_v8, %v9252_v4  ;;  %v3808_v46 = vshll.u32 %v5229_v33, 16  ;;  %v5627_v44 = vpop.f32.mrf.mxu1 }
 0x14f   : > { %v9254_v26 = vrot.slane %v7633_v25, 5  ;;  %v8360_v27 = vadd.f32 %v1510_v38, %v1118_v52  ;;  %v1139_v45 = vadd.f32 %v5626_v48, %v9255_v13  ;;  %v4266_v32 = vrot.slane %v5229_v33, 5  ;;  %v1526_v38 = vpop.f32.mrf.mxu0 }
 0x150   : > { %v3819_v54 = vor.u32 %v3818_v22, %v3815_v50  ;;  %v5331_v10 = vcombine.low %v4257_v57, %v4260_v39  ;;  %v3829_v51 = vor.u32 %v3828_v16, %v8342_v20  ;;  %v3832_v40 = vshll.u32 %v5232_v41, 16  ;;  %v1133_v39 = vpop.f32.mrf.mxu1 }
 0x151   : > { %v4265_v61 = vrot.slane %v9254_v26, 4  ;;  %v5317_v9 = vrot.slane %v7681_v28, 9  ;;  %v8366_v34 = vadd.f32 %v5660_v14, %v1139_v45  ;;  %v1131_v59 = vadd.f32 %v1130_v15, %v9256_v12  ;;  %v9259_v14 = vld [vmem:[#allocation22_spill] sm:$0xff]  ;;  %v5664_v43 = vpop.f32.mrf.mxu0  ;;  %v9263_v45 = vld [vmem:[#allocation56_spill] sm:$0xff] }
 0x152   : > { %v4272_v21 = vrot.slane %v4270_v60, 4  ;;  %v4273_v23 = vrot.slane %v5232_v41, 5  ;;  %v5282_v35 = vcombine.low %v3777_v18, %v3787_v24  ;;  %v3806_v30 = vrot.slane %v3805_v63, 4  ;;  %v5235_v41 = vld [vmem:[%s6045_s25 + $0xd4] sm:$0x1]  ;;  %5833 = vmatmul.mubr.msk.bf16.gmra.mxu1 %vm687_vm3, %v8313_v62 }
 0x153   : > { %v3810_v33 = vrot.slane %v3808_v46, 5  ;;  %v9257_v50 = vmov %v9254_v26  ;;  %v9258_v22 = vrot.slane %v7621_v49, 9  ;;  %v8375_v28 = vadd.f32 %v1523_v1, %v1131_v59  ;;  %5867 = vmatmul.mubr.msk.bf16.gmra.mxu0 %vm687_vm3, %v5330_v6  ;;  %v9260_v6 = vld [vmem:[#allocation42_spill] sm:$0xff]  ;;  %v1539_v8 = vpop.f32.mrf.mxu0  ;;  %v5630_v46 = vpop.f32.mrf.mxu1  ;;  %v9261_v26 = vld [vmem:[#allocation52_spill] sm:$0xff] }
 0x154   : > { %v1142_v57 = vadd.f32 %v5627_v44, %v9259_v14  ;;  %v4267_v18 = vsel %vm6375_vm7, %v4265_v61, %v4266_v32  ;;  %v3820_v16 = vrot.slane %v3819_v54, 4  ;;  %v4277_v52 = vrot.slane %v7713_v7, 5  ;;  %5870 = vmatprep.mubr.msk.bf16.mxu0 %vm687_vm3, %v5331_v10  ;;  %v9262_v61 = vld [vmem:[#allocation54_spill] sm:$0xff]  ;;  %5836 = vmatprep.mubr.msk.bf16.mxu1 %vm687_vm3, %v5282_v35 }
 0x155   : > { %v4264_v36 = vsel %vm6375_vm7, %v9258_v22, %v9257_v50  ;;  %v3801_v49 = vsel %vm6090_vm4, %v8340_v19, %v9252_v4  ;;  %v3830_v25 = vrot.slane %v3829_v51, 4  ;;  %v3834_v1 = vrot.slane %v3832_v40, 5  ;;  %v5665_v10 = vpop.f32.mrf.mxu0  ;;  %v1146_v40 = vpop.f32.mrf.mxu1 }
 0x156   : > { %v8388_v48 = vadd.f32 %v5661_v29, %v1142_v57  ;;  %v1134_v24 = vadd.f32 %v1133_v39, %v9260_v6  ;;  %v4271_v63 = vsel %vm6375_vm7, %v5317_v9, %v4270_v60  ;;  %v4274_v7 = vsel %vm6375_vm7, %v4272_v21, %v4273_v23  ;;  %v9264_v29 = vld [vmem:[#allocation58_spill] sm:$0xff]  ;;  %v9265_v60 = vld [vmem:[#allocation44_spill] sm:$0xff] }
 0x157   : > { %v3811_v19 = vsel %vm6090_vm4, %v3806_v30, %v3810_v33  ;;  %v5332_v4 = vcombine.low %v4264_v36, %v4267_v18  ;;  %v3843_v13 = vor.u32 %v9262_v61, %v9261_v26  ;;  %v3853_v32 = vor.u32 %v9264_v29, %v9263_v45  ;;  %v1542_v30 = vpop.f32.mrf.mxu0  ;;  %v5631_v33 = vpop.f32.mrf.mxu1  ;;  %v9271_v61 = vld [vmem:[#allocation6_spill] sm:$0xff] }
 0x158   : > { %v8403_v54 = vadd.f32 %v1526_v38, %v1134_v24  ;;  %v1155_v15 = vadd.f32 %v5630_v46, %v9265_v60  ;;  %v3825_v62 = vsel %vm6090_vm4, %v3820_v16, %v8342_v20  ;;  %v3856_v51 = vshll.u32 %v5235_v41, 16  ;;  %v9266_v38 = vld [vmem:[#allocation50_spill] sm:$0xff]  ;;  %v9267_v20 = vld [vmem:[#allocation53_spill] sm:$0xff] }
 0x159   : > { %v3835_v9 = vsel %vm6090_vm4, %v3830_v25, %v3834_v1  ;;  %v5333_v12 = vcombine.low %v4271_v63, %v4274_v7  ;;  %v4279_v59 = vrot.slane %v4277_v52, 4  ;;  %v4280_v21 = vrot.slane %v5235_v41, 5  ;;  %v5668_v57 = vpop.f32.mrf.mxu0  ;;  %v1149_v39 = vpop.f32.mrf.mxu1  ;;  %v9269_v41 = vld [vmem:[#allocation57_spill] sm:$0xff] }
 0x15a   : > { %v8412_v23 = vadd.f32 %v5664_v43, %v1155_v15  ;;  %v1147_v44 = vadd.f32 %v1146_v40, %v9266_v38  ;;  %v5283_v50 = vcombine.low %v3801_v49, %v3811_v19  ;;  %v3844_v35 = vrot.slane %v3843_v13, 4  ;;  %v9272_v15 = vld [vmem:[#allocation11_spill] sm:$0xff]  ;;  %v9274_v38 = vld [vmem:[#allocation25_spill] sm:$0xff] }
 0x15b   : > { %v3854_v22 = vrot.slane %v3853_v32, 4  ;;  %v1158_v14 = vadd.f32 %v5631_v33, %v9267_v20  ;;  %5871 = vmatmul.mubr.msk.bf16.gmra.mxu0 %vm687_vm3, %v5332_v4  ;;  %v5284_v18 = vcombine.low %v3825_v62, %v3835_v9  ;;  %v3858_v16 = vrot.slane %v3856_v51, 5  ;;  %v1555_v24 = vpop.f32.mrf.mxu0 }
 0x15c   : > { %v8415_v36 = vadd.f32 %v1539_v8, %v1147_v44  ;;  %5874 = vmatprep.mubr.msk.bf16.mxu0 %vm687_vm3, %v5333_v12  ;;  %v9268_v43 = vrot.slane %v7701_v42, 9  ;;  %v4281_v49 = vsel %vm6375_vm7, %v4279_v59, %v4280_v21  ;;  %v1150_v6 = vadd.f32 %v1149_v39, %v9269_v41  ;;  %v5634_v8 = vpop.f32.mrf.mxu1  ;;  %5837 = vmatmul.mubr.msk.bf16.gmra.mxu1 %vm687_vm3, %v5283_v50  ;;  %v9270_v42 = vld [vmem:[#allocation8_spill] sm:$0xff] }
 0x15d   : > { %v8426_v1 = vadd.f32 %v5665_v10, %v1158_v14  ;;  %v3849_v63 = vsel %vm6090_vm4, %v3844_v35, %v9263_v45  ;;  %v1171_v46 = vadd.f32 %v5634_v8, %v9270_v42  ;;  %5840 = vmatprep.mubr.msk.bf16.mxu1 %vm687_vm3, %v5284_v18  ;;  %v3859_v31 = vsel %vm6090_vm4, %v3854_v22, %v3858_v16  ;;  %v9275_v35 = vld [vmem:[#allocation2_spill] sm:$0xff]  ;;  %v9276_v18 = vld [vmem:[#allocation9_spill] sm:$0xff] }
 0x15e   : > { %v4278_v25 = vsel %vm6375_vm7, %v9268_v43, %v4277_v52  ;;  %v8433_v7 = vadd.f32 %v1542_v30, %v1150_v6  ;;  %v5669_v52 = vpop.f32.mrf.mxu0  ;;  %v1162_v4 = vpop.f32.mrf.mxu1  ;;  %v5285_v60 = vcombine.low %v3849_v63, %v3859_v31  ;;  %v9278_v63 = vld [vmem:[#allocation10_spill] sm:$0xff] }
 0x15f   : > { %v5334_v19 = vcombine.low %v4278_v25, %v4281_v49  ;;  %v8439_v26 = vadd.f32 %v5668_v57, %v1171_v46  ;;  %v1163_v13 = vadd.f32 %v1162_v4, %v9271_v61  ;;  %v9277_v49 = vld [vmem:[#allocation12_spill] sm:$0xff] }
 0x160   : > { %v1558_v29 = vpop.f32.mrf.mxu0  ;;  %v5635_v32 = vpop.f32.mrf.mxu1 }
 0x161   : > { %v8442_v45 = vadd.f32 %v1555_v24, %v1163_v13  ;;  %v1174_v10 = vadd.f32 %v5635_v32, %v9272_v15  ;;  %v9280_v32 = vld [vmem:[#allocation4_spill] sm:$0xff] }
 0x162   : > { %v5672_v62 = vpop.f32.mrf.mxu0  ;;  %v1165_v51 = vpop.f32.mrf.mxu1 }
 0x163   : > { %5875 = vmatmul.mubr.msk.bf16.gmra.mxu0 %vm687_vm3, %v5334_v19  ;;  %v8446_v40 = vadd.f32 %v5669_v52, %v1174_v10  ;;  %v1166_v9 = vadd.f32 %v1165_v51, %v9273_v56  ;;  %v9279_v19 = vld [vmem:[#allocation13_spill] sm:$0xff]  ;;  %v9281_v51 = vld [vmem:[#allocation7_spill] sm:$0xff] }
 0x164   : > { %v1571_v12 = vpop.f32.mrf.mxu0  ;;  %v5638_v59 = vpop.f32.mrf.mxu1  ;;  %5841 = vmatmul.mubr.msk.bf16.gmra.mxu1 %vm687_vm3, %v5285_v60 }
 0x165   : > { %v8450_v21 = vadd.f32 %v1558_v29, %v1166_v9  ;;  %v1187_v44 = vadd.f32 %v5638_v59, %v9274_v38 }
 0x166   : > { %v5673_v30 = vpop.f32.mrf.mxu0  ;;  %v1178_v33 = vpop.f32.mrf.mxu1 }
 0x167   : > { %v8453_v50 = vadd.f32 %v5672_v62, %v1187_v44  ;;  %v1179_v22 = vadd.f32 %v1178_v33, %v9275_v35 }
 0x168   : > { %v1574_v20 = vpop.f32.mrf.mxu0  ;;  %v5639_v14 = vpop.f32.mrf.mxu1 }
 0x169   : > { %v8456_v57 = vadd.f32 %v1571_v12, %v1179_v22  ;;  %v1190_v16 = vadd.f32 %v5639_v14, %v9276_v18 }
 0x16a   : > { %v5712_v39 = vpop.f32.mrf.mxu0  ;;  %v1181_v43 = vpop.f32.mrf.mxu1 }
 0x16b   : > { %v8459_v25 = vadd.f32 %v5673_v30, %v1190_v16  ;;  %v1182_v41 = vadd.f32 %v1181_v43, %v9277_v49 }
 0x16c   : > { %v2515_v6 = vpop.f32.mrf.mxu0  ;;  %v5678_v24 = vpop.f32.mrf.mxu1 }
 0x16d   : > { %v8462_v8 = vadd.f32 %v1574_v20, %v1182_v41  ;;  %v1966_v42 = vadd.f32 %v5678_v24, %v9278_v63 }
 0x16e   : > { %v5713_v46 = vpop.f32.mrf.mxu0  ;;  %v1837_v52 = vpop.f32.mrf.mxu1 }
 0x16f   : > { %v8465_v31 = vadd.f32 %v5712_v39, %v1966_v42  ;;  %v1964_v4 = vadd.f32 %v1837_v52, %v9279_v19 }
 0x170   : > { %v2518_v61 = vpop.f32.mrf.mxu0  ;;  %v5679_v13 = vpop.f32.mrf.mxu1 }
 0x171   : > { %v8468_v29 = vadd.f32 %v2515_v6, %v1964_v4  ;;  %v1967_v60 = vadd.f32 %v5679_v13, %v9280_v32 }
 0x172   : > { %v5716_v15 = vpop.f32.mrf.mxu0  ;;  %v1840_v10 = vpop.f32.mrf.mxu1 }
 0x173   : > { %v8471_v62 = vadd.f32 %v5713_v46, %v1967_v60  ;;  %v1965_v56 = vadd.f32 %v1840_v10, %v9281_v51 }
 0x174   : > { %v2531_v9 = vpop.f32.mrf.mxu0  ;;  %v5682_v12 = vpop.f32.mrf.mxu1 }
 0x175   : > { %v8474_v59 = vadd.f32 %v2518_v61, %v1965_v56  ;;  %v1970_v38 = vadd.f32 %v5682_v12, %v8186_v47 }
 0x176   : > { %v5717_v44 = vpop.f32.mrf.mxu0  ;;  %v1853_v30 = vpop.f32.mrf.mxu1 }
 0x177   : > { %v8477_v33 = vadd.f32 %v5716_v15, %v1970_v38  ;;  %v1968_v35 = vadd.f32 %v1853_v30, %v8205_v37 }
 0x178   : > { %v2534_v22 = vpop.f32.mrf.mxu0  ;;  %v5683_v20 = vpop.f32.mrf.mxu1 }
 0x179   : > { %v8480_v14 = vadd.f32 %v2531_v9, %v1968_v35  ;;  %v1971_v18 = vadd.f32 %v5683_v20, %v8220_v0 }
 0x17a   : > { %v5720_v16 = vpop.f32.mrf.mxu0  ;;  %v1856_v39 = vpop.f32.mrf.mxu1 }
 0x17b   : > { %v8483_v43 = vadd.f32 %v5717_v44, %v1971_v18  ;;  %v1969_v49 = vadd.f32 %v1856_v39, %v8233_v58 }
 0x17c   : > { %v2547_v41 = vpop.f32.mrf.mxu0  ;;  %v5686_v47 = vpop.f32.mrf.mxu1 }
 0x17d   : > { %v8486_v6 = vadd.f32 %v2534_v22, %v1969_v49  ;;  %v1974_v24 = vadd.f32 %v5686_v47, %v8253_v55 }
 0x17e   : > { %v5721_v63 = vpop.f32.mrf.mxu0  ;;  %v1869_v37 = vpop.f32.mrf.mxu1 }
 0x17f   : > { %v8489_v42 = vadd.f32 %v5720_v16, %v1974_v24  ;;  %v1972_v46 = vadd.f32 %v1869_v37, %v8262_v3 }
 0x180   : > { %v2550_v52 = vpop.f32.mrf.mxu0  ;;  %v5687_v0 = vpop.f32.mrf.mxu1 }
 0x181   : > { %v8492_v19 = vadd.f32 %v2547_v41, %v1972_v46  ;;  %v1975_v4 = vadd.f32 %v5687_v0, %v8286_v2 }
 0x182   : > { %v5724_v61 = vpop.f32.mrf.mxu0  ;;  %v1872_v58 = vpop.f32.mrf.mxu1 }
 0x183   : > { %v8495_v13 = vadd.f32 %v5721_v63, %v1975_v4  ;;  %v1973_v32 = vadd.f32 %v1872_v58, %v8297_v11 }
 0x184   : > { %v2563_v60 = vpop.f32.mrf.mxu0  ;;  %v5690_v55 = vpop.f32.mrf.mxu1 }
 0x185   : > { %v8498_v15 = vadd.f32 %v2550_v52, %v1973_v32  ;;  %v1978_v10 = vadd.f32 %v5690_v55, %v8319_v17 }
 0x186   : > { %v5725_v51 = vpop.f32.mrf.mxu0  ;;  %v1885_v3 = vpop.f32.mrf.mxu1 }
 0x187   : > { %v8501_v56 = vadd.f32 %v5724_v61, %v1978_v10  ;;  %v1976_v9 = vadd.f32 %v1885_v3, %v8328_v5 }
 0x188   : > { %v2566_v12 = vpop.f32.mrf.mxu0  ;;  %v5691_v2 = vpop.f32.mrf.mxu1 }
 0x189   : > { %v8504_v38 = vadd.f32 %v2563_v60, %v1976_v9  ;;  %v1979_v44 = vadd.f32 %v5691_v2, %v8346_v53 }
 0x18a   : > { %v5728_v30 = vpop.f32.mrf.mxu0  ;;  %v1888_v11 = vpop.f32.mrf.mxu1 }
 0x18b   : > { %v8507_v35 = vadd.f32 %v5725_v51, %v1979_v44  ;;  %v1977_v22 = vadd.f32 %v1888_v11, %v8360_v27 }
 0x18c   : > { %v2579_v20 = vpop.f32.mrf.mxu0  ;;  %v5694_v17 = vpop.f32.mrf.mxu1 }
 0x18d   : > { %v8510_v18 = vadd.f32 %v2566_v12, %v1977_v22  ;;  %v1982_v16 = vadd.f32 %v5694_v17, %v8366_v34 }
 0x18e   : > { %v5729_v39 = vpop.f32.mrf.mxu0  ;;  %v1901_v5 = vpop.f32.mrf.mxu1 }
 0x18f   : > { %v8513_v49 = vadd.f32 %v5728_v30, %v1982_v16  ;;  %v1980_v41 = vadd.f32 %v1901_v5, %v8375_v28 }
 0x190   : > { %v2582_v47 = vpop.f32.mrf.mxu0  ;;  %v5695_v53 = vpop.f32.mrf.mxu1 }
 0x191   : > { %v8516_v24 = vadd.f32 %v2579_v20, %v1980_v41  ;;  %v1983_v63 = vadd.f32 %v5695_v53, %v8388_v48 }
 0x192   : > { %v5732_v37 = vpop.f32.mrf.mxu0  ;;  %v1904_v27 = vpop.f32.mrf.mxu1 }
 0x193   : > { %v8519_v46 = vadd.f32 %v5729_v39, %v1983_v63  ;;  %v1981_v52 = vadd.f32 %v1904_v27, %v8403_v54 }
 0x194   : > { %v2595_v0 = vpop.f32.mrf.mxu0  ;;  %v5698_v34 = vpop.f32.mrf.mxu1 }
 0x195   : > { %9282 = vst [vmem:[#allocation5_spill] sm:$0xff] %v8519_v46  ;;  %v8522_v4 = vadd.f32 %v2582_v47, %v1981_v52  ;;  %v1986_v61 = vadd.f32 %v5698_v34, %v8412_v23 }
 0x196   : > { %v5733_v58 = vpop.f32.mrf.mxu0  ;;  %v1917_v28 = vpop.f32.mrf.mxu1 }
 0x197   : > { %9283 = vst [vmem:[#allocation15_spill] sm:$0xff] %v8522_v4  ;;  %v8525_v32 = vadd.f32 %v5732_v37, %v1986_v61  ;;  %v1984_v60 = vadd.f32 %v1917_v28, %v8415_v36 }
 0x198   : > { %v2598_v55 = vpop.f32.mrf.mxu0  ;;  %v5699_v48 = vpop.f32.mrf.mxu1 }
 0x199   : > { %9284 = vst [vmem:[#allocation26_spill] sm:$0xff] %v8525_v32  ;;  %v8528_v10 = vadd.f32 %v2595_v0, %v1984_v60  ;;  %v1987_v51 = vadd.f32 %v5699_v48, %v8426_v1 }
 0x19a   : > { %v5736_v3 = vpop.f32.mrf.mxu0  ;;  %v1920_v54 = vpop.f32.mrf.mxu1 }
 0x19b   : > { %9285 = vst [vmem:[#allocation18_spill] sm:$0xff] %v8528_v10  ;;  %v8531_v9 = vadd.f32 %v5733_v58, %v1987_v51  ;;  %v1985_v12 = vadd.f32 %v1920_v54, %v8433_v7 }
 0x19c   : > { %v2611_v2 = vpop.f32.mrf.mxu0  ;;  %v5702_v23 = vpop.f32.mrf.mxu1 }
 0x19d   : > { %9286 = vst [vmem:[#allocation16_spill] sm:$0xff] %v8531_v9  ;;  %v8534_v44 = vadd.f32 %v2598_v55, %v1985_v12  ;;  %v1990_v30 = vadd.f32 %v5702_v23, %v8439_v26 }
 0x19e   : > { %v5737_v11 = vpop.f32.mrf.mxu0  ;;  %v1933_v36 = vpop.f32.mrf.mxu1 }
 0x19f   : > { %9287 = vst [vmem:[#allocation17_spill] sm:$0xff] %v8534_v44  ;;  %v8537_v22 = vadd.f32 %v5736_v3, %v1990_v30  ;;  %v1988_v20 = vadd.f32 %v1933_v36, %v8442_v45 }
 0x1a0   : > { %v2614_v17 = vpop.f32.mrf.mxu0  ;;  %v5703_v1 = vpop.f32.mrf.mxu1 }
 0x1a1   : > { %9288 = vst [vmem:[#allocation27_spill] sm:$0xff] %v8537_v22  ;;  %v8540_v16 = vadd.f32 %v2611_v2, %v1988_v20  ;;  %v1991_v39 = vadd.f32 %v5703_v1, %v8446_v40 }
 0x1a2   : > { %v5740_v5 = vpop.f32.mrf.mxu0  ;;  %v1936_v7 = vpop.f32.mrf.mxu1 }
 0x1a3   : > { %9289 = vst [vmem:[#allocation28_spill] sm:$0xff] %v8540_v16  ;;  %v8543_v41 = vadd.f32 %v5737_v11, %v1991_v39  ;;  %v1989_v47 = vadd.f32 %v1936_v7, %v8450_v21 }
 0x1a4   : > { %v2627_v53 = vpop.f32.mrf.mxu0  ;;  %v5706_v26 = vpop.f32.mrf.mxu1 }
 0x1a5   : > { %9290 = vst [vmem:[#allocation29_spill] sm:$0xff] %v8543_v41  ;;  %v8546_v63 = vadd.f32 %v2614_v17, %v1989_v47  ;;  %v1994_v37 = vadd.f32 %v5706_v26, %v8453_v50 }
 0x1a6   : > { %v5741_v27 = vpop.f32.mrf.mxu0  ;;  %v1949_v45 = vpop.f32.mrf.mxu1 }
 0x1a7   : > { %9291 = vst [vmem:[#allocation34_spill] sm:$0xff] %v8546_v63  ;;  %v8549_v52 = vadd.f32 %v5740_v5, %v1994_v37  ;;  %v1992_v0 = vadd.f32 %v1949_v45, %v8456_v57 }
 0x1a8   : > { %v2630_v34 = vpop.f32.mrf.mxu0  ;;  %v5707_v40 = vpop.f32.mrf.mxu1 }
 0x1a9   : > { %9292 = vst [vmem:[#allocation21_spill] sm:$0xff] %v8549_v52  ;;  %v8552_v61 = vadd.f32 %v2627_v53, %v1992_v0  ;;  %v1995_v58 = vadd.f32 %v5707_v40, %v8459_v25 }
 0x1aa   : > { %v8555_v28 = vpop.f32.mrf.mxu0  ;;  %v1952_v21 = vpop.f32.mrf.mxu1 }
 0x1ab   : > { %9293 = vst [vmem:[#allocation33_spill] sm:$0xff] %v8552_v61  ;;  %v8557_v60 = vadd.f32 %v5741_v27, %v1995_v58  ;;  %v1993_v55 = vadd.f32 %v1952_v21, %v8462_v8 }
 0x1ac   : > { %v8560_v50 = vpop.f32.mrf.mxu0  ;;  %v5746_v48 = vpop.f32.mrf.mxu1 }
 0x1ad   : > { %9294 = vst [vmem:[#allocation31_spill] sm:$0xff] %v8557_v60  ;;  %v8562_v51 = vadd.f32 %v2630_v34, %v1993_v55 }
 0x1ae   : > { %v8564_v3 = vpop.f32.mrf.mxu0  ;;  %v2937_v57 = vpop.f32.mrf.mxu1 }
 0x1af   : > { %9295 = vst [vmem:[#allocation37_spill] sm:$0xff] %v8562_v51 }
 0x1b0   : > { %v8566_v54 = vpop.f32.mrf.mxu0  ;;  %v5747_v12 = vpop.f32.mrf.mxu1 }
 0x1b2   : > { %v8568_v2 = vpop.f32.mrf.mxu0  ;;  %v8570_v25 = vpop.f32.mrf.mxu1 }
 0x1b4   : > { %v8572_v23 = vpop.f32.mrf.mxu0  ;;  %v8574_v30 = vpop.f32.mrf.mxu1 }
 0x1b6   : > { %v8576_v8 = vpop.f32.mrf.mxu0  ;;  %v8578_v11 = vpop.f32.mrf.mxu1 }
 0x1b8   : > { %v8580_v36 = vpop.f32.mrf.mxu0  ;;  %v8582_v20 = vpop.f32.mrf.mxu1 }
 0x1ba   : > { %v8584_v17 = vpop.f32.mrf.mxu0  ;;  %v8586_v1 = vpop.f32.mrf.mxu1 }
 0x1bc   : > { %v8588_v39 = vpop.f32.mrf.mxu0  ;;  %v8590_v5 = vpop.f32.mrf.mxu1 }
 0x1be   : > { %v8592_v7 = vpop.f32.mrf.mxu0  ;;  %v8594_v47 = vpop.f32.mrf.mxu1 }
 0x1c0   : > { %v8596_v53 = vpop.f32.mrf.mxu0  ;;  %v8598_v26 = vpop.f32.mrf.mxu1 }
 0x1c2   : > { %v8600_v37 = vpop.f32.mrf.mxu0  ;;  %v8602_v27 = vpop.f32.mrf.mxu1 }
 0x1c4   : > { %v8604_v45 = vpop.f32.mrf.mxu0  ;;  %v8606_v0 = vpop.f32.mrf.mxu1 }
 0x1c6   : > { %v8608_v34 = vpop.f32.mrf.mxu0  ;;  %v8610_v40 = vpop.f32.mrf.mxu1 }
 0x1c8   : > { %v8612_v58 = vpop.f32.mrf.mxu0  ;;  %v8614_v21 = vpop.f32.mrf.mxu1 }
 0x1ca   : > { %v8616_v55 = vpop.f32.mrf.mxu0  ;;  %v8618_v51 = vpop.f32.mrf.mxu1 }
 0x1cc   : > { %v8620_v60 = vpop.f32.mrf.mxu0  ;;  %v8622_v61 = vpop.f32.mrf.mxu1 }
 0x1cd   : > { %9296 = vst [vmem:[#allocation30_spill] sm:$0xff] %v8620_v60 }
 0x1ce   : > { %v8624_v52 = vpop.f32.mrf.mxu0  ;;  %v8626_v63 = vpop.f32.mrf.mxu1 }
 0x1cf   : > { %9297 = vst [vmem:[#allocation38_spill] sm:$0xff] %v8624_v52 }
 0x1d0   : > { %v8628_v41 = vpop.f32.mrf.mxu0  ;;  %v8630_v16 = vpop.f32.mrf.mxu1 }
 0x1d1   : > { %9298 = vst [vmem:[#allocation43_spill] sm:$0xff] %v8628_v41  ;;  %9299 = vst [vmem:[#allocation20_spill] sm:$0xff] %v8630_v16 }
 0x1d2   : > { %v8632_v22 = vpop.f32.mrf.mxu0  ;;  %v8634_v44 = vpop.f32.mrf.mxu1 }
 0x1d3   : > { %9300 = vst [vmem:[#allocation19_spill] sm:$0xff] %v8632_v22  ;;  %9301 = vst [vmem:[#allocation45_spill] sm:$0xff] %v8634_v44 }
 0x1d4   : > { %v8636_v9 = vpop.f32.mrf.mxu0  ;;  %v8638_v10 = vpop.f32.mrf.mxu1 }
 0x1d5   : > { %9302 = vst [vmem:[#allocation51_spill] sm:$0xff] %v8636_v9  ;;  %9303 = vst [vmem:[#allocation39_spill] sm:$0xff] %v8638_v10 }
 0x1d6   : > { %v8640_v32 = vpop.f32.mrf.mxu0  ;;  %v8642_v4 = vpop.f32.mrf.mxu1 }
 0x1d7   : > { %9304 = vst [vmem:[#allocation23_spill] sm:$0xff] %v8640_v32  ;;  %9305 = vst [vmem:[#allocation55_spill] sm:$0xff] %v8642_v4 }
 0x1d8   : > { %v8644_v60 = vpop.f32.mrf.mxu0  ;;  %v8646_v52 = vpop.f32.mrf.mxu1 }
 0x1d9   : > { %9306 = vst [vmem:[#allocation40_spill] sm:$0xff] %v8644_v60  ;;  %9307 = vst [vmem:[#allocation41_spill] sm:$0xff] %v8646_v52 }
 0x1da   : > { %v8648_v46 = vpop.f32.mrf.mxu0  ;;  %v8650_v41 = vpop.f32.mrf.mxu1 }
 0x1db   : > { %9308 = vst [vmem:[#allocation14_spill] sm:$0xff] %v8648_v46  ;;  %9309 = vst [vmem:[#allocation35_spill] sm:$0xff] %v8650_v41 }
 0x1dc   : > { %v8652_v16 = vpop.f32.mrf.mxu0  ;;  %v8654_v22 = vpop.f32.mrf.mxu1 }
 0x1dd   : > { %9310 = vst [vmem:[#allocation24_spill] sm:$0xff] %v8652_v16  ;;  %9311 = vst [vmem:[#allocation46_spill] sm:$0xff] %v8654_v22 }
 0x1de   : > { %v8656_v44 = vpop.f32.mrf.mxu0  ;;  %v8658_v9 = vpop.f32.mrf.mxu1 }
 0x1df   : > { %9312 = vst [vmem:[#allocation47_spill] sm:$0xff] %v8656_v44  ;;  %9313 = vst [vmem:[#allocation48_spill] sm:$0xff] %v8658_v9  ;;  %v3066_v44 = vadd.f32 %v5746_v48, %v8465_v31  ;;  %v3065_v31 = vadd.f32 %v8570_v25, %v8474_v59 }
 0x1e0   : > { %v8660_v10 = vpop.f32.mrf.mxu0  ;;  %v8662_v32 = vpop.f32.mrf.mxu1 }
 0x1e1   : > { %9314 = vst [vmem:[#allocation49_spill] sm:$0xff] %v8660_v10  ;;  %9315 = vst [vmem:[#allocation32_spill] sm:$0xff] %v8662_v32  ;;  %v3064_v10 = vadd.f32 %v2937_v57, %v8468_v29  ;;  %v8692_v29 = vld [vmem:[%s8893_s2] ss:$0 sm:$0xff] }
 0x1e2   : > { %v8664_v4 = vpop.f32.mrf.mxu0  ;;  %v8666_v60 = vpop.f32.mrf.mxu1 }
 0x1e3   : > { %9316 = vst [vmem:[#allocation36_spill] sm:$0xff] %v8664_v4  ;;  %9317 = vst [vmem:[#allocation22_spill] sm:$0xff] %v8666_v60  ;;  %v3444_v60 = vadd.f32 %v8555_v28, %v3066_v44 }
 0x1e4   : > { %v8668_v52 = vpop.f32.mrf.mxu0  ;;  %v8670_v46 = vpop.f32.mrf.mxu1 }
 0x1e5   : > { %9318 = vst [vmem:[#allocation42_spill] sm:$0xff] %v8668_v52  ;;  %9319 = vst [vmem:[#allocation52_spill] sm:$0xff] %v8670_v46  ;;  %v3067_v52 = vadd.f32 %v5747_v12, %v8471_v62 }
 0x1e6   : > { %v8672_v41 = vpop.f32.mrf.mxu0  ;;  %v8674_v16 = vpop.f32.mrf.mxu1 }
 0x1e7   : > { %9320 = vst [vmem:[#allocation54_spill] sm:$0xff] %v8672_v41  ;;  %9321 = vst [vmem:[#allocation56_spill] sm:$0xff] %v8674_v16  ;;  %v3442_v16 = vadd.f32 %v8560_v50, %v3064_v10  ;;  %v3445_v44 = vadd.f32 %v8564_v3, %v3067_v52  ;;  %v3068_v10 = vadd.f32 %v8578_v11, %v8480_v14 }
 0x1e8   : > { %v8677_v22 = vpop.f32.mrf.mxu0  ;;  %v8679_v9 = vpop.f32.mrf.mxu1  ;;  %v3069_v11 = vadd.f32 %v8586_v1, %v8486_v6  ;;  %v3074_v6 = vadd.f32 %v8590_v5, %v8489_v42 }
 0x1e9   : > { %9322 = vst [vmem:[#allocation58_spill] sm:$0xff] %v8677_v22  ;;  %9323 = vst [vmem:[#allocation44_spill] sm:$0xff] %v8679_v9 }
 0x1ea   : > { %v5848_v32 = vpop.f32.mrf.mxu0  ;;  %v8682_v4 = vpop.f32.mrf.mxu1 }
 0x1eb   : > { %9324 = vst [vmem:[#allocation50_spill] sm:$0xff] %v8682_v4  ;;  %v3070_v4 = vadd.f32 %v8574_v30, %v8477_v33 }
 0x1ec   : > { %v4415_v46 = vpop.f32.mrf.mxu0  ;;  %v5814_v41 = vpop.f32.mrf.mxu1 }
 0x1ed   : > { %v4122_v48 = vadd.f32 %v5814_v41, %v3444_v60  ;;  %v3443_v41 = vadd.f32 %v8566_v54, %v3065_v31  ;;  %v3448_v14 = vadd.f32 %v8568_v2, %v3070_v4  ;;  %v3446_v54 = vadd.f32 %v8572_v23, %v3068_v10 }
 0x1ee   : > { %v5849_v22 = vpop.f32.mrf.mxu0  ;;  %v3993_v57 = vpop.f32.mrf.mxu1 }
 0x1ef   : > { %v4544_v28 = vadd.f32 %v5848_v32, %v4122_v48  ;;  %v4120_v62 = vadd.f32 %v3993_v57, %v3442_v16  ;;  %v3071_v32 = vadd.f32 %v8582_v20, %v8483_v43 }
 0x1f0   : > { %v4418_v12 = vpop.f32.mrf.mxu0  ;;  %v5815_v59 = vpop.f32.mrf.mxu1 }
 0x1f1   : > { %v4583_v60 = vadd.f32 %v8692_v29, %v4544_v28  ;;  %v4542_v50 = vadd.f32 %v4415_v46, %v4120_v62  ;;  %v4123_v25 = vadd.f32 %v5815_v59, %v3445_v44  ;;  %v3449_v2 = vadd.f32 %v8576_v8, %v3071_v32 }
 0x1f2   : > { %v5852_v9 = vpop.f32.mrf.mxu0  ;;  %v3996_v16 = vpop.f32.mrf.mxu1  ;;  %v3447_v59 = vadd.f32 %v8580_v36, %v3069_v11  ;;  %v3072_v32 = vadd.f32 %v8594_v47, %v8492_v19 }
 0x1f3   : > { %v4615_v52 = vmax.f32 %v4583_v60, 0.0  ;;  %v4581_v3 = vadd.f32 %v8692_v29, %v4542_v50  ;;  %v4545_v33 = vadd.f32 %v5849_v22, %v4123_v25  ;;  %v4121_v30 = vadd.f32 %v3996_v16, %v3443_v41 }
 0x1f4   : > { %v4431_v48 = vpop.f32.mrf.mxu0  ;;  %v5818_v43 = vpop.f32.mrf.mxu1  ;;  %v3452_v25 = vadd.f32 %v8584_v17, %v3074_v6  ;;  %v3075_v16 = vadd.f32 %v8598_v26, %v8495_v13  ;;  %v3073_v17 = vadd.f32 %v8602_v27, %v8498_v15 }
 0x1f5   : > { %v5389_v46 = vpack.c.bf16 %v4615_v52, %v4615_v52  ;;  %v4613_v20 = vmax.f32 %v4581_v3, 0.0  ;;  %v4584_v22 = vadd.f32 %v8692_v29, %v4545_v33  ;;  %v4543_v31 = vadd.f32 %v4418_v12, %v4121_v30 }
 0x1f6   : > { %v5853_v4 = vpop.f32.mrf.mxu0  ;;  %v4126_v23 = vadd.f32 %v5818_v43, %v3448_v14  ;;  %v4009_v1 = vpop.f32.mrf.mxu1  ;;  %v3450_v43 = vadd.f32 %v8588_v39, %v3072_v32 }
 0x1f7   : > { %4776 = vst.msk [vmem:[%s8712_s19 + $0x8] sm:$0xf] %vm4773_vm8, %v5389_v46  ;;  %v5387_v57 = vpack.c.bf16 %v4613_v20, %v4613_v20  ;;  %v4616_v44 = vmax.f32 %v4584_v22, 0.0  ;;  %v4582_v28 = vadd.f32 %v8692_v29, %v4543_v31  ;;  %v4124_v62 = vadd.f32 %v4009_v1, %v3446_v54 }
 0x1f8   : > { %v4434_v10 = vpop.f32.mrf.mxu0  ;;  %v4548_v12 = vadd.f32 %v5852_v9, %v4126_v23  ;;  %v5819_v41 = vpop.f32.mrf.mxu1  ;;  %v3453_v46 = vadd.f32 %v8592_v7, %v3075_v16  ;;  %v3078_v20 = vadd.f32 %v8606_v0, %v8501_v56  ;;  %v3451_v23 = vadd.f32 %v8596_v53, %v3073_v17 }
 0x1f9   : > { %4774 = vst.msk [vmem:[%s8712_s19] sm:$0xf] %vm4773_vm8, %v5387_v57  ;;  %v5390_v8 = vpack.c.bf16 %v4616_v44, %v4616_v44  ;;  %v4614_v60 = vmax.f32 %v4582_v28, 0.0  ;;  %v4546_v42 = vadd.f32 %v4431_v48, %v4124_v62  ;;  %v4127_v5 = vadd.f32 %v5819_v41, %v3449_v2 }
 0x1fa   : > { %v5856_v50 = vpop.f32.mrf.mxu0  ;;  %v4587_v36 = vadd.f32 %v8692_v29, %v4548_v12  ;;  %v4012_v9 = vpop.f32.mrf.mxu1  ;;  %v3076_v1 = vadd.f32 %v8610_v40, %v8504_v38  ;;  %v3456_v62 = vadd.f32 %v8600_v37, %v3078_v20 }
 0x1fb   : > { %4777 = vst.msk [vmem:[%s8712_s19 + $0xc] sm:$0xf] %vm4773_vm8, %v5390_v8  ;;  %v5388_v52 = vpack.c.bf16 %v4614_v60, %v4614_v60  ;;  %v4585_v3 = vadd.f32 %v8692_v29, %v4546_v42  ;;  %v4549_v33 = vadd.f32 %v5853_v4, %v4127_v5  ;;  %v4125_v30 = vadd.f32 %v4012_v9, %v3447_v59 }
 0x1fc   : > { %v4447_v48 = vpop.f32.mrf.mxu0  ;;  %v4619_v14 = vmax.f32 %v4587_v36, 0.0  ;;  %v5822_v54 = vpop.f32.mrf.mxu1  ;;  %v3454_v8 = vadd.f32 %v8604_v45, %v3076_v1  ;;  %v3079_v60 = vadd.f32 %v8614_v21, %v8507_v35  ;;  %v3077_v42 = vadd.f32 %v8618_v51, %v8510_v18 }
 0x1fd   : > { %4775 = vst.msk [vmem:[%s8712_s19 + $0x4] sm:$0xf] %vm4773_vm8, %v5388_v52  ;;  %v4617_v19 = vmax.f32 %v4585_v3, 0.0  ;;  %v4588_v13 = vadd.f32 %v8692_v29, %v4549_v33  ;;  %v4547_v47 = vadd.f32 %v4434_v10, %v4125_v30  ;;  %v4130_v26 = vadd.f32 %v5822_v54, %v3452_v25 }
 0x1fe   : > { %v5857_v11 = vpop.f32.mrf.mxu0  ;;  %v5393_v15 = vpack.c.bf16 %v4619_v14, %v4619_v14  ;;  %v4025_v27 = vpop.f32.mrf.mxu1  ;;  %v3082_v45 = vadd.f32 %v8622_v61, %v8513_v49  ;;  %v3457_v33 = vadd.f32 %v8608_v34, %v3079_v60  ;;  %v3455_v30 = vadd.f32 %v8612_v58, %v3077_v42  ;;  %v9334_v60 = vld [vmem:[#allocation55_spill] sm:$0xff] }
 0x1ff   : > { %v5391_v22 = vpack.c.bf16 %v4617_v19, %v4617_v19  ;;  %v4620_v31 = vmax.f32 %v4588_v13, 0.0  ;;  %v4586_v4 = vadd.f32 %v8692_v29, %v4547_v47  ;;  %v4552_v2 = vadd.f32 %v5856_v50, %v4130_v26  ;;  %v9325_v26 = vld [vmem:[#allocation5_spill] sm:$0xff] }
 0x200   : > { %v4450_v6 = vpop.f32.mrf.mxu0  ;;  %4780 = vst.msk [vmem:[%s8712_s19 + $0x18] sm:$0xf] %vm4773_vm8, %v5393_v15  ;;  %v4128_v39 = vadd.f32 %v4025_v27, %v3450_v43  ;;  %v5823_v7 = vpop.f32.mrf.mxu1  ;;  %v3460_v47 = vadd.f32 %v8616_v55, %v3082_v45  ;;  %v9327_v27 = vld [vmem:[#allocation30_spill] sm:$0xff]  ;;  %v9335_v45 = vld [vmem:[#allocation43_spill] sm:$0xff] }
 0x201   : > { %4778 = vst.msk [vmem:[%s8712_s19 + $0x10] sm:$0xf] %vm4773_vm8, %v5391_v22  ;;  %v5394_v56 = vpack.c.bf16 %v4620_v31, %v4620_v31  ;;  %v4618_v0 = vmax.f32 %v4586_v4, 0.0  ;;  %v4591_v57 = vadd.f32 %v8692_v29, %v4552_v2  ;;  %v4131_v44 = vadd.f32 %v5823_v7, %v3453_v46 }
 0x202   : > { %v4550_v10 = vadd.f32 %v4447_v48, %v4128_v39  ;;  %v4028_v53 = vpop.f32.mrf.mxu1  ;;  %v3080_v48 = vadd.f32 %v8626_v63, %v8516_v24  ;;  %v9328_v39 = vld [vmem:[#allocation38_spill] sm:$0xff] }
 0x203   : > { %v5860_v28 = vpop.f32.mrf.mxu0  ;;  %4781 = vst.msk [vmem:[%s8712_s19 + $0x1c] sm:$0xf] %vm4773_vm8, %v5394_v56  ;;  %v5392_v38 = vpack.c.bf16 %v4618_v0, %v4618_v0  ;;  %v4623_v40 = vmax.f32 %v4591_v57, 0.0  ;;  %v4553_v59 = vadd.f32 %v5857_v11, %v4131_v44  ;;  %v4129_v12 = vadd.f32 %v4028_v53, %v3451_v23  ;;  %v9326_v11 = vld [vmem:[#allocation20_spill] sm:$0xff]  ;;  %v9329_v56 = vld [vmem:[#allocation15_spill] sm:$0xff]  ;;  %v9330_v0 = vld [vmem:[#allocation45_spill] sm:$0xff] }
 0x204   : > { %v4589_v37 = vadd.f32 %v8692_v29, %v4550_v10  ;;  %v5826_v5 = vpop.f32.mrf.mxu1  ;;  %v3083_v43 = vadd.f32 %v9326_v11, %v9325_v26  ;;  %v3458_v22 = vadd.f32 %v9327_v27, %v3080_v48  ;;  %v3081_v57 = vadd.f32 %v9330_v0, %v9329_v56  ;;  %v9331_v44 = vld [vmem:[#allocation26_spill] sm:$0xff]  ;;  %v9346_v56 = vld [vmem:[#allocation28_spill] sm:$0xff] }
 0x205   : > { %v4463_v41 = vpop.f32.mrf.mxu0  ;;  %4779 = vst.msk [vmem:[%s8712_s19 + $0x14] sm:$0xf] %vm4773_vm8, %v5392_v38  ;;  %v5397_v50 = vpack.c.bf16 %v4623_v40, %v4623_v40  ;;  %v4592_v25 = vadd.f32 %v8692_v29, %v4553_v59  ;;  %v4551_v32 = vadd.f32 %v4450_v6, %v4129_v12  ;;  %v4134_v16 = vadd.f32 %v5826_v5, %v3456_v62  ;;  %v9347_v0 = vld [vmem:[#allocation48_spill] sm:$0xff] }
 0x206   : > { %v4621_v9 = vmax.f32 %v4589_v37, 0.0  ;;  %v4041_v52 = vpop.f32.mrf.mxu1  ;;  %v3461_v7 = vadd.f32 %v9328_v39, %v3083_v43  ;;  %v9345_v39 = vld [vmem:[#allocation46_spill] sm:$0xff] }
 0x207   : > { %v5861_v36 = vpop.f32.mrf.mxu0  ;;  %4784 = vst.msk [vmem:[%s8712_s19 + $0x28] sm:$0xf] %vm4773_vm8, %v5397_v50  ;;  %v4624_v35 = vmax.f32 %v4592_v25, 0.0  ;;  %v4590_v18 = vadd.f32 %v8692_v29, %v4551_v32  ;;  %v4556_v51 = vadd.f32 %v5860_v28, %v4134_v16  ;;  %v4132_v21 = vadd.f32 %v4041_v52, %v3454_v8  ;;  %v9332_v28 = vld [vmem:[#allocation39_spill] sm:$0xff]  ;;  %v9333_v8 = vld [vmem:[#allocation18_spill] sm:$0xff] }
 0x208   : > { %v5395_v49 = vpack.c.bf16 %v4621_v9, %v4621_v9  ;;  %v5827_v61 = vpop.f32.mrf.mxu1  ;;  %v3086_v62 = vadd.f32 %v9332_v28, %v9331_v44  ;;  %v3084_v42 = vadd.f32 %v9334_v60, %v9333_v8  ;;  %v3459_v9 = vadd.f32 %v9335_v45, %v3081_v57  ;;  %v9336_v52 = vld [vmem:[#allocation19_spill] sm:$0xff] }
 0x209   : > { %v4466_v3 = vpop.f32.mrf.mxu0  ;;  %v5398_v17 = vpack.c.bf16 %v4624_v35, %v4624_v35  ;;  %v4622_v14 = vmax.f32 %v4590_v18, 0.0  ;;  %v4595_v54 = vadd.f32 %v8692_v29, %v4556_v51  ;;  %v4554_v19 = vadd.f32 %v4463_v41, %v4132_v21  ;;  %v9337_v18 = vld [vmem:[#allocation16_spill] sm:$0xff]  ;;  %v9338_v51 = vld [vmem:[#allocation41_spill] sm:$0xff] }
 0x20a   : > { %4782 = vst.msk [vmem:[%s8712_s19 + $0x20] sm:$0xf] %vm4773_vm8, %v5395_v49  ;;  %v4135_v34 = vadd.f32 %v5827_v61, %v3457_v33  ;;  %v4044_v58 = vpop.f32.mrf.mxu1  ;;  %v3464_v35 = vadd.f32 %v9336_v52, %v3086_v62  ;;  %v3087_v21 = vadd.f32 %v9338_v51, %v9337_v18  ;;  %v3088_v57 = vadd.f32 %v9347_v0, %v9346_v56  ;;  %v9353_v52 = vld [vmem:[#allocation22_spill] sm:$0xff] }
 0x20b   : > { %v5864_v13 = vpop.f32.mrf.mxu0  ;;  %4785 = vst.msk [vmem:[%s8712_s19 + $0x2c] sm:$0xf] %vm4773_vm8, %v5398_v17  ;;  %v5396_v24 = vpack.c.bf16 %v4622_v14, %v4622_v14  ;;  %v4627_v63 = vmax.f32 %v4595_v54, 0.0  ;;  %v4593_v46 = vadd.f32 %v8692_v29, %v4554_v19  ;;  %v4133_v20 = vadd.f32 %v4044_v58, %v3455_v30  ;;  %v9339_v14 = vld [vmem:[#allocation51_spill] sm:$0xff]  ;;  %v9340_v19 = vld [vmem:[#allocation17_spill] sm:$0xff] }
 0x20c   : > { %v4557_v31 = vadd.f32 %v5861_v36, %v4135_v34  ;;  %v5830_v55 = vpop.f32.mrf.mxu1  ;;  %v3462_v54 = vadd.f32 %v9339_v14, %v3084_v42  ;;  %v9356_v14 = vld [vmem:[#allocation52_spill] sm:$0xff] }
 0x20d   : > { %v4479_v15 = vpop.f32.mrf.mxu0  ;;  %4783 = vst.msk [vmem:[%s8712_s19 + $0x24] sm:$0xf] %vm4773_vm8, %v5396_v24  ;;  %v5401_v4 = vpack.c.bf16 %v4627_v63, %v4627_v63  ;;  %v4625_v2 = vmax.f32 %v4593_v46, 0.0  ;;  %v4555_v6 = vadd.f32 %v4466_v3, %v4133_v20  ;;  %v4138_v23 = vadd.f32 %v5830_v55, %v3460_v47  ;;  %v9342_v46 = vld [vmem:[#allocation23_spill] sm:$0xff] }
 0x20e   : > { %v4596_v10 = vadd.f32 %v8692_v29, %v4557_v31  ;;  %v4057_v53 = vpop.f32.mrf.mxu1  ;;  %v3465_v20 = vadd.f32 %v9342_v46, %v3087_v21 }
 0x20f   : > { %v5865_v1 = vpop.f32.mrf.mxu0  ;;  %4788 = vst.msk [vmem:[%s8712_s19 + $0x38] sm:$0xf] %vm4773_vm8, %v5401_v4  ;;  %v5399_v38 = vpack.c.bf16 %v4625_v2, %v4625_v2  ;;  %v4594_v40 = vadd.f32 %v8692_v29, %v4555_v6  ;;  %v4560_v59 = vadd.f32 %v5864_v13, %v4138_v23  ;;  %v4136_v12 = vadd.f32 %v4057_v53, %v3458_v22  ;;  %v9341_v13 = vld [vmem:[#allocation35_spill] sm:$0xff]  ;;  %v9343_v6 = vld [vmem:[#allocation40_spill] sm:$0xff] }
 0x210   : > { %v4628_v37 = vmax.f32 %v4596_v10, 0.0  ;;  %v5831_v5 = vpop.f32.mrf.mxu1  ;;  %v3085_v47 = vadd.f32 %v9341_v13, %v9340_v19 }
 0x211   : > { %v4482_v41 = vpop.f32.mrf.mxu0  ;;  %4786 = vst.msk [vmem:[%s8712_s19 + $0x30] sm:$0xf] %vm4773_vm8, %v5399_v38  ;;  %v4626_v50 = vmax.f32 %v4594_v40, 0.0  ;;  %v4599_v25 = vadd.f32 %v8692_v29, %v4560_v59  ;;  %v4558_v32 = vadd.f32 %v4479_v15, %v4136_v12  ;;  %v4139_v16 = vadd.f32 %v5831_v5, %v3461_v7  ;;  %v9348_v59 = vld [vmem:[#allocation29_spill] sm:$0xff]  ;;  %v9349_v12 = vld [vmem:[#allocation32_spill] sm:$0xff] }
 0x212   : > { %v5402_v3 = vpack.c.bf16 %v4628_v37, %v4628_v37  ;;  %v4060_v33 = vpop.f32.mrf.mxu1  ;;  %v3463_v23 = vadd.f32 %v9343_v6, %v3085_v47  ;;  %v9360_v6 = vld [vmem:[#allocation56_spill] sm:$0xff] }
 0x213   : > { %v5868_v36 = vpop.f32.mrf.mxu0  ;;  %v5400_v30 = vpack.c.bf16 %v4626_v50, %v4626_v50  ;;  %v4631_v48 = vmax.f32 %v4599_v25, 0.0  ;;  %v4597_v49 = vadd.f32 %v8692_v29, %v4558_v32  ;;  %v4561_v61 = vadd.f32 %v5865_v1, %v4139_v16  ;;  %v9344_v1 = vld [vmem:[#allocation27_spill] sm:$0xff]  ;;  %v9350_v32 = vld [vmem:[#allocation14_spill] sm:$0xff] }
 0x214   : > { %4789 = vst.msk [vmem:[%s8712_s19 + $0x3c] sm:$0xf] %vm4773_vm8, %v5402_v3  ;;  %v4137_v26 = vadd.f32 %v4060_v33, %v3459_v9  ;;  %v5834_v11 = vpop.f32.mrf.mxu1  ;;  %v3090_v7 = vadd.f32 %v9345_v39, %v9344_v1  ;;  %v9352_v9 = vld [vmem:[#allocation34_spill] sm:$0xff]  ;;  %v9361_v1 = vld [vmem:[#allocation31_spill] sm:$0xff]  ;;  %v9362_v39 = vld [vmem:[#allocation44_spill] sm:$0xff] }
 0x215   : > { %v4495_v17 = vpop.f32.mrf.mxu0  ;;  %4787 = vst.msk [vmem:[%s8712_s19 + $0x34] sm:$0xf] %vm4773_vm8, %v5400_v30  ;;  %v5405_v43 = vpack.c.bf16 %v4631_v48, %v4631_v48  ;;  %v4629_v34 = vmax.f32 %v4597_v49, 0.0  ;;  %v4600_v58 = vadd.f32 %v8692_v29, %v4561_v61  ;;  %v4142_v24 = vadd.f32 %v5834_v11, %v3464_v35  ;;  %v9354_v49 = vld [vmem:[#allocation47_spill] sm:$0xff] }
 0x216   : > { %v4559_v15 = vadd.f32 %v4482_v41, %v4137_v26  ;;  %v4073_v27 = vpop.f32.mrf.mxu1  ;;  %v3091_v41 = vadd.f32 %v9349_v12, %v9348_v59  ;;  %v3468_v16 = vadd.f32 %v9350_v32, %v3090_v7  ;;  %v3089_v35 = vadd.f32 %v9353_v52, %v9352_v9 }
 0x217   : > { %v5869_v63 = vpop.f32.mrf.mxu0  ;;  %4792 = vst.msk [vmem:[%s8712_s19 + $0x48] sm:$0xf] %vm4773_vm8, %v5405_v43  ;;  %v5403_v22 = vpack.c.bf16 %v4629_v34, %v4629_v34  ;;  %v4632_v31 = vmax.f32 %v4600_v58, 0.0  ;;  %v4564_v55 = vadd.f32 %v5868_v36, %v4142_v24  ;;  %v4140_v4 = vadd.f32 %v4073_v27, %v3462_v54  ;;  %v9351_v36 = vld [vmem:[#allocation24_spill] sm:$0xff]  ;;  %v9357_v58 = vld [vmem:[#allocation49_spill] sm:$0xff] }
 0x218   : > { %v4598_v44 = vadd.f32 %v8692_v29, %v4559_v15  ;;  %v5835_v28 = vpop.f32.mrf.mxu1  ;;  %v3466_v45 = vadd.f32 %v9351_v36, %v3088_v57  ;;  %v3469_v61 = vadd.f32 %v9354_v49, %v3091_v41  ;;  %v3467_v24 = vadd.f32 %v9357_v58, %v3089_v35  ;;  %v9367_v35 = vld [vmem:[#allocation58_spill] sm:$0xff] }
 0x219   : > { %v4498_v2 = vpop.f32.mrf.mxu0  ;;  %4790 = vst.msk [vmem:[%s8712_s19 + $0x40] sm:$0xf] %vm4773_vm8, %v5403_v22  ;;  %v5406_v62 = vpack.c.bf16 %v4632_v31, %v4632_v31  ;;  %v4603_v10 = vadd.f32 %v8692_v29, %v4564_v55  ;;  %v4562_v53 = vadd.f32 %v4495_v17, %v4140_v4  ;;  %v4143_v38 = vadd.f32 %v5835_v28, %v3465_v20  ;;  %v9355_v17 = vld [vmem:[#allocation21_spill] sm:$0xff]  ;;  %v9358_v55 = vld [vmem:[#allocation36_spill] sm:$0xff] }
 0x21a   : > { %v4630_v8 = vmax.f32 %v4598_v44, 0.0  ;;  %v4076_v60 = vpop.f32.mrf.mxu1  ;;  %v3094_v54 = vadd.f32 %v9356_v14, %v9355_v17  ;;  %v3095_v7 = vadd.f32 %v9362_v39, %v9361_v1 }
 0x21b   : > { %v5872_v40 = vpop.f32.mrf.mxu0  ;;  %4793 = vst.msk [vmem:[%s8712_s19 + $0x4c] sm:$0xf] %vm4773_vm8, %v5406_v62  ;;  %v4635_v42 = vmax.f32 %v4603_v10, 0.0  ;;  %v4601_v37 = vadd.f32 %v8692_v29, %v4562_v53  ;;  %v4565_v5 = vadd.f32 %v5869_v63, %v4143_v38  ;;  %v4141_v50 = vadd.f32 %v4076_v60, %v3463_v23  ;;  %v9363_v10 = vld [vmem:[#allocation37_spill] sm:$0xff]  ;;  %v9364_v53 = vld [vmem:[#allocation50_spill] sm:$0xff] }
 0x21c   : > { %v5404_v18 = vpack.c.bf16 %v4630_v8, %v4630_v8  ;;  %v5838_v51 = vpop.f32.mrf.mxu1  ;;  %v3472_v4 = vadd.f32 %v9358_v55, %v3094_v54  ;;  %v3093_v38 = vadd.f32 %v9364_v53, %v9363_v10 }
 0x21d   : > { %v4511_v25 = vpop.f32.mrf.mxu0  ;;  %v5409_v21 = vpack.c.bf16 %v4635_v42, %v4635_v42  ;;  %v4633_v3 = vmax.f32 %v4601_v37, 0.0  ;;  %v4604_v33 = vadd.f32 %v8692_v29, %v4565_v5  ;;  %v4563_v30 = vadd.f32 %v4498_v2, %v4141_v50  ;;  %v9359_v2 = vld [vmem:[#allocation33_spill] sm:$0xff]  ;;  %v9365_v37 = vld [vmem:[#allocation42_spill] sm:$0xff] }
 0x21e   : > { %4791 = vst.msk [vmem:[%s8712_s19 + $0x44] sm:$0xf] %vm4773_vm8, %v5404_v18  ;;  %v4146_v19 = vadd.f32 %v5838_v51, %v3468_v16  ;;  %v4089_v13 = vpop.f32.mrf.mxu1  ;;  %v3092_v23 = vadd.f32 %v9360_v6, %v9359_v2  ;;  %v9366_v50 = vld [vmem:[#allocation54_spill] sm:$0xff]  ;;  %v3471_v18 = vadd.f32 %v9367_v35, %v3093_v38 }
 0x21f   : > { %v5873_v48 = vpop.f32.mrf.mxu0  ;;  %4796 = vst.msk [vmem:[%s8712_s19 + $0x58] sm:$0xf] %vm4773_vm8, %v5409_v21  ;;  %v5407_v47 = vpack.c.bf16 %v4633_v3, %v4633_v3  ;;  %v4636_v26 = vmax.f32 %v4604_v33, 0.0  ;;  %v4602_v11 = vadd.f32 %v8692_v29, %v4563_v30  ;;  %v4144_v43 = vadd.f32 %v4089_v13, %v3466_v45 }
 0x220   : > { %v4568_v63 = vadd.f32 %v5872_v40, %v4146_v19  ;;  %v5839_v46 = vpop.f32.mrf.mxu1  ;;  %v3470_v5 = vadd.f32 %v9365_v37, %v3092_v23 }
 0x221   : > { %v4514_v34 = vpop.f32.mrf.mxu0  ;;  %4794 = vst.msk [vmem:[%s8712_s19 + $0x50] sm:$0xf] %vm4773_vm8, %v5407_v47  ;;  %v5410_v20 = vpack.c.bf16 %v4636_v26, %v4636_v26  ;;  %v4634_v15 = vmax.f32 %v4602_v11, 0.0  ;;  %v4566_v27 = vadd.f32 %v4511_v25, %v4144_v43  ;;  %v4147_v22 = vadd.f32 %v5839_v46, %v3469_v61 }
 0x222   : > { %v4607_v56 = vadd.f32 %v8692_v29, %v4568_v63  ;;  %v4092_v0 = vpop.f32.mrf.mxu1  ;;  %v3473_v25 = vadd.f32 %v9366_v50, %v3095_v7 }
 0x223   : > { %v5876_v31 = vpop.f32.mrf.mxu0  ;;  %4797 = vst.msk [vmem:[%s8712_s19 + $0x5c] sm:$0xf] %vm4773_vm8, %v5410_v20  ;;  %v5408_v57 = vpack.c.bf16 %v4634_v15, %v4634_v15  ;;  %v4605_v44 = vadd.f32 %v8692_v29, %v4566_v27  ;;  %v4569_v28 = vadd.f32 %v5873_v48, %v4147_v22  ;;  %v4145_v62 = vadd.f32 %v4092_v0, %v3467_v24 }
 0x224   : > { %v4639_v40 = vmax.f32 %v4607_v56, 0.0  ;;  %v5842_v59 = vpop.f32.mrf.mxu1 }
 0x225   : > { %v4527_v12 = vpop.f32.mrf.mxu0  ;;  %4795 = vst.msk [vmem:[%s8712_s19 + $0x54] sm:$0xf] %vm4773_vm8, %v5408_v57  ;;  %v4637_v41 = vmax.f32 %v4605_v44, 0.0  ;;  %v4608_v8 = vadd.f32 %v8692_v29, %v4569_v28  ;;  %v4567_v60 = vadd.f32 %v4514_v34, %v4145_v62  ;;  %v4150_v42 = vadd.f32 %v5842_v59, %v3472_v4 }
 0x226   : > { %v5413_v32 = vpack.c.bf16 %v4639_v40, %v4639_v40  ;;  %v4105_v16 = vpop.f32.mrf.mxu1 }
 0x227   : > { %v5411_v36 = vpack.c.bf16 %v4637_v41, %v4637_v41  ;;  %v4640_v45 = vmax.f32 %v4608_v8, 0.0  ;;  %v4606_v9 = vadd.f32 %v8692_v29, %v4567_v60  ;;  %v4572_v52 = vadd.f32 %v5876_v31, %v4150_v42  ;;  %v5877_v3 = vpop.f32.mrf.mxu0 }
 0x228   : > { %4800 = vst.msk [vmem:[%s8712_s19 + $0x68] sm:$0xf] %vm4773_vm8, %v5413_v32  ;;  %v4148_v51 = vadd.f32 %v4105_v16, %v3470_v5  ;;  %v5843_v21 = vpop.f32.mrf.mxu1 }
 0x229   : > { %4798 = vst.msk [vmem:[%s8712_s19 + $0x60] sm:$0xf] %vm4773_vm8, %v5411_v36  ;;  %v5414_v33 = vpack.c.bf16 %v4640_v45, %v4640_v45  ;;  %v4638_v30 = vmax.f32 %v4606_v9, 0.0  ;;  %v4611_v48 = vadd.f32 %v8692_v29, %v4572_v52  ;;  %v4151_v49 = vadd.f32 %v5843_v21, %v3473_v25  ;;  %v4530_v26 = vpop.f32.mrf.mxu0 }
 0x22a   : > { %v4570_v61 = vadd.f32 %v4527_v12, %v4148_v51  ;;  %v4108_v17 = vpop.f32.mrf.mxu1 }
 0x22b   : > { %4801 = vst.msk [vmem:[%s8712_s19 + $0x6c] sm:$0xf] %vm4773_vm8, %v5414_v33  ;;  %v5412_v14 = vpack.c.bf16 %v4638_v30, %v4638_v30  ;;  %v4643_v54 = vmax.f32 %v4611_v48, 0.0  ;;  %v4573_v19 = vadd.f32 %v5877_v3, %v4151_v49  ;;  %v4149_v13 = vadd.f32 %v4108_v17, %v3471_v18 }
 0x22c   : > { %v4609_v47 = vadd.f32 %v8692_v29, %v4570_v61 }
 0x22d   : > { %4799 = vst.msk [vmem:[%s8712_s19 + $0x64] sm:$0xf] %vm4773_vm8, %v5412_v14  ;;  %v5417_v11 = vpack.c.bf16 %v4643_v54, %v4643_v54  ;;  %v4612_v43 = vadd.f32 %v8692_v29, %v4573_v19  ;;  %v4571_v34 = vadd.f32 %v4530_v26, %v4149_v13 }
 0x22e   : > { %v4641_v58 = vmax.f32 %v4609_v47, 0.0 }
 0x22f   : > { %4804 = vst.msk [vmem:[%s8712_s19 + $0x78] sm:$0xf] %vm4773_vm8, %v5417_v11  ;;  %v4644_v24 = vmax.f32 %v4612_v43, 0.0  ;;  %v4610_v63 = vadd.f32 %v8692_v29, %v4571_v34 }
 0x230   : > { %v5415_v46 = vpack.c.bf16 %v4641_v58, %v4641_v58 }
 0x231   : > { %v5418_v20 = vpack.c.bf16 %v4644_v24, %v4644_v24  ;;  %v4642_v15 = vmax.f32 %v4610_v63, 0.0 }
 0x232   : > { %4802 = vst.msk [vmem:[%s8712_s19 + $0x70] sm:$0xf] %vm4773_vm8, %v5415_v46 }
 0x233   : > { %4805 = vst.msk [vmem:[%s8712_s19 + $0x7c] sm:$0xf] %vm4773_vm8, %v5418_v20  ;;  %v5416_v27 = vpack.c.bf16 %v4642_v15, %v4642_v15 }
 0x235   : > { %4803 = vst.msk [vmem:[%s8712_s19 + $0x74] sm:$0xf] %vm4773_vm8, %v5416_v27 }
 0x236 PF: > { %s13_s14 = sadd.s32 1, %s5985_s14   ;;  %s9368_s12 = smov %s5981_s13 }
 0x237   : > { %p10_p5 = scmp.ge.s32.totalorder %s13_s14, 4   ;;  %s9369_s13 = smov %s9371_s15 }
 0x239   :  { %12 = sbr.rel (!%p10_p5) target bundleno = 2 (0x2), region = 73 }

</bundles_post_ra>
